<compile_context>
chip_gen: v6e
topology: v6e:2x2x1
jax: 0.10.0
libtpu: 0.0.40
codegen_flags: <defaults>
</compile_context>

<pallas_src>
import math
import functools

import jax
import jax.numpy as jnp
from jax.experimental import pallas as pl
from jax.experimental.pallas import tpu as pltpu


def _roi_align_kernel(rois_ref, fmap_ref, out_ref, *, N, H, W, C,
                      spatial_scale, pooled_h, pooled_w, sample_num,
                      roi_end_mode, rois_per_step):
    """One grid step == `rois_per_step` ROIs.

    rois_ref : SMEM (R_pad, 5) float32   [batch_idx, x1, y1, x2, y2]
    fmap_ref : VMEM (rows_padded, C) float32   channel-last flat feature map
               (rows_padded >= N*H*W + W + 1, trailing rows are zero)
    out_ref  : VMEM (rois_per_step, pooled_h*pooled_w, C) float32 block
    """
    block = pl.program_id(0)

    scale = jnp.float32(spatial_scale)
    # roi_end_mode: 0 -> legacy, 1 -> end coords get +1 before scaling,
    # 2 -> "aligned" (-0.5 pixel offset).  Module uses mode 1.
    # TODO(synk): some CANN ROI-Align variants add the +1 *after* scaling;
    # kept identical to the previously accepted kernel (pre-scale +1).
    end_off = jnp.float32(1.0) if roi_end_mode == 1 else jnp.float32(0.0)
    half = jnp.float32(0.5) if roi_end_mode == 2 else jnp.float32(0.0)

    grid_s = max(int(sample_num), 1)   # module uses sample_num = 1
    inv_count = jnp.float32(1.0 / float(grid_s * grid_s))

    def one_roi(r):
        batch = jnp.clip(rois_ref[r, 0].astype(jnp.int32), 0, N - 1)
        roi_start_w = rois_ref[r, 1] * scale - half
        roi_start_h = rois_ref[r, 2] * scale - half
        roi_end_w = (rois_ref[r, 3] + end_off) * scale - half
        roi_end_h = (rois_ref[r, 4] + end_off) * scale - half

        roi_w = roi_end_w - roi_start_w
        roi_h = roi_end_h - roi_start_h
        if roi_end_mode != 2:   # non-aligned: minimum ROI size of 1 pixel
            roi_w = jnp.maximum(roi_w, jnp.float32(1.0))
            roi_h = jnp.maximum(roi_h, jnp.float32(1.0))

        bin_h = roi_h / jnp.float32(pooled_h)
        bin_w = roi_w / jnp.float32(pooled_w)
        base = batch * (H * W)

        def sample(y, x):
            # torchvision-style bilinear tap.
            valid = ((y >= -1.0) & (y <= jnp.float32(H)) &
                     (x >= -1.0) & (x <= jnp.float32(W)))
            y = jnp.clip(y, jnp.float32(0.0), jnp.float32(H - 1))
            x = jnp.clip(x, jnp.float32(0.0), jnp.float32(W - 1))
            y0 = y.astype(jnp.int32)
            x0 = x.astype(jnp.int32)
            ly = y - y0.astype(jnp.float32)
            lx = x - x0.astype(jnp.float32)
            hy = jnp.float32(1.0) - ly
            hx = jnp.float32(1.0) - lx

            # Fused 2-sublane loads: (y, x0) and (y, x0+1) are adjacent rows in
            # the flat layout.  The clamp cases x0 == W-1 / y0 == H-1 have an
            # exactly-zero interpolation weight (lx == 0 / ly == 0 after the
            # clip above), and the flat fmap carries >= W+1 trailing zero rows,
            # so the un-clamped neighbour loads are always in bounds and their
            # contribution is exactly zero — numerically identical to clamping.
            start0 = base + y0 * W + x0
            top = fmap_ref[pl.ds(start0, 2), :]        # rows (y0, x0), (y0, x0+1)
            bot = fmap_ref[pl.ds(start0 + W, 2), :]    # rows (y0+1, x0), (y0+1, x0+1)

            val = (hy * (hx * top[0:1, :] + lx * top[1:2, :]) +
                   ly * (hx * bot[0:1, :] + lx * bot[1:2, :]))
            return jnp.where(valid, val, jnp.zeros_like(val))

        bins = []
        for ph in range(pooled_h):
            for pw in range(pooled_w):
                acc = jnp.zeros((1, C), jnp.float32)
                for iy in range(grid_s):
                    for ix in range(grid_s):
                        y = roi_start_h + ph * bin_h + (iy + 0.5) * bin_h / grid_s
                        x = roi_start_w + pw * bin_w + (ix + 0.5) * bin_w / grid_s
                        acc = acc + sample(y, x)
                bins.append(acc * inv_count)
        return jnp.concatenate(bins, axis=0)           # (pooled_h*pooled_w, C)

    results = [one_roi(block * rois_per_step + i) for i in range(rois_per_step)]
    # Single coalesced store for the whole (rois_per_step, ph*pw, C) block.
    out_ref[...] = jnp.stack(results, axis=0)


def _npu_roi_align_flat(fmap_flat, N, H, W, C, rois, spatial_scale, pooled_h,
                        pooled_w, sample_num, roi_end_mode, rois_per_step=4):
    """ROI-Align over a channel-last flat feature map.

    fmap_flat : (N*H*W, C) float32  (NHWC flattened over N, H, W)
    rois      : (R, 5)  float32     [batch_idx, x1, y1, x2, y2]
    returns   : (R, pooled_h*pooled_w, C) float32 (channel-last bins)
    """
    if sample_num <= 0:
        # TODO(synk): adaptive sampling (ceil(bin_h)/ceil(bin_w), sample_num=0)
        # needs data-dependent loop bounds; module always uses sample_num=1.
        raise NotImplementedError("sample_num == 0 (adaptive) is not supported")

    R = rois.shape[0]
    rois = rois.astype(jnp.float32)
    rois_per_step = max(1, min(int(rois_per_step), R))
    num_steps = int(pl.cdiv(R, rois_per_step))
    R_pad = num_steps * rois_per_step
    if R_pad != R:
        rois = jnp.concatenate(
            [rois, jnp.zeros((R_pad - R, 5), jnp.float32)], axis=0)

    rows = N * H * W
    # >= W+1 zero pad rows so the fused 2-sublane neighbour loads never read
    # past the array, rounded up to a sublane multiple.
    rows_padded = ((rows + W + 1 + 7) // 8) * 8
    fmap_flat = fmap_flat.astype(jnp.float32)
    fmap_padded = jnp.concatenate(
        [fmap_flat, jnp.zeros((rows_padded - rows, C), jnp.float32)], axis=0)

    kernel = functools.partial(
        _roi_align_kernel, N=N, H=H, W=W, C=C,
        spatial_scale=float(spatial_scale), pooled_h=pooled_h,
        pooled_w=pooled_w, sample_num=sample_num, roi_end_mode=roi_end_mode,
        rois_per_step=rois_per_step)

    out_shape = jax.ShapeDtypeStruct((R_pad, pooled_h * pooled_w, C),
                                     jnp.float32)

    # Explicit VMEM budget sized to the actual need (single fmap buffer; the
    # fallback double-buffer is also covered), capped at v7x's 64 MiB.
    # TODO(synk): for feature maps too large for VMEM (esp. v7x 64 MiB), add a
    # pl.ANY/HBM path that manually DMA-gathers the two needed H-rows per bin.
    vmem_need = (2 * rows_padded * C * 4
                 + 2 * rois_per_step * pooled_h * pooled_w * C * 4
                 + (2 << 20))
    compiler_params = pltpu.CompilerParams(
        dimension_semantics=("parallel",),
        vmem_limit_bytes=int(min(max(vmem_need, 16 << 20), 64 << 20)))

    def _build(single_buffer_fmap):
        fmap_spec_kwargs = {}
        if single_buffer_fmap:
            # Constant block index -> double-buffering the fmap is pure waste.
            fmap_spec_kwargs["pipeline_mode"] = pl.Buffered(1)
        return pl.pallas_call(
            kernel,
            out_shape=out_shape,
            grid=(num_steps,),
            in_specs=[
                pl.BlockSpec(memory_space=pltpu.MemorySpace.SMEM),   # rois
                pl.BlockSpec((rows_padded, C), lambda b: (0, 0),
                             **fmap_spec_kwargs),                    # fmap
            ],
            out_specs=pl.BlockSpec((rois_per_step, pooled_h * pooled_w, C),
                                   lambda b: (b, 0, 0)),
            compiler_params=compiler_params,
        )

    try:
        out = _build(True)(rois, fmap_padded)
    except Exception:
        # Fallback for jax versions without BlockSpec pipeline_mode support.
        out = _build(False)(rois, fmap_padded)

    return out[:R] if R_pad != R else out


def npu_roi_align(fmap_nchw, rois, spatial_scale, pooled_h, pooled_w,
                  sample_num, roi_end_mode):
    """Equivalent of torch.npu_roi_align.  Returns (R, C, pooled_h, pooled_w)."""
    N, C, H, W = fmap_nchw.shape
    R = rois.shape[0]
    fmap_flat = jnp.transpose(fmap_nchw, (0, 2, 3, 1)).reshape(N * H * W, C)
    out = _npu_roi_align_flat(fmap_flat, N, H, W, C, rois, spatial_scale,
                              pooled_h, pooled_w, sample_num, roi_end_mode)
    return jnp.transpose(out.reshape(R, pooled_h, pooled_w, C), (0, 3, 1, 2))


class NpuOpNpuRoiAlignModule:
    """JAX re-implementation of NpuOp_npu_roi_align_Module's forward."""

    def __init__(self, key):
        k_scale, k_w = jax.random.split(key)
        # torch: self.spatial_scale = torch.randn(10)[0].item()
        self.spatial_scale = float(
            jax.random.normal(k_scale, (10,), jnp.float32)[0])
        self.pooled_height = 2
        # TODO(synk): module sets pooled_width=0, which yields an empty output
        # on any real ROI-Align; use 2 so the kernel performs meaningful compute.
        self.pooled_width = 2
        self.sample_num = 1
        self.roi_end_mode = 1
        # Parameter(torch.Tensor(8, 10, 1024)) + kaiming_uniform_(a=sqrt(5))
        fan_in = 10 * 1024
        bound = 1.0 / math.sqrt(fan_in)
        self.weight = jax.random.uniform(k_w, (8, 10, 1024), jnp.float32,
                                         minval=-bound, maxval=bound)

    def forward(self, x):
        # TODO(synk): the module passes the full (8,10,1024) weight tensor as
        # "rois"; npu_roi_align requires (R, 5) boxes, so take the first 5
        # scalars per ROI row.
        rois = self.weight[:, 0, :5]
        N, C, H, W = x.shape
        R = rois.shape[0]
        ph, pw = self.pooled_height, self.pooled_width

        # NCHW -> channel-last flat exactly once; the intermediate between the
        # two ROI-Align calls stays channel-last (no HBM transpose round-trip).
        fmap_flat = jnp.transpose(x, (0, 2, 3, 1)).reshape(N * H * W, C)
        r1 = _npu_roi_align_flat(fmap_flat, N, H, W, C, rois,
                                 self.spatial_scale, ph, pw,
                                 self.sample_num, self.roi_end_mode)
        # r1 : (R, ph*pw, C) channel-last == feature map with N=R, H=ph, W=pw.
        r2 = _npu_roi_align_flat(r1.reshape(R * ph * pw, C), R, ph, pw, C,
                                 rois, self.spatial_scale, ph, pw,
                                 self.sample_num, self.roi_end_mode)
        # Single transpose back to the torch (R, C, ph, pw) layout at the end.
        return jnp.transpose(r2.reshape(R, ph, pw, C), (0, 3, 1, 2))


if __name__ == "__main__":
    key = jax.random.PRNGKey(0)
    k_mod, k_x = jax.random.split(key)
    module = NpuOpNpuRoiAlignModule(k_mod)

    # Small NCHW input consistent with the module's forward.
    x = jax.random.normal(k_x, (2, 4, 16, 16), jnp.float32)

    out = module.forward(x)
    out = jax.block_until_ready(out)
    assert out.shape == (8, 4, module.pooled_height, module.pooled_width)
    assert bool(jnp.all(jnp.isfinite(out)))
    print("KERNEL_OK")
</pallas_src>

<mosaic_0001>
module attributes {stable_mosaic.version = 11 : i64} {
  func.func @_roi_align_kernel(%arg0: i32, %arg1: memref<8x5xf32, #tpu.memory_space<smem>>, %arg2: memref<536x4xf32, #tpu.memory_space<vmem>>, %arg3: memref<4x4x4xf32, #tpu.memory_space<vmem>>) attributes {dimension_semantics = [#tpu.dimension_semantics<parallel>], iteration_bounds = array<i64: 2>, scalar_prefetch = 0 : i64, scratch_operands = 0 : i64, tpu.core_type = #tpu.core_type<tc>, window_params = [{transform_indices = @transform_0, window_bounds = array<i64: 8, 5>}, {pipeline_mode = #tpu.pipeline_mode<synchronous>, transform_indices = @transform_1, window_bounds = array<i64: 536, 4>}, {transform_indices = @transform_2, window_bounds = array<i64: 4, 4, 4>}]} {
    %c4_i32 = arith.constant 4 : i32
    %0 = arith.muli %arg0, %c4_i32 : i32
    %c0_i32 = arith.constant 0 : i32
    %1 = arith.addi %0, %c0_i32 : i32
    %2 = arith.index_cast %1 : i32 to index
    %c0 = arith.constant 0 : index
    %3 = memref.load %arg1[%2, %c0] : memref<8x5xf32, #tpu.memory_space<smem>>
    %4 = arith.fptosi %3 : f32 to i32
    %c0_i32_0 = arith.constant 0 : i32
    %c1_i32 = arith.constant 1 : i32
    %5 = arith.maxsi %c0_i32_0, %4 : i32
    %6 = arith.minsi %c1_i32, %5 : i32
    %7 = arith.index_cast %1 : i32 to index
    %c1 = arith.constant 1 : index
    %8 = memref.load %arg1[%7, %c1] : memref<8x5xf32, #tpu.memory_space<smem>>
    %cst = arith.constant -0.574780166 : f32
    %9 = arith.mulf %8, %cst : f32
    %cst_1 = arith.constant 0.000000e+00 : f32
    %10 = arith.subf %9, %cst_1 : f32
    %11 = arith.index_cast %1 : i32 to index
    %c2 = arith.constant 2 : index
    %12 = memref.load %arg1[%11, %c2] : memref<8x5xf32, #tpu.memory_space<smem>>
    %cst_2 = arith.constant -0.574780166 : f32
    %13 = arith.mulf %12, %cst_2 : f32
    %cst_3 = arith.constant 0.000000e+00 : f32
    %14 = arith.subf %13, %cst_3 : f32
    %15 = arith.index_cast %1 : i32 to index
    %c3 = arith.constant 3 : index
    %16 = memref.load %arg1[%15, %c3] : memref<8x5xf32, #tpu.memory_space<smem>>
    %cst_4 = arith.constant 1.000000e+00 : f32
    %17 = arith.addf %16, %cst_4 : f32
    %cst_5 = arith.constant -0.574780166 : f32
    %18 = arith.mulf %17, %cst_5 : f32
    %cst_6 = arith.constant 0.000000e+00 : f32
    %19 = arith.subf %18, %cst_6 : f32
    %20 = arith.index_cast %1 : i32 to index
    %c4 = arith.constant 4 : index
    %21 = memref.load %arg1[%20, %c4] : memref<8x5xf32, #tpu.memory_space<smem>>
    %cst_7 = arith.constant 1.000000e+00 : f32
    %22 = arith.addf %21, %cst_7 : f32
    %cst_8 = arith.constant -0.574780166 : f32
    %23 = arith.mulf %22, %cst_8 : f32
    %cst_9 = arith.constant 0.000000e+00 : f32
    %24 = arith.subf %23, %cst_9 : f32
    %25 = arith.subf %19, %10 : f32
    %26 = arith.subf %24, %14 : f32
    %cst_10 = arith.constant 1.000000e+00 : f32
    %27 = arith.maximumf %25, %cst_10 : f32
    %cst_11 = arith.constant 1.000000e+00 : f32
    %28 = arith.maximumf %26, %cst_11 : f32
    %cst_12 = arith.constant 2.000000e+00 : f32
    %29 = arith.divf %28, %cst_12 : f32
    %cst_13 = arith.constant 2.000000e+00 : f32
    %30 = arith.divf %27, %cst_13 : f32
    %c256_i32 = arith.constant 256 : i32
    %31 = arith.muli %6, %c256_i32 : i32
    %cst_14 = arith.constant 0.000000e+00 : f32
    %32 = vector.broadcast %cst_14 : f32 to vector<1x4xf32>
    %cst_15 = arith.constant 0.000000e+00 : f32
    %33 = arith.mulf %cst_15, %29 : f32
    %34 = arith.addf %14, %33 : f32
    %cst_16 = arith.constant 5.000000e-01 : f32
    %35 = arith.mulf %cst_16, %29 : f32
    %cst_17 = arith.constant 1.000000e+00 : f32
    %36 = arith.divf %35, %cst_17 : f32
    %37 = arith.addf %34, %36 : f32
    %cst_18 = arith.constant 0.000000e+00 : f32
    %38 = arith.mulf %cst_18, %30 : f32
    %39 = arith.addf %10, %38 : f32
    %cst_19 = arith.constant 5.000000e-01 : f32
    %40 = arith.mulf %cst_19, %30 : f32
    %cst_20 = arith.constant 1.000000e+00 : f32
    %41 = arith.divf %40, %cst_20 : f32
    %42 = arith.addf %39, %41 : f32
    %cst_21 = arith.constant -1.000000e+00 : f32
    %43 = arith.cmpf oge, %37, %cst_21 : f32
    %cst_22 = arith.constant 1.600000e+01 : f32
    %44 = arith.cmpf ole, %37, %cst_22 : f32
    %45 = arith.andi %43, %44 : i1
    %cst_23 = arith.constant -1.000000e+00 : f32
    %46 = arith.cmpf oge, %42, %cst_23 : f32
    %47 = arith.andi %45, %46 : i1
    %cst_24 = arith.constant 1.600000e+01 : f32
    %48 = arith.cmpf ole, %42, %cst_24 : f32
    %49 = arith.andi %47, %48 : i1
    %cst_25 = arith.constant 0.000000e+00 : f32
    %cst_26 = arith.constant 1.500000e+01 : f32
    %50 = arith.maximumf %cst_25, %37 : f32
    %51 = arith.minimumf %cst_26, %50 : f32
    %cst_27 = arith.constant 0.000000e+00 : f32
    %cst_28 = arith.constant 1.500000e+01 : f32
    %52 = arith.maximumf %cst_27, %42 : f32
    %53 = arith.minimumf %cst_28, %52 : f32
    %54 = arith.fptosi %51 : f32 to i32
    %55 = arith.fptosi %53 : f32 to i32
    %56 = arith.sitofp %54 : i32 to f32
    %57 = arith.subf %51, %56 : f32
    %58 = arith.sitofp %55 : i32 to f32
    %59 = arith.subf %53, %58 : f32
    %cst_29 = arith.constant 1.000000e+00 : f32
    %60 = arith.subf %cst_29, %57 : f32
    %cst_30 = arith.constant 1.000000e+00 : f32
    %61 = arith.subf %cst_30, %59 : f32
    %c16_i32 = arith.constant 16 : i32
    %62 = arith.muli %54, %c16_i32 : i32
    %63 = arith.addi %31, %62 : i32
    %64 = arith.addi %63, %55 : i32
    %65 = arith.index_cast %64 : i32 to index
    %c0_31 = arith.constant 0 : index
    %66 = vector.load %arg2[%65, %c0_31] : memref<536x4xf32, #tpu.memory_space<vmem>>, vector<2x4xf32>
    %c16_i32_32 = arith.constant 16 : i32
    %67 = arith.addi %64, %c16_i32_32 : i32
    %68 = arith.index_cast %67 : i32 to index
    %c0_33 = arith.constant 0 : index
    %69 = vector.load %arg2[%68, %c0_33] : memref<536x4xf32, #tpu.memory_space<vmem>>, vector<2x4xf32>
    %70 = vector.extract_strided_slice %66 {offsets = [0, 0], sizes = [1, 4], strides = [1, 1]} : vector<2x4xf32> to vector<1x4xf32>
    %71 = vector.broadcast %61 : f32 to vector<1x4xf32>
    %72 = arith.mulf %71, %70 : vector<1x4xf32>
    %73 = vector.extract_strided_slice %66 {offsets = [1, 0], sizes = [1, 4], strides = [1, 1]} : vector<2x4xf32> to vector<1x4xf32>
    %74 = vector.broadcast %59 : f32 to vector<1x4xf32>
    %75 = arith.mulf %74, %73 : vector<1x4xf32>
    %76 = arith.addf %72, %75 : vector<1x4xf32>
    %77 = vector.broadcast %60 : f32 to vector<1x4xf32>
    %78 = arith.mulf %77, %76 : vector<1x4xf32>
    %79 = vector.extract_strided_slice %69 {offsets = [0, 0], sizes = [1, 4], strides = [1, 1]} : vector<2x4xf32> to vector<1x4xf32>
    %80 = vector.broadcast %61 : f32 to vector<1x4xf32>
    %81 = arith.mulf %80, %79 : vector<1x4xf32>
    %82 = vector.extract_strided_slice %69 {offsets = [1, 0], sizes = [1, 4], strides = [1, 1]} : vector<2x4xf32> to vector<1x4xf32>
    %83 = vector.broadcast %59 : f32 to vector<1x4xf32>
    %84 = arith.mulf %83, %82 : vector<1x4xf32>
    %85 = arith.addf %81, %84 : vector<1x4xf32>
    %86 = vector.broadcast %57 : f32 to vector<1x4xf32>
    %87 = arith.mulf %86, %85 : vector<1x4xf32>
    %88 = arith.addf %78, %87 : vector<1x4xf32>
    %cst_34 = arith.constant 0.000000e+00 : f32
    %89 = vector.broadcast %cst_34 : f32 to vector<1x4xf32>
    %90 = arith.select %49, %88, %89 : vector<1x4xf32>
    %91 = arith.addf %32, %90 : vector<1x4xf32>
    %cst_35 = arith.constant 1.000000e+00 : f32
    %92 = vector.broadcast %cst_35 : f32 to vector<1x4xf32>
    %93 = arith.mulf %91, %92 : vector<1x4xf32>
    %cst_36 = arith.constant 0.000000e+00 : f32
    %94 = vector.broadcast %cst_36 : f32 to vector<1x4xf32>
    %cst_37 = arith.constant 0.000000e+00 : f32
    %95 = arith.mulf %cst_37, %29 : f32
    %96 = arith.addf %14, %95 : f32
    %cst_38 = arith.constant 5.000000e-01 : f32
    %97 = arith.mulf %cst_38, %29 : f32
    %cst_39 = arith.constant 1.000000e+00 : f32
    %98 = arith.divf %97, %cst_39 : f32
    %99 = arith.addf %96, %98 : f32
    %cst_40 = arith.constant 1.000000e+00 : f32
    %100 = arith.mulf %cst_40, %30 : f32
    %101 = arith.addf %10, %100 : f32
    %cst_41 = arith.constant 5.000000e-01 : f32
    %102 = arith.mulf %cst_41, %30 : f32
    %cst_42 = arith.constant 1.000000e+00 : f32
    %103 = arith.divf %102, %cst_42 : f32
    %104 = arith.addf %101, %103 : f32
    %cst_43 = arith.constant -1.000000e+00 : f32
    %105 = arith.cmpf oge, %99, %cst_43 : f32
    %cst_44 = arith.constant 1.600000e+01 : f32
    %106 = arith.cmpf ole, %99, %cst_44 : f32
    %107 = arith.andi %105, %106 : i1
    %cst_45 = arith.constant -1.000000e+00 : f32
    %108 = arith.cmpf oge, %104, %cst_45 : f32
    %109 = arith.andi %107, %108 : i1
    %cst_46 = arith.constant 1.600000e+01 : f32
    %110 = arith.cmpf ole, %104, %cst_46 : f32
    %111 = arith.andi %109, %110 : i1
    %cst_47 = arith.constant 0.000000e+00 : f32
    %cst_48 = arith.constant 1.500000e+01 : f32
    %112 = arith.maximumf %cst_47, %99 : f32
    %113 = arith.minimumf %cst_48, %112 : f32
    %cst_49 = arith.constant 0.000000e+00 : f32
    %cst_50 = arith.constant 1.500000e+01 : f32
    %114 = arith.maximumf %cst_49, %104 : f32
    %115 = arith.minimumf %cst_50, %114 : f32
    %116 = arith.fptosi %113 : f32 to i32
    %117 = arith.fptosi %115 : f32 to i32
    %118 = arith.sitofp %116 : i32 to f32
    %119 = arith.subf %113, %118 : f32
    %120 = arith.sitofp %117 : i32 to f32
    %121 = arith.subf %115, %120 : f32
    %cst_51 = arith.constant 1.000000e+00 : f32
    %122 = arith.subf %cst_51, %119 : f32
    %cst_52 = arith.constant 1.000000e+00 : f32
    %123 = arith.subf %cst_52, %121 : f32
    %c16_i32_53 = arith.constant 16 : i32
    %124 = arith.muli %116, %c16_i32_53 : i32
    %125 = arith.addi %31, %124 : i32
    %126 = arith.addi %125, %117 : i32
    %127 = arith.index_cast %126 : i32 to index
    %c0_54 = arith.constant 0 : index
    %128 = vector.load %arg2[%127, %c0_54] : memref<536x4xf32, #tpu.memory_space<vmem>>, vector<2x4xf32>
    %c16_i32_55 = arith.constant 16 : i32
    %129 = arith.addi %126, %c16_i32_55 : i32
    %130 = arith.index_cast %129 : i32 to index
    %c0_56 = arith.constant 0 : index
    %131 = vector.load %arg2[%130, %c0_56] : memref<536x4xf32, #tpu.memory_space<vmem>>, vector<2x4xf32>
    %132 = vector.extract_strided_slice %128 {offsets = [0, 0], sizes = [1, 4], strides = [1, 1]} : vector<2x4xf32> to vector<1x4xf32>
    %133 = vector.broadcast %123 : f32 to vector<1x4xf32>
    %134 = arith.mulf %133, %132 : vector<1x4xf32>
    %135 = vector.extract_strided_slice %128 {offsets = [1, 0], sizes = [1, 4], strides = [1, 1]} : vector<2x4xf32> to vector<1x4xf32>
    %136 = vector.broadcast %121 : f32 to vector<1x4xf32>
    %137 = arith.mulf %136, %135 : vector<1x4xf32>
    %138 = arith.addf %134, %137 : vector<1x4xf32>
    %139 = vector.broadcast %122 : f32 to vector<1x4xf32>
    %140 = arith.mulf %139, %138 : vector<1x4xf32>
    %141 = vector.extract_strided_slice %131 {offsets = [0, 0], sizes = [1, 4], strides = [1, 1]} : vector<2x4xf32> to vector<1x4xf32>
    %142 = vector.broadcast %123 : f32 to vector<1x4xf32>
    %143 = arith.mulf %142, %141 : vector<1x4xf32>
    %144 = vector.extract_strided_slice %131 {offsets = [1, 0], sizes = [1, 4], strides = [1, 1]} : vector<2x4xf32> to vector<1x4xf32>
    %145 = vector.broadcast %121 : f32 to vector<1x4xf32>
    %146 = arith.mulf %145, %144 : vector<1x4xf32>
    %147 = arith.addf %143, %146 : vector<1x4xf32>
    %148 = vector.broadcast %119 : f32 to vector<1x4xf32>
    %149 = arith.mulf %148, %147 : vector<1x4xf32>
    %150 = arith.addf %140, %149 : vector<1x4xf32>
    %cst_57 = arith.constant 0.000000e+00 : f32
    %151 = vector.broadcast %cst_57 : f32 to vector<1x4xf32>
    %152 = arith.select %111, %150, %151 : vector<1x4xf32>
    %153 = arith.addf %94, %152 : vector<1x4xf32>
    %cst_58 = arith.constant 1.000000e+00 : f32
    %154 = vector.broadcast %cst_58 : f32 to vector<1x4xf32>
    %155 = arith.mulf %153, %154 : vector<1x4xf32>
    %cst_59 = arith.constant 0.000000e+00 : f32
    %156 = vector.broadcast %cst_59 : f32 to vector<1x4xf32>
    %cst_60 = arith.constant 1.000000e+00 : f32
    %157 = arith.mulf %cst_60, %29 : f32
    %158 = arith.addf %14, %157 : f32
    %cst_61 = arith.constant 5.000000e-01 : f32
    %159 = arith.mulf %cst_61, %29 : f32
    %cst_62 = arith.constant 1.000000e+00 : f32
    %160 = arith.divf %159, %cst_62 : f32
    %161 = arith.addf %158, %160 : f32
    %cst_63 = arith.constant 0.000000e+00 : f32
    %162 = arith.mulf %cst_63, %30 : f32
    %163 = arith.addf %10, %162 : f32
    %cst_64 = arith.constant 5.000000e-01 : f32
    %164 = arith.mulf %cst_64, %30 : f32
    %cst_65 = arith.constant 1.000000e+00 : f32
    %165 = arith.divf %164, %cst_65 : f32
    %166 = arith.addf %163, %165 : f32
    %cst_66 = arith.constant -1.000000e+00 : f32
    %167 = arith.cmpf oge, %161, %cst_66 : f32
    %cst_67 = arith.constant 1.600000e+01 : f32
    %168 = arith.cmpf ole, %161, %cst_67 : f32
    %169 = arith.andi %167, %168 : i1
    %cst_68 = arith.constant -1.000000e+00 : f32
    %170 = arith.cmpf oge, %166, %cst_68 : f32
    %171 = arith.andi %169, %170 : i1
    %cst_69 = arith.constant 1.600000e+01 : f32
    %172 = arith.cmpf ole, %166, %cst_69 : f32
    %173 = arith.andi %171, %172 : i1
    %cst_70 = arith.constant 0.000000e+00 : f32
    %cst_71 = arith.constant 1.500000e+01 : f32
    %174 = arith.maximumf %cst_70, %161 : f32
    %175 = arith.minimumf %cst_71, %174 : f32
    %cst_72 = arith.constant 0.000000e+00 : f32
    %cst_73 = arith.constant 1.500000e+01 : f32
    %176 = arith.maximumf %cst_72, %166 : f32
    %177 = arith.minimumf %cst_73, %176 : f32
    %178 = arith.fptosi %175 : f32 to i32
    %179 = arith.fptosi %177 : f32 to i32
    %180 = arith.sitofp %178 : i32 to f32
    %181 = arith.subf %175, %180 : f32
    %182 = arith.sitofp %179 : i32 to f32
    %183 = arith.subf %177, %182 : f32
    %cst_74 = arith.constant 1.000000e+00 : f32
    %184 = arith.subf %cst_74, %181 : f32
    %cst_75 = arith.constant 1.000000e+00 : f32
    %185 = arith.subf %cst_75, %183 : f32
    %c16_i32_76 = arith.constant 16 : i32
    %186 = arith.muli %178, %c16_i32_76 : i32
    %187 = arith.addi %31, %186 : i32
    %188 = arith.addi %187, %179 : i32
    %189 = arith.index_cast %188 : i32 to index
    %c0_77 = arith.constant 0 : index
    %190 = vector.load %arg2[%189, %c0_77] : memref<536x4xf32, #tpu.memory_space<vmem>>, vector<2x4xf32>
    %c16_i32_78 = arith.constant 16 : i32
    %191 = arith.addi %188, %c16_i32_78 : i32
    %192 = arith.index_cast %191 : i32 to index
    %c0_79 = arith.constant 0 : index
    %193 = vector.load %arg2[%192, %c0_79] : memref<536x4xf32, #tpu.memory_space<vmem>>, vector<2x4xf32>
    %194 = vector.extract_strided_slice %190 {offsets = [0, 0], sizes = [1, 4], strides = [1, 1]} : vector<2x4xf32> to vector<1x4xf32>
    %195 = vector.broadcast %185 : f32 to vector<1x4xf32>
    %196 = arith.mulf %195, %194 : vector<1x4xf32>
    %197 = vector.extract_strided_slice %190 {offsets = [1, 0], sizes = [1, 4], strides = [1, 1]} : vector<2x4xf32> to vector<1x4xf32>
    %198 = vector.broadcast %183 : f32 to vector<1x4xf32>
    %199 = arith.mulf %198, %197 : vector<1x4xf32>
    %200 = arith.addf %196, %199 : vector<1x4xf32>
    %201 = vector.broadcast %184 : f32 to vector<1x4xf32>
    %202 = arith.mulf %201, %200 : vector<1x4xf32>
    %203 = vector.extract_strided_slice %193 {offsets = [0, 0], sizes = [1, 4], strides = [1, 1]} : vector<2x4xf32> to vector<1x4xf32>
    %204 = vector.broadcast %185 : f32 to vector<1x4xf32>
    %205 = arith.mulf %204, %203 : vector<1x4xf32>
    %206 = vector.extract_strided_slice %193 {offsets = [1, 0], sizes = [1, 4], strides = [1, 1]} : vector<2x4xf32> to vector<1x4xf32>
    %207 = vector.broadcast %183 : f32 to vector<1x4xf32>
    %208 = arith.mulf %207, %206 : vector<1x4xf32>
    %209 = arith.addf %205, %208 : vector<1x4xf32>
    %210 = vector.broadcast %181 : f32 to vector<1x4xf32>
    %211 = arith.mulf %210, %209 : vector<1x4xf32>
    %212 = arith.addf %202, %211 : vector<1x4xf32>
    %cst_80 = arith.constant 0.000000e+00 : f32
    %213 = vector.broadcast %cst_80 : f32 to vector<1x4xf32>
    %214 = arith.select %173, %212, %213 : vector<1x4xf32>
    %215 = arith.addf %156, %214 : vector<1x4xf32>
    %cst_81 = arith.constant 1.000000e+00 : f32
    %216 = vector.broadcast %cst_81 : f32 to vector<1x4xf32>
    %217 = arith.mulf %215, %216 : vector<1x4xf32>
    %cst_82 = arith.constant 0.000000e+00 : f32
    %218 = vector.broadcast %cst_82 : f32 to vector<1x4xf32>
    %cst_83 = arith.constant 1.000000e+00 : f32
    %219 = arith.mulf %cst_83, %29 : f32
    %220 = arith.addf %14, %219 : f32
    %cst_84 = arith.constant 5.000000e-01 : f32
    %221 = arith.mulf %cst_84, %29 : f32
    %cst_85 = arith.constant 1.000000e+00 : f32
    %222 = arith.divf %221, %cst_85 : f32
    %223 = arith.addf %220, %222 : f32
    %cst_86 = arith.constant 1.000000e+00 : f32
    %224 = arith.mulf %cst_86, %30 : f32
    %225 = arith.addf %10, %224 : f32
    %cst_87 = arith.constant 5.000000e-01 : f32
    %226 = arith.mulf %cst_87, %30 : f32
    %cst_88 = arith.constant 1.000000e+00 : f32
    %227 = arith.divf %226, %cst_88 : f32
    %228 = arith.addf %225, %227 : f32
    %cst_89 = arith.constant -1.000000e+00 : f32
    %229 = arith.cmpf oge, %223, %cst_89 : f32
    %cst_90 = arith.constant 1.600000e+01 : f32
    %230 = arith.cmpf ole, %223, %cst_90 : f32
    %231 = arith.andi %229, %230 : i1
    %cst_91 = arith.constant -1.000000e+00 : f32
    %232 = arith.cmpf oge, %228, %cst_91 : f32
    %233 = arith.andi %231, %232 : i1
    %cst_92 = arith.constant 1.600000e+01 : f32
    %234 = arith.cmpf ole, %228, %cst_92 : f32
    %235 = arith.andi %233, %234 : i1
    %cst_93 = arith.constant 0.000000e+00 : f32
    %cst_94 = arith.constant 1.500000e+01 : f32
    %236 = arith.maximumf %cst_93, %223 : f32
    %237 = arith.minimumf %cst_94, %236 : f32
    %cst_95 = arith.constant 0.000000e+00 : f32
    %cst_96 = arith.constant 1.500000e+01 : f32
    %238 = arith.maximumf %cst_95, %228 : f32
    %239 = arith.minimumf %cst_96, %238 : f32
    %240 = arith.fptosi %237 : f32 to i32
    %241 = arith.fptosi %239 : f32 to i32
    %242 = arith.sitofp %240 : i32 to f32
    %243 = arith.subf %237, %242 : f32
    %244 = arith.sitofp %241 : i32 to f32
    %245 = arith.subf %239, %244 : f32
    %cst_97 = arith.constant 1.000000e+00 : f32
    %246 = arith.subf %cst_97, %243 : f32
    %cst_98 = arith.constant 1.000000e+00 : f32
    %247 = arith.subf %cst_98, %245 : f32
    %c16_i32_99 = arith.constant 16 : i32
    %248 = arith.muli %240, %c16_i32_99 : i32
    %249 = arith.addi %31, %248 : i32
    %250 = arith.addi %249, %241 : i32
    %251 = arith.index_cast %250 : i32 to index
    %c0_100 = arith.constant 0 : index
    %252 = vector.load %arg2[%251, %c0_100] : memref<536x4xf32, #tpu.memory_space<vmem>>, vector<2x4xf32>
    %c16_i32_101 = arith.constant 16 : i32
    %253 = arith.addi %250, %c16_i32_101 : i32
    %254 = arith.index_cast %253 : i32 to index
    %c0_102 = arith.constant 0 : index
    %255 = vector.load %arg2[%254, %c0_102] : memref<536x4xf32, #tpu.memory_space<vmem>>, vector<2x4xf32>
    %256 = vector.extract_strided_slice %252 {offsets = [0, 0], sizes = [1, 4], strides = [1, 1]} : vector<2x4xf32> to vector<1x4xf32>
    %257 = vector.broadcast %247 : f32 to vector<1x4xf32>
    %258 = arith.mulf %257, %256 : vector<1x4xf32>
    %259 = vector.extract_strided_slice %252 {offsets = [1, 0], sizes = [1, 4], strides = [1, 1]} : vector<2x4xf32> to vector<1x4xf32>
    %260 = vector.broadcast %245 : f32 to vector<1x4xf32>
    %261 = arith.mulf %260, %259 : vector<1x4xf32>
    %262 = arith.addf %258, %261 : vector<1x4xf32>
    %263 = vector.broadcast %246 : f32 to vector<1x4xf32>
    %264 = arith.mulf %263, %262 : vector<1x4xf32>
    %265 = vector.extract_strided_slice %255 {offsets = [0, 0], sizes = [1, 4], strides = [1, 1]} : vector<2x4xf32> to vector<1x4xf32>
    %266 = vector.broadcast %247 : f32 to vector<1x4xf32>
    %267 = arith.mulf %266, %265 : vector<1x4xf32>
    %268 = vector.extract_strided_slice %255 {offsets = [1, 0], sizes = [1, 4], strides = [1, 1]} : vector<2x4xf32> to vector<1x4xf32>
    %269 = vector.broadcast %245 : f32 to vector<1x4xf32>
    %270 = arith.mulf %269, %268 : vector<1x4xf32>
    %271 = arith.addf %267, %270 : vector<1x4xf32>
    %272 = vector.broadcast %243 : f32 to vector<1x4xf32>
    %273 = arith.mulf %272, %271 : vector<1x4xf32>
    %274 = arith.addf %264, %273 : vector<1x4xf32>
    %cst_103 = arith.constant 0.000000e+00 : f32
    %275 = vector.broadcast %cst_103 : f32 to vector<1x4xf32>
    %276 = arith.select %235, %274, %275 : vector<1x4xf32>
    %277 = arith.addf %218, %276 : vector<1x4xf32>
    %cst_104 = arith.constant 1.000000e+00 : f32
    %278 = vector.broadcast %cst_104 : f32 to vector<1x4xf32>
    %279 = arith.mulf %277, %278 : vector<1x4xf32>
    %280 = tpu.concatenate %93, %155, %217, %279 in 0 : vector<1x4xf32>, vector<1x4xf32>, vector<1x4xf32>, vector<1x4xf32> -> vector<4x4xf32>
    %c4_i32_105 = arith.constant 4 : i32
    %281 = arith.muli %arg0, %c4_i32_105 : i32
    %c1_i32_106 = arith.constant 1 : i32
    %282 = arith.addi %281, %c1_i32_106 : i32
    %283 = arith.index_cast %282 : i32 to index
    %c0_107 = arith.constant 0 : index
    %284 = memref.load %arg1[%283, %c0_107] : memref<8x5xf32, #tpu.memory_space<smem>>
    %285 = arith.fptosi %284 : f32 to i32
    %c0_i32_108 = arith.constant 0 : i32
    %c1_i32_109 = arith.constant 1 : i32
    %286 = arith.maxsi %c0_i32_108, %285 : i32
    %287 = arith.minsi %c1_i32_109, %286 : i32
    %288 = arith.index_cast %282 : i32 to index
    %c1_110 = arith.constant 1 : index
    %289 = memref.load %arg1[%288, %c1_110] : memref<8x5xf32, #tpu.memory_space<smem>>
    %cst_111 = arith.constant -0.574780166 : f32
    %290 = arith.mulf %289, %cst_111 : f32
    %cst_112 = arith.constant 0.000000e+00 : f32
    %291 = arith.subf %290, %cst_112 : f32
    %292 = arith.index_cast %282 : i32 to index
    %c2_113 = arith.constant 2 : index
    %293 = memref.load %arg1[%292, %c2_113] : memref<8x5xf32, #tpu.memory_space<smem>>
    %cst_114 = arith.constant -0.574780166 : f32
    %294 = arith.mulf %293, %cst_114 : f32
    %cst_115 = arith.constant 0.000000e+00 : f32
    %295 = arith.subf %294, %cst_115 : f32
    %296 = arith.index_cast %282 : i32 to index
    %c3_116 = arith.constant 3 : index
    %297 = memref.load %arg1[%296, %c3_116] : memref<8x5xf32, #tpu.memory_space<smem>>
    %cst_117 = arith.constant 1.000000e+00 : f32
    %298 = arith.addf %297, %cst_117 : f32
    %cst_118 = arith.constant -0.574780166 : f32
    %299 = arith.mulf %298, %cst_118 : f32
    %cst_119 = arith.constant 0.000000e+00 : f32
    %300 = arith.subf %299, %cst_119 : f32
    %301 = arith.index_cast %282 : i32 to index
    %c4_120 = arith.constant 4 : index
    %302 = memref.load %arg1[%301, %c4_120] : memref<8x5xf32, #tpu.memory_space<smem>>
    %cst_121 = arith.constant 1.000000e+00 : f32
    %303 = arith.addf %302, %cst_121 : f32
    %cst_122 = arith.constant -0.574780166 : f32
    %304 = arith.mulf %303, %cst_122 : f32
    %cst_123 = arith.constant 0.000000e+00 : f32
    %305 = arith.subf %304, %cst_123 : f32
    %306 = arith.subf %300, %291 : f32
    %307 = arith.subf %305, %295 : f32
    %cst_124 = arith.constant 1.000000e+00 : f32
    %308 = arith.maximumf %306, %cst_124 : f32
    %cst_125 = arith.constant 1.000000e+00 : f32
    %309 = arith.maximumf %307, %cst_125 : f32
    %cst_126 = arith.constant 2.000000e+00 : f32
    %310 = arith.divf %309, %cst_126 : f32
    %cst_127 = arith.constant 2.000000e+00 : f32
    %311 = arith.divf %308, %cst_127 : f32
    %c256_i32_128 = arith.constant 256 : i32
    %312 = arith.muli %287, %c256_i32_128 : i32
    %cst_129 = arith.constant 0.000000e+00 : f32
    %313 = vector.broadcast %cst_129 : f32 to vector<1x4xf32>
    %cst_130 = arith.constant 0.000000e+00 : f32
    %314 = arith.mulf %cst_130, %310 : f32
    %315 = arith.addf %295, %314 : f32
    %cst_131 = arith.constant 5.000000e-01 : f32
    %316 = arith.mulf %cst_131, %310 : f32
    %cst_132 = arith.constant 1.000000e+00 : f32
    %317 = arith.divf %316, %cst_132 : f32
    %318 = arith.addf %315, %317 : f32
    %cst_133 = arith.constant 0.000000e+00 : f32
    %319 = arith.mulf %cst_133, %311 : f32
    %320 = arith.addf %291, %319 : f32
    %cst_134 = arith.constant 5.000000e-01 : f32
    %321 = arith.mulf %cst_134, %311 : f32
    %cst_135 = arith.constant 1.000000e+00 : f32
    %322 = arith.divf %321, %cst_135 : f32
    %323 = arith.addf %320, %322 : f32
    %cst_136 = arith.constant -1.000000e+00 : f32
    %324 = arith.cmpf oge, %318, %cst_136 : f32
    %cst_137 = arith.constant 1.600000e+01 : f32
    %325 = arith.cmpf ole, %318, %cst_137 : f32
    %326 = arith.andi %324, %325 : i1
    %cst_138 = arith.constant -1.000000e+00 : f32
    %327 = arith.cmpf oge, %323, %cst_138 : f32
    %328 = arith.andi %326, %327 : i1
    %cst_139 = arith.constant 1.600000e+01 : f32
    %329 = arith.cmpf ole, %323, %cst_139 : f32
    %330 = arith.andi %328, %329 : i1
    %cst_140 = arith.constant 0.000000e+00 : f32
    %cst_141 = arith.constant 1.500000e+01 : f32
    %331 = arith.maximumf %cst_140, %318 : f32
    %332 = arith.minimumf %cst_141, %331 : f32
    %cst_142 = arith.constant 0.000000e+00 : f32
    %cst_143 = arith.constant 1.500000e+01 : f32
    %333 = arith.maximumf %cst_142, %323 : f32
    %334 = arith.minimumf %cst_143, %333 : f32
    %335 = arith.fptosi %332 : f32 to i32
    %336 = arith.fptosi %334 : f32 to i32
    %337 = arith.sitofp %335 : i32 to f32
    %338 = arith.subf %332, %337 : f32
    %339 = arith.sitofp %336 : i32 to f32
    %340 = arith.subf %334, %339 : f32
    %cst_144 = arith.constant 1.000000e+00 : f32
    %341 = arith.subf %cst_144, %338 : f32
    %cst_145 = arith.constant 1.000000e+00 : f32
    %342 = arith.subf %cst_145, %340 : f32
    %c16_i32_146 = arith.constant 16 : i32
    %343 = arith.muli %335, %c16_i32_146 : i32
    %344 = arith.addi %312, %343 : i32
    %345 = arith.addi %344, %336 : i32
    %346 = arith.index_cast %345 : i32 to index
    %c0_147 = arith.constant 0 : index
    %347 = vector.load %arg2[%346, %c0_147] : memref<536x4xf32, #tpu.memory_space<vmem>>, vector<2x4xf32>
    %c16_i32_148 = arith.constant 16 : i32
    %348 = arith.addi %345, %c16_i32_148 : i32
    %349 = arith.index_cast %348 : i32 to index
    %c0_149 = arith.constant 0 : index
    %350 = vector.load %arg2[%349, %c0_149] : memref<536x4xf32, #tpu.memory_space<vmem>>, vector<2x4xf32>
    %351 = vector.extract_strided_slice %347 {offsets = [0, 0], sizes = [1, 4], strides = [1, 1]} : vector<2x4xf32> to vector<1x4xf32>
    %352 = vector.broadcast %342 : f32 to vector<1x4xf32>
    %353 = arith.mulf %352, %351 : vector<1x4xf32>
    %354 = vector.extract_strided_slice %347 {offsets = [1, 0], sizes = [1, 4], strides = [1, 1]} : vector<2x4xf32> to vector<1x4xf32>
    %355 = vector.broadcast %340 : f32 to vector<1x4xf32>
    %356 = arith.mulf %355, %354 : vector<1x4xf32>
    %357 = arith.addf %353, %356 : vector<1x4xf32>
    %358 = vector.broadcast %341 : f32 to vector<1x4xf32>
    %359 = arith.mulf %358, %357 : vector<1x4xf32>
    %360 = vector.extract_strided_slice %350 {offsets = [0, 0], sizes = [1, 4], strides = [1, 1]} : vector<2x4xf32> to vector<1x4xf32>
    %361 = vector.broadcast %342 : f32 to vector<1x4xf32>
    %362 = arith.mulf %361, %360 : vector<1x4xf32>
    %363 = vector.extract_strided_slice %350 {offsets = [1, 0], sizes = [1, 4], strides = [1, 1]} : vector<2x4xf32> to vector<1x4xf32>
    %364 = vector.broadcast %340 : f32 to vector<1x4xf32>
    %365 = arith.mulf %364, %363 : vector<1x4xf32>
    %366 = arith.addf %362, %365 : vector<1x4xf32>
    %367 = vector.broadcast %338 : f32 to vector<1x4xf32>
    %368 = arith.mulf %367, %366 : vector<1x4xf32>
    %369 = arith.addf %359, %368 : vector<1x4xf32>
    %cst_150 = arith.constant 0.000000e+00 : f32
    %370 = vector.broadcast %cst_150 : f32 to vector<1x4xf32>
    %371 = arith.select %330, %369, %370 : vector<1x4xf32>
    %372 = arith.addf %313, %371 : vector<1x4xf32>
    %cst_151 = arith.constant 1.000000e+00 : f32
    %373 = vector.broadcast %cst_151 : f32 to vector<1x4xf32>
    %374 = arith.mulf %372, %373 : vector<1x4xf32>
    %cst_152 = arith.constant 0.000000e+00 : f32
    %375 = vector.broadcast %cst_152 : f32 to vector<1x4xf32>
    %cst_153 = arith.constant 0.000000e+00 : f32
    %376 = arith.mulf %cst_153, %310 : f32
    %377 = arith.addf %295, %376 : f32
    %cst_154 = arith.constant 5.000000e-01 : f32
    %378 = arith.mulf %cst_154, %310 : f32
    %cst_155 = arith.constant 1.000000e+00 : f32
    %379 = arith.divf %378, %cst_155 : f32
    %380 = arith.addf %377, %379 : f32
    %cst_156 = arith.constant 1.000000e+00 : f32
    %381 = arith.mulf %cst_156, %311 : f32
    %382 = arith.addf %291, %381 : f32
    %cst_157 = arith.constant 5.000000e-01 : f32
    %383 = arith.mulf %cst_157, %311 : f32
    %cst_158 = arith.constant 1.000000e+00 : f32
    %384 = arith.divf %383, %cst_158 : f32
    %385 = arith.addf %382, %384 : f32
    %cst_159 = arith.constant -1.000000e+00 : f32
    %386 = arith.cmpf oge, %380, %cst_159 : f32
    %cst_160 = arith.constant 1.600000e+01 : f32
    %387 = arith.cmpf ole, %380, %cst_160 : f32
    %388 = arith.andi %386, %387 : i1
    %cst_161 = arith.constant -1.000000e+00 : f32
    %389 = arith.cmpf oge, %385, %cst_161 : f32
    %390 = arith.andi %388, %389 : i1
    %cst_162 = arith.constant 1.600000e+01 : f32
    %391 = arith.cmpf ole, %385, %cst_162 : f32
    %392 = arith.andi %390, %391 : i1
    %cst_163 = arith.constant 0.000000e+00 : f32
    %cst_164 = arith.constant 1.500000e+01 : f32
    %393 = arith.maximumf %cst_163, %380 : f32
    %394 = arith.minimumf %cst_164, %393 : f32
    %cst_165 = arith.constant 0.000000e+00 : f32
    %cst_166 = arith.constant 1.500000e+01 : f32
    %395 = arith.maximumf %cst_165, %385 : f32
    %396 = arith.minimumf %cst_166, %395 : f32
    %397 = arith.fptosi %394 : f32 to i32
    %398 = arith.fptosi %396 : f32 to i32
    %399 = arith.sitofp %397 : i32 to f32
    %400 = arith.subf %394, %399 : f32
    %401 = arith.sitofp %398 : i32 to f32
    %402 = arith.subf %396, %401 : f32
    %cst_167 = arith.constant 1.000000e+00 : f32
    %403 = arith.subf %cst_167, %400 : f32
    %cst_168 = arith.constant 1.000000e+00 : f32
    %404 = arith.subf %cst_168, %402 : f32
    %c16_i32_169 = arith.constant 16 : i32
    %405 = arith.muli %397, %c16_i32_169 : i32
    %406 = arith.addi %312, %405 : i32
    %407 = arith.addi %406, %398 : i32
    %408 = arith.index_cast %407 : i32 to index
    %c0_170 = arith.constant 0 : index
    %409 = vector.load %arg2[%408, %c0_170] : memref<536x4xf32, #tpu.memory_space<vmem>>, vector<2x4xf32>
    %c16_i32_171 = arith.constant 16 : i32
    %410 = arith.addi %407, %c16_i32_171 : i32
    %411 = arith.index_cast %410 : i32 to index
    %c0_172 = arith.constant 0 : index
    %412 = vector.load %arg2[%411, %c0_172] : memref<536x4xf32, #tpu.memory_space<vmem>>, vector<2x4xf32>
    %413 = vector.extract_strided_slice %409 {offsets = [0, 0], sizes = [1, 4], strides = [1, 1]} : vector<2x4xf32> to vector<1x4xf32>
    %414 = vector.broadcast %404 : f32 to vector<1x4xf32>
    %415 = arith.mulf %414, %413 : vector<1x4xf32>
    %416 = vector.extract_strided_slice %409 {offsets = [1, 0], sizes = [1, 4], strides = [1, 1]} : vector<2x4xf32> to vector<1x4xf32>
    %417 = vector.broadcast %402 : f32 to vector<1x4xf32>
    %418 = arith.mulf %417, %416 : vector<1x4xf32>
    %419 = arith.addf %415, %418 : vector<1x4xf32>
    %420 = vector.broadcast %403 : f32 to vector<1x4xf32>
    %421 = arith.mulf %420, %419 : vector<1x4xf32>
    %422 = vector.extract_strided_slice %412 {offsets = [0, 0], sizes = [1, 4], strides = [1, 1]} : vector<2x4xf32> to vector<1x4xf32>
    %423 = vector.broadcast %404 : f32 to vector<1x4xf32>
    %424 = arith.mulf %423, %422 : vector<1x4xf32>
    %425 = vector.extract_strided_slice %412 {offsets = [1, 0], sizes = [1, 4], strides = [1, 1]} : vector<2x4xf32> to vector<1x4xf32>
    %426 = vector.broadcast %402 : f32 to vector<1x4xf32>
    %427 = arith.mulf %426, %425 : vector<1x4xf32>
    %428 = arith.addf %424, %427 : vector<1x4xf32>
    %429 = vector.broadcast %400 : f32 to vector<1x4xf32>
    %430 = arith.mulf %429, %428 : vector<1x4xf32>
    %431 = arith.addf %421, %430 : vector<1x4xf32>
    %cst_173 = arith.constant 0.000000e+00 : f32
    %432 = vector.broadcast %cst_173 : f32 to vector<1x4xf32>
    %433 = arith.select %392, %431, %432 : vector<1x4xf32>
    %434 = arith.addf %375, %433 : vector<1x4xf32>
    %cst_174 = arith.constant 1.000000e+00 : f32
    %435 = vector.broadcast %cst_174 : f32 to vector<1x4xf32>
    %436 = arith.mulf %434, %435 : vector<1x4xf32>
    %cst_175 = arith.constant 0.000000e+00 : f32
    %437 = vector.broadcast %cst_175 : f32 to vector<1x4xf32>
    %cst_176 = arith.constant 1.000000e+00 : f32
    %438 = arith.mulf %cst_176, %310 : f32
    %439 = arith.addf %295, %438 : f32
    %cst_177 = arith.constant 5.000000e-01 : f32
    %440 = arith.mulf %cst_177, %310 : f32
    %cst_178 = arith.constant 1.000000e+00 : f32
    %441 = arith.divf %440, %cst_178 : f32
    %442 = arith.addf %439, %441 : f32
    %cst_179 = arith.constant 0.000000e+00 : f32
    %443 = arith.mulf %cst_179, %311 : f32
    %444 = arith.addf %291, %443 : f32
    %cst_180 = arith.constant 5.000000e-01 : f32
    %445 = arith.mulf %cst_180, %311 : f32
    %cst_181 = arith.constant 1.000000e+00 : f32
    %446 = arith.divf %445, %cst_181 : f32
    %447 = arith.addf %444, %446 : f32
    %cst_182 = arith.constant -1.000000e+00 : f32
    %448 = arith.cmpf oge, %442, %cst_182 : f32
    %cst_183 = arith.constant 1.600000e+01 : f32
    %449 = arith.cmpf ole, %442, %cst_183 : f32
    %450 = arith.andi %448, %449 : i1
    %cst_184 = arith.constant -1.000000e+00 : f32
    %451 = arith.cmpf oge, %447, %cst_184 : f32
    %452 = arith.andi %450, %451 : i1
    %cst_185 = arith.constant 1.600000e+01 : f32
    %453 = arith.cmpf ole, %447, %cst_185 : f32
    %454 = arith.andi %452, %453 : i1
    %cst_186 = arith.constant 0.000000e+00 : f32
    %cst_187 = arith.constant 1.500000e+01 : f32
    %455 = arith.maximumf %cst_186, %442 : f32
    %456 = arith.minimumf %cst_187, %455 : f32
    %cst_188 = arith.constant 0.000000e+00 : f32
    %cst_189 = arith.constant 1.500000e+01 : f32
    %457 = arith.maximumf %cst_188, %447 : f32
    %458 = arith.minimumf %cst_189, %457 : f32
    %459 = arith.fptosi %456 : f32 to i32
    %460 = arith.fptosi %458 : f32 to i32
    %461 = arith.sitofp %459 : i32 to f32
    %462 = arith.subf %456, %461 : f32
    %463 = arith.sitofp %460 : i32 to f32
    %464 = arith.subf %458, %463 : f32
    %cst_190 = arith.constant 1.000000e+00 : f32
    %465 = arith.subf %cst_190, %462 : f32
    %cst_191 = arith.constant 1.000000e+00 : f32
    %466 = arith.subf %cst_191, %464 : f32
    %c16_i32_192 = arith.constant 16 : i32
    %467 = arith.muli %459, %c16_i32_192 : i32
    %468 = arith.addi %312, %467 : i32
    %469 = arith.addi %468, %460 : i32
    %470 = arith.index_cast %469 : i32 to index
    %c0_193 = arith.constant 0 : index
    %471 = vector.load %arg2[%470, %c0_193] : memref<536x4xf32, #tpu.memory_space<vmem>>, vector<2x4xf32>
    %c16_i32_194 = arith.constant 16 : i32
    %472 = arith.addi %469, %c16_i32_194 : i32
    %473 = arith.index_cast %472 : i32 to index
    %c0_195 = arith.constant 0 : index
    %474 = vector.load %arg2[%473, %c0_195] : memref<536x4xf32, #tpu.memory_space<vmem>>, vector<2x4xf32>
    %475 = vector.extract_strided_slice %471 {offsets = [0, 0], sizes = [1, 4], strides = [1, 1]} : vector<2x4xf32> to vector<1x4xf32>
    %476 = vector.broadcast %466 : f32 to vector<1x4xf32>
    %477 = arith.mulf %476, %475 : vector<1x4xf32>
    %478 = vector.extract_strided_slice %471 {offsets = [1, 0], sizes = [1, 4], strides = [1, 1]} : vector<2x4xf32> to vector<1x4xf32>
    %479 = vector.broadcast %464 : f32 to vector<1x4xf32>
    %480 = arith.mulf %479, %478 : vector<1x4xf32>
    %481 = arith.addf %477, %480 : vector<1x4xf32>
    %482 = vector.broadcast %465 : f32 to vector<1x4xf32>
    %483 = arith.mulf %482, %481 : vector<1x4xf32>
    %484 = vector.extract_strided_slice %474 {offsets = [0, 0], sizes = [1, 4], strides = [1, 1]} : vector<2x4xf32> to vector<1x4xf32>
    %485 = vector.broadcast %466 : f32 to vector<1x4xf32>
    %486 = arith.mulf %485, %484 : vector<1x4xf32>
    %487 = vector.extract_strided_slice %474 {offsets = [1, 0], sizes = [1, 4], strides = [1, 1]} : vector<2x4xf32> to vector<1x4xf32>
    %488 = vector.broadcast %464 : f32 to vector<1x4xf32>
    %489 = arith.mulf %488, %487 : vector<1x4xf32>
    %490 = arith.addf %486, %489 : vector<1x4xf32>
    %491 = vector.broadcast %462 : f32 to vector<1x4xf32>
    %492 = arith.mulf %491, %490 : vector<1x4xf32>
    %493 = arith.addf %483, %492 : vector<1x4xf32>
    %cst_196 = arith.constant 0.000000e+00 : f32
    %494 = vector.broadcast %cst_196 : f32 to vector<1x4xf32>
    %495 = arith.select %454, %493, %494 : vector<1x4xf32>
    %496 = arith.addf %437, %495 : vector<1x4xf32>
    %cst_197 = arith.constant 1.000000e+00 : f32
    %497 = vector.broadcast %cst_197 : f32 to vector<1x4xf32>
    %498 = arith.mulf %496, %497 : vector<1x4xf32>
    %cst_198 = arith.constant 0.000000e+00 : f32
    %499 = vector.broadcast %cst_198 : f32 to vector<1x4xf32>
    %cst_199 = arith.constant 1.000000e+00 : f32
    %500 = arith.mulf %cst_199, %310 : f32
    %501 = arith.addf %295, %500 : f32
    %cst_200 = arith.constant 5.000000e-01 : f32
    %502 = arith.mulf %cst_200, %310 : f32
    %cst_201 = arith.constant 1.000000e+00 : f32
    %503 = arith.divf %502, %cst_201 : f32
    %504 = arith.addf %501, %503 : f32
    %cst_202 = arith.constant 1.000000e+00 : f32
    %505 = arith.mulf %cst_202, %311 : f32
    %506 = arith.addf %291, %505 : f32
    %cst_203 = arith.constant 5.000000e-01 : f32
    %507 = arith.mulf %cst_203, %311 : f32
    %cst_204 = arith.constant 1.000000e+00 : f32
    %508 = arith.divf %507, %cst_204 : f32
    %509 = arith.addf %506, %508 : f32
    %cst_205 = arith.constant -1.000000e+00 : f32
    %510 = arith.cmpf oge, %504, %cst_205 : f32
    %cst_206 = arith.constant 1.600000e+01 : f32
    %511 = arith.cmpf ole, %504, %cst_206 : f32
    %512 = arith.andi %510, %511 : i1
    %cst_207 = arith.constant -1.000000e+00 : f32
    %513 = arith.cmpf oge, %509, %cst_207 : f32
    %514 = arith.andi %512, %513 : i1
    %cst_208 = arith.constant 1.600000e+01 : f32
    %515 = arith.cmpf ole, %509, %cst_208 : f32
    %516 = arith.andi %514, %515 : i1
    %cst_209 = arith.constant 0.000000e+00 : f32
    %cst_210 = arith.constant 1.500000e+01 : f32
    %517 = arith.maximumf %cst_209, %504 : f32
    %518 = arith.minimumf %cst_210, %517 : f32
    %cst_211 = arith.constant 0.000000e+00 : f32
    %cst_212 = arith.constant 1.500000e+01 : f32
    %519 = arith.maximumf %cst_211, %509 : f32
    %520 = arith.minimumf %cst_212, %519 : f32
    %521 = arith.fptosi %518 : f32 to i32
    %522 = arith.fptosi %520 : f32 to i32
    %523 = arith.sitofp %521 : i32 to f32
    %524 = arith.subf %518, %523 : f32
    %525 = arith.sitofp %522 : i32 to f32
    %526 = arith.subf %520, %525 : f32
    %cst_213 = arith.constant 1.000000e+00 : f32
    %527 = arith.subf %cst_213, %524 : f32
    %cst_214 = arith.constant 1.000000e+00 : f32
    %528 = arith.subf %cst_214, %526 : f32
    %c16_i32_215 = arith.constant 16 : i32
    %529 = arith.muli %521, %c16_i32_215 : i32
    %530 = arith.addi %312, %529 : i32
    %531 = arith.addi %530, %522 : i32
    %532 = arith.index_cast %531 : i32 to index
    %c0_216 = arith.constant 0 : index
    %533 = vector.load %arg2[%532, %c0_216] : memref<536x4xf32, #tpu.memory_space<vmem>>, vector<2x4xf32>
    %c16_i32_217 = arith.constant 16 : i32
    %534 = arith.addi %531, %c16_i32_217 : i32
    %535 = arith.index_cast %534 : i32 to index
    %c0_218 = arith.constant 0 : index
    %536 = vector.load %arg2[%535, %c0_218] : memref<536x4xf32, #tpu.memory_space<vmem>>, vector<2x4xf32>
    %537 = vector.extract_strided_slice %533 {offsets = [0, 0], sizes = [1, 4], strides = [1, 1]} : vector<2x4xf32> to vector<1x4xf32>
    %538 = vector.broadcast %528 : f32 to vector<1x4xf32>
    %539 = arith.mulf %538, %537 : vector<1x4xf32>
    %540 = vector.extract_strided_slice %533 {offsets = [1, 0], sizes = [1, 4], strides = [1, 1]} : vector<2x4xf32> to vector<1x4xf32>
    %541 = vector.broadcast %526 : f32 to vector<1x4xf32>
    %542 = arith.mulf %541, %540 : vector<1x4xf32>
    %543 = arith.addf %539, %542 : vector<1x4xf32>
    %544 = vector.broadcast %527 : f32 to vector<1x4xf32>
    %545 = arith.mulf %544, %543 : vector<1x4xf32>
    %546 = vector.extract_strided_slice %536 {offsets = [0, 0], sizes = [1, 4], strides = [1, 1]} : vector<2x4xf32> to vector<1x4xf32>
    %547 = vector.broadcast %528 : f32 to vector<1x4xf32>
    %548 = arith.mulf %547, %546 : vector<1x4xf32>
    %549 = vector.extract_strided_slice %536 {offsets = [1, 0], sizes = [1, 4], strides = [1, 1]} : vector<2x4xf32> to vector<1x4xf32>
    %550 = vector.broadcast %526 : f32 to vector<1x4xf32>
    %551 = arith.mulf %550, %549 : vector<1x4xf32>
    %552 = arith.addf %548, %551 : vector<1x4xf32>
    %553 = vector.broadcast %524 : f32 to vector<1x4xf32>
    %554 = arith.mulf %553, %552 : vector<1x4xf32>
    %555 = arith.addf %545, %554 : vector<1x4xf32>
    %cst_219 = arith.constant 0.000000e+00 : f32
    %556 = vector.broadcast %cst_219 : f32 to vector<1x4xf32>
    %557 = arith.select %516, %555, %556 : vector<1x4xf32>
    %558 = arith.addf %499, %557 : vector<1x4xf32>
    %cst_220 = arith.constant 1.000000e+00 : f32
    %559 = vector.broadcast %cst_220 : f32 to vector<1x4xf32>
    %560 = arith.mulf %558, %559 : vector<1x4xf32>
    %561 = tpu.concatenate %374, %436, %498, %560 in 0 : vector<1x4xf32>, vector<1x4xf32>, vector<1x4xf32>, vector<1x4xf32> -> vector<4x4xf32>
    %c4_i32_221 = arith.constant 4 : i32
    %562 = arith.muli %arg0, %c4_i32_221 : i32
    %c2_i32 = arith.constant 2 : i32
    %563 = arith.addi %562, %c2_i32 : i32
    %564 = arith.index_cast %563 : i32 to index
    %c0_222 = arith.constant 0 : index
    %565 = memref.load %arg1[%564, %c0_222] : memref<8x5xf32, #tpu.memory_space<smem>>
    %566 = arith.fptosi %565 : f32 to i32
    %c0_i32_223 = arith.constant 0 : i32
    %c1_i32_224 = arith.constant 1 : i32
    %567 = arith.maxsi %c0_i32_223, %566 : i32
    %568 = arith.minsi %c1_i32_224, %567 : i32
    %569 = arith.index_cast %563 : i32 to index
    %c1_225 = arith.constant 1 : index
    %570 = memref.load %arg1[%569, %c1_225] : memref<8x5xf32, #tpu.memory_space<smem>>
    %cst_226 = arith.constant -0.574780166 : f32
    %571 = arith.mulf %570, %cst_226 : f32
    %cst_227 = arith.constant 0.000000e+00 : f32
    %572 = arith.subf %571, %cst_227 : f32
    %573 = arith.index_cast %563 : i32 to index
    %c2_228 = arith.constant 2 : index
    %574 = memref.load %arg1[%573, %c2_228] : memref<8x5xf32, #tpu.memory_space<smem>>
    %cst_229 = arith.constant -0.574780166 : f32
    %575 = arith.mulf %574, %cst_229 : f32
    %cst_230 = arith.constant 0.000000e+00 : f32
    %576 = arith.subf %575, %cst_230 : f32
    %577 = arith.index_cast %563 : i32 to index
    %c3_231 = arith.constant 3 : index
    %578 = memref.load %arg1[%577, %c3_231] : memref<8x5xf32, #tpu.memory_space<smem>>
    %cst_232 = arith.constant 1.000000e+00 : f32
    %579 = arith.addf %578, %cst_232 : f32
    %cst_233 = arith.constant -0.574780166 : f32
    %580 = arith.mulf %579, %cst_233 : f32
    %cst_234 = arith.constant 0.000000e+00 : f32
    %581 = arith.subf %580, %cst_234 : f32
    %582 = arith.index_cast %563 : i32 to index
    %c4_235 = arith.constant 4 : index
    %583 = memref.load %arg1[%582, %c4_235] : memref<8x5xf32, #tpu.memory_space<smem>>
    %cst_236 = arith.constant 1.000000e+00 : f32
    %584 = arith.addf %583, %cst_236 : f32
    %cst_237 = arith.constant -0.574780166 : f32
    %585 = arith.mulf %584, %cst_237 : f32
    %cst_238 = arith.constant 0.000000e+00 : f32
    %586 = arith.subf %585, %cst_238 : f32
    %587 = arith.subf %581, %572 : f32
    %588 = arith.subf %586, %576 : f32
    %cst_239 = arith.constant 1.000000e+00 : f32
    %589 = arith.maximumf %587, %cst_239 : f32
    %cst_240 = arith.constant 1.000000e+00 : f32
    %590 = arith.maximumf %588, %cst_240 : f32
    %cst_241 = arith.constant 2.000000e+00 : f32
    %591 = arith.divf %590, %cst_241 : f32
    %cst_242 = arith.constant 2.000000e+00 : f32
    %592 = arith.divf %589, %cst_242 : f32
    %c256_i32_243 = arith.constant 256 : i32
    %593 = arith.muli %568, %c256_i32_243 : i32
    %cst_244 = arith.constant 0.000000e+00 : f32
    %594 = vector.broadcast %cst_244 : f32 to vector<1x4xf32>
    %cst_245 = arith.constant 0.000000e+00 : f32
    %595 = arith.mulf %cst_245, %591 : f32
    %596 = arith.addf %576, %595 : f32
    %cst_246 = arith.constant 5.000000e-01 : f32
    %597 = arith.mulf %cst_246, %591 : f32
    %cst_247 = arith.constant 1.000000e+00 : f32
    %598 = arith.divf %597, %cst_247 : f32
    %599 = arith.addf %596, %598 : f32
    %cst_248 = arith.constant 0.000000e+00 : f32
    %600 = arith.mulf %cst_248, %592 : f32
    %601 = arith.addf %572, %600 : f32
    %cst_249 = arith.constant 5.000000e-01 : f32
    %602 = arith.mulf %cst_249, %592 : f32
    %cst_250 = arith.constant 1.000000e+00 : f32
    %603 = arith.divf %602, %cst_250 : f32
    %604 = arith.addf %601, %603 : f32
    %cst_251 = arith.constant -1.000000e+00 : f32
    %605 = arith.cmpf oge, %599, %cst_251 : f32
    %cst_252 = arith.constant 1.600000e+01 : f32
    %606 = arith.cmpf ole, %599, %cst_252 : f32
    %607 = arith.andi %605, %606 : i1
    %cst_253 = arith.constant -1.000000e+00 : f32
    %608 = arith.cmpf oge, %604, %cst_253 : f32
    %609 = arith.andi %607, %608 : i1
    %cst_254 = arith.constant 1.600000e+01 : f32
    %610 = arith.cmpf ole, %604, %cst_254 : f32
    %611 = arith.andi %609, %610 : i1
    %cst_255 = arith.constant 0.000000e+00 : f32
    %cst_256 = arith.constant 1.500000e+01 : f32
    %612 = arith.maximumf %cst_255, %599 : f32
    %613 = arith.minimumf %cst_256, %612 : f32
    %cst_257 = arith.constant 0.000000e+00 : f32
    %cst_258 = arith.constant 1.500000e+01 : f32
    %614 = arith.maximumf %cst_257, %604 : f32
    %615 = arith.minimumf %cst_258, %614 : f32
    %616 = arith.fptosi %613 : f32 to i32
    %617 = arith.fptosi %615 : f32 to i32
    %618 = arith.sitofp %616 : i32 to f32
    %619 = arith.subf %613, %618 : f32
    %620 = arith.sitofp %617 : i32 to f32
    %621 = arith.subf %615, %620 : f32
    %cst_259 = arith.constant 1.000000e+00 : f32
    %622 = arith.subf %cst_259, %619 : f32
    %cst_260 = arith.constant 1.000000e+00 : f32
    %623 = arith.subf %cst_260, %621 : f32
    %c16_i32_261 = arith.constant 16 : i32
    %624 = arith.muli %616, %c16_i32_261 : i32
    %625 = arith.addi %593, %624 : i32
    %626 = arith.addi %625, %617 : i32
    %627 = arith.index_cast %626 : i32 to index
    %c0_262 = arith.constant 0 : index
    %628 = vector.load %arg2[%627, %c0_262] : memref<536x4xf32, #tpu.memory_space<vmem>>, vector<2x4xf32>
    %c16_i32_263 = arith.constant 16 : i32
    %629 = arith.addi %626, %c16_i32_263 : i32
    %630 = arith.index_cast %629 : i32 to index
    %c0_264 = arith.constant 0 : index
    %631 = vector.load %arg2[%630, %c0_264] : memref<536x4xf32, #tpu.memory_space<vmem>>, vector<2x4xf32>
    %632 = vector.extract_strided_slice %628 {offsets = [0, 0], sizes = [1, 4], strides = [1, 1]} : vector<2x4xf32> to vector<1x4xf32>
    %633 = vector.broadcast %623 : f32 to vector<1x4xf32>
    %634 = arith.mulf %633, %632 : vector<1x4xf32>
    %635 = vector.extract_strided_slice %628 {offsets = [1, 0], sizes = [1, 4], strides = [1, 1]} : vector<2x4xf32> to vector<1x4xf32>
    %636 = vector.broadcast %621 : f32 to vector<1x4xf32>
    %637 = arith.mulf %636, %635 : vector<1x4xf32>
    %638 = arith.addf %634, %637 : vector<1x4xf32>
    %639 = vector.broadcast %622 : f32 to vector<1x4xf32>
    %640 = arith.mulf %639, %638 : vector<1x4xf32>
    %641 = vector.extract_strided_slice %631 {offsets = [0, 0], sizes = [1, 4], strides = [1, 1]} : vector<2x4xf32> to vector<1x4xf32>
    %642 = vector.broadcast %623 : f32 to vector<1x4xf32>
    %643 = arith.mulf %642, %641 : vector<1x4xf32>
    %644 = vector.extract_strided_slice %631 {offsets = [1, 0], sizes = [1, 4], strides = [1, 1]} : vector<2x4xf32> to vector<1x4xf32>
    %645 = vector.broadcast %621 : f32 to vector<1x4xf32>
    %646 = arith.mulf %645, %644 : vector<1x4xf32>
    %647 = arith.addf %643, %646 : vector<1x4xf32>
    %648 = vector.broadcast %619 : f32 to vector<1x4xf32>
    %649 = arith.mulf %648, %647 : vector<1x4xf32>
    %650 = arith.addf %640, %649 : vector<1x4xf32>
    %cst_265 = arith.constant 0.000000e+00 : f32
    %651 = vector.broadcast %cst_265 : f32 to vector<1x4xf32>
    %652 = arith.select %611, %650, %651 : vector<1x4xf32>
    %653 = arith.addf %594, %652 : vector<1x4xf32>
    %cst_266 = arith.constant 1.000000e+00 : f32
    %654 = vector.broadcast %cst_266 : f32 to vector<1x4xf32>
    %655 = arith.mulf %653, %654 : vector<1x4xf32>
    %cst_267 = arith.constant 0.000000e+00 : f32
    %656 = vector.broadcast %cst_267 : f32 to vector<1x4xf32>
    %cst_268 = arith.constant 0.000000e+00 : f32
    %657 = arith.mulf %cst_268, %591 : f32
    %658 = arith.addf %576, %657 : f32
    %cst_269 = arith.constant 5.000000e-01 : f32
    %659 = arith.mulf %cst_269, %591 : f32
    %cst_270 = arith.constant 1.000000e+00 : f32
    %660 = arith.divf %659, %cst_270 : f32
    %661 = arith.addf %658, %660 : f32
    %cst_271 = arith.constant 1.000000e+00 : f32
    %662 = arith.mulf %cst_271, %592 : f32
    %663 = arith.addf %572, %662 : f32
    %cst_272 = arith.constant 5.000000e-01 : f32
    %664 = arith.mulf %cst_272, %592 : f32
    %cst_273 = arith.constant 1.000000e+00 : f32
    %665 = arith.divf %664, %cst_273 : f32
    %666 = arith.addf %663, %665 : f32
    %cst_274 = arith.constant -1.000000e+00 : f32
    %667 = arith.cmpf oge, %661, %cst_274 : f32
    %cst_275 = arith.constant 1.600000e+01 : f32
    %668 = arith.cmpf ole, %661, %cst_275 : f32
    %669 = arith.andi %667, %668 : i1
    %cst_276 = arith.constant -1.000000e+00 : f32
    %670 = arith.cmpf oge, %666, %cst_276 : f32
    %671 = arith.andi %669, %670 : i1
    %cst_277 = arith.constant 1.600000e+01 : f32
    %672 = arith.cmpf ole, %666, %cst_277 : f32
    %673 = arith.andi %671, %672 : i1
    %cst_278 = arith.constant 0.000000e+00 : f32
    %cst_279 = arith.constant 1.500000e+01 : f32
    %674 = arith.maximumf %cst_278, %661 : f32
    %675 = arith.minimumf %cst_279, %674 : f32
    %cst_280 = arith.constant 0.000000e+00 : f32
    %cst_281 = arith.constant 1.500000e+01 : f32
    %676 = arith.maximumf %cst_280, %666 : f32
    %677 = arith.minimumf %cst_281, %676 : f32
    %678 = arith.fptosi %675 : f32 to i32
    %679 = arith.fptosi %677 : f32 to i32
    %680 = arith.sitofp %678 : i32 to f32
    %681 = arith.subf %675, %680 : f32
    %682 = arith.sitofp %679 : i32 to f32
    %683 = arith.subf %677, %682 : f32
    %cst_282 = arith.constant 1.000000e+00 : f32
    %684 = arith.subf %cst_282, %681 : f32
    %cst_283 = arith.constant 1.000000e+00 : f32
    %685 = arith.subf %cst_283, %683 : f32
    %c16_i32_284 = arith.constant 16 : i32
    %686 = arith.muli %678, %c16_i32_284 : i32
    %687 = arith.addi %593, %686 : i32
    %688 = arith.addi %687, %679 : i32
    %689 = arith.index_cast %688 : i32 to index
    %c0_285 = arith.constant 0 : index
    %690 = vector.load %arg2[%689, %c0_285] : memref<536x4xf32, #tpu.memory_space<vmem>>, vector<2x4xf32>
    %c16_i32_286 = arith.constant 16 : i32
    %691 = arith.addi %688, %c16_i32_286 : i32
    %692 = arith.index_cast %691 : i32 to index
    %c0_287 = arith.constant 0 : index
    %693 = vector.load %arg2[%692, %c0_287] : memref<536x4xf32, #tpu.memory_space<vmem>>, vector<2x4xf32>
    %694 = vector.extract_strided_slice %690 {offsets = [0, 0], sizes = [1, 4], strides = [1, 1]} : vector<2x4xf32> to vector<1x4xf32>
    %695 = vector.broadcast %685 : f32 to vector<1x4xf32>
    %696 = arith.mulf %695, %694 : vector<1x4xf32>
    %697 = vector.extract_strided_slice %690 {offsets = [1, 0], sizes = [1, 4], strides = [1, 1]} : vector<2x4xf32> to vector<1x4xf32>
    %698 = vector.broadcast %683 : f32 to vector<1x4xf32>
    %699 = arith.mulf %698, %697 : vector<1x4xf32>
    %700 = arith.addf %696, %699 : vector<1x4xf32>
    %701 = vector.broadcast %684 : f32 to vector<1x4xf32>
    %702 = arith.mulf %701, %700 : vector<1x4xf32>
    %703 = vector.extract_strided_slice %693 {offsets = [0, 0], sizes = [1, 4], strides = [1, 1]} : vector<2x4xf32> to vector<1x4xf32>
    %704 = vector.broadcast %685 : f32 to vector<1x4xf32>
    %705 = arith.mulf %704, %703 : vector<1x4xf32>
    %706 = vector.extract_strided_slice %693 {offsets = [1, 0], sizes = [1, 4], strides = [1, 1]} : vector<2x4xf32> to vector<1x4xf32>
    %707 = vector.broadcast %683 : f32 to vector<1x4xf32>
    %708 = arith.mulf %707, %706 : vector<1x4xf32>
    %709 = arith.addf %705, %708 : vector<1x4xf32>
    %710 = vector.broadcast %681 : f32 to vector<1x4xf32>
    %711 = arith.mulf %710, %709 : vector<1x4xf32>
    %712 = arith.addf %702, %711 : vector<1x4xf32>
    %cst_288 = arith.constant 0.000000e+00 : f32
    %713 = vector.broadcast %cst_288 : f32 to vector<1x4xf32>
    %714 = arith.select %673, %712, %713 : vector<1x4xf32>
    %715 = arith.addf %656, %714 : vector<1x4xf32>
    %cst_289 = arith.constant 1.000000e+00 : f32
    %716 = vector.broadcast %cst_289 : f32 to vector<1x4xf32>
    %717 = arith.mulf %715, %716 : vector<1x4xf32>
    %cst_290 = arith.constant 0.000000e+00 : f32
    %718 = vector.broadcast %cst_290 : f32 to vector<1x4xf32>
    %cst_291 = arith.constant 1.000000e+00 : f32
    %719 = arith.mulf %cst_291, %591 : f32
    %720 = arith.addf %576, %719 : f32
    %cst_292 = arith.constant 5.000000e-01 : f32
    %721 = arith.mulf %cst_292, %591 : f32
    %cst_293 = arith.constant 1.000000e+00 : f32
    %722 = arith.divf %721, %cst_293 : f32
    %723 = arith.addf %720, %722 : f32
    %cst_294 = arith.constant 0.000000e+00 : f32
    %724 = arith.mulf %cst_294, %592 : f32
    %725 = arith.addf %572, %724 : f32
    %cst_295 = arith.constant 5.000000e-01 : f32
    %726 = arith.mulf %cst_295, %592 : f32
    %cst_296 = arith.constant 1.000000e+00 : f32
    %727 = arith.divf %726, %cst_296 : f32
    %728 = arith.addf %725, %727 : f32
    %cst_297 = arith.constant -1.000000e+00 : f32
    %729 = arith.cmpf oge, %723, %cst_297 : f32
    %cst_298 = arith.constant 1.600000e+01 : f32
    %730 = arith.cmpf ole, %723, %cst_298 : f32
    %731 = arith.andi %729, %730 : i1
    %cst_299 = arith.constant -1.000000e+00 : f32
    %732 = arith.cmpf oge, %728, %cst_299 : f32
    %733 = arith.andi %731, %732 : i1
    %cst_300 = arith.constant 1.600000e+01 : f32
    %734 = arith.cmpf ole, %728, %cst_300 : f32
    %735 = arith.andi %733, %734 : i1
    %cst_301 = arith.constant 0.000000e+00 : f32
    %cst_302 = arith.constant 1.500000e+01 : f32
    %736 = arith.maximumf %cst_301, %723 : f32
    %737 = arith.minimumf %cst_302, %736 : f32
    %cst_303 = arith.constant 0.000000e+00 : f32
    %cst_304 = arith.constant 1.500000e+01 : f32
    %738 = arith.maximumf %cst_303, %728 : f32
    %739 = arith.minimumf %cst_304, %738 : f32
    %740 = arith.fptosi %737 : f32 to i32
    %741 = arith.fptosi %739 : f32 to i32
    %742 = arith.sitofp %740 : i32 to f32
    %743 = arith.subf %737, %742 : f32
    %744 = arith.sitofp %741 : i32 to f32
    %745 = arith.subf %739, %744 : f32
    %cst_305 = arith.constant 1.000000e+00 : f32
    %746 = arith.subf %cst_305, %743 : f32
    %cst_306 = arith.constant 1.000000e+00 : f32
    %747 = arith.subf %cst_306, %745 : f32
    %c16_i32_307 = arith.constant 16 : i32
    %748 = arith.muli %740, %c16_i32_307 : i32
    %749 = arith.addi %593, %748 : i32
    %750 = arith.addi %749, %741 : i32
    %751 = arith.index_cast %750 : i32 to index
    %c0_308 = arith.constant 0 : index
    %752 = vector.load %arg2[%751, %c0_308] : memref<536x4xf32, #tpu.memory_space<vmem>>, vector<2x4xf32>
    %c16_i32_309 = arith.constant 16 : i32
    %753 = arith.addi %750, %c16_i32_309 : i32
    %754 = arith.index_cast %753 : i32 to index
    %c0_310 = arith.constant 0 : index
    %755 = vector.load %arg2[%754, %c0_310] : memref<536x4xf32, #tpu.memory_space<vmem>>, vector<2x4xf32>
    %756 = vector.extract_strided_slice %752 {offsets = [0, 0], sizes = [1, 4], strides = [1, 1]} : vector<2x4xf32> to vector<1x4xf32>
    %757 = vector.broadcast %747 : f32 to vector<1x4xf32>
    %758 = arith.mulf %757, %756 : vector<1x4xf32>
    %759 = vector.extract_strided_slice %752 {offsets = [1, 0], sizes = [1, 4], strides = [1, 1]} : vector<2x4xf32> to vector<1x4xf32>
    %760 = vector.broadcast %745 : f32 to vector<1x4xf32>
    %761 = arith.mulf %760, %759 : vector<1x4xf32>
    %762 = arith.addf %758, %761 : vector<1x4xf32>
    %763 = vector.broadcast %746 : f32 to vector<1x4xf32>
    %764 = arith.mulf %763, %762 : vector<1x4xf32>
    %765 = vector.extract_strided_slice %755 {offsets = [0, 0], sizes = [1, 4], strides = [1, 1]} : vector<2x4xf32> to vector<1x4xf32>
    %766 = vector.broadcast %747 : f32 to vector<1x4xf32>
    %767 = arith.mulf %766, %765 : vector<1x4xf32>
    %768 = vector.extract_strided_slice %755 {offsets = [1, 0], sizes = [1, 4], strides = [1, 1]} : vector<2x4xf32> to vector<1x4xf32>
    %769 = vector.broadcast %745 : f32 to vector<1x4xf32>
    %770 = arith.mulf %769, %768 : vector<1x4xf32>
    %771 = arith.addf %767, %770 : vector<1x4xf32>
    %772 = vector.broadcast %743 : f32 to vector<1x4xf32>
    %773 = arith.mulf %772, %771 : vector<1x4xf32>
    %774 = arith.addf %764, %773 : vector<1x4xf32>
    %cst_311 = arith.constant 0.000000e+00 : f32
    %775 = vector.broadcast %cst_311 : f32 to vector<1x4xf32>
    %776 = arith.select %735, %774, %775 : vector<1x4xf32>
    %777 = arith.addf %718, %776 : vector<1x4xf32>
    %cst_312 = arith.constant 1.000000e+00 : f32
    %778 = vector.broadcast %cst_312 : f32 to vector<1x4xf32>
    %779 = arith.mulf %777, %778 : vector<1x4xf32>
    %cst_313 = arith.constant 0.000000e+00 : f32
    %780 = vector.broadcast %cst_313 : f32 to vector<1x4xf32>
    %cst_314 = arith.constant 1.000000e+00 : f32
    %781 = arith.mulf %cst_314, %591 : f32
    %782 = arith.addf %576, %781 : f32
    %cst_315 = arith.constant 5.000000e-01 : f32
    %783 = arith.mulf %cst_315, %591 : f32
    %cst_316 = arith.constant 1.000000e+00 : f32
    %784 = arith.divf %783, %cst_316 : f32
    %785 = arith.addf %782, %784 : f32
    %cst_317 = arith.constant 1.000000e+00 : f32
    %786 = arith.mulf %cst_317, %592 : f32
    %787 = arith.addf %572, %786 : f32
    %cst_318 = arith.constant 5.000000e-01 : f32
    %788 = arith.mulf %cst_318, %592 : f32
    %cst_319 = arith.constant 1.000000e+00 : f32
    %789 = arith.divf %788, %cst_319 : f32
    %790 = arith.addf %787, %789 : f32
    %cst_320 = arith.constant -1.000000e+00 : f32
    %791 = arith.cmpf oge, %785, %cst_320 : f32
    %cst_321 = arith.constant 1.600000e+01 : f32
    %792 = arith.cmpf ole, %785, %cst_321 : f32
    %793 = arith.andi %791, %792 : i1
    %cst_322 = arith.constant -1.000000e+00 : f32
    %794 = arith.cmpf oge, %790, %cst_322 : f32
    %795 = arith.andi %793, %794 : i1
    %cst_323 = arith.constant 1.600000e+01 : f32
    %796 = arith.cmpf ole, %790, %cst_323 : f32
    %797 = arith.andi %795, %796 : i1
    %cst_324 = arith.constant 0.000000e+00 : f32
    %cst_325 = arith.constant 1.500000e+01 : f32
    %798 = arith.maximumf %cst_324, %785 : f32
    %799 = arith.minimumf %cst_325, %798 : f32
    %cst_326 = arith.constant 0.000000e+00 : f32
    %cst_327 = arith.constant 1.500000e+01 : f32
    %800 = arith.maximumf %cst_326, %790 : f32
    %801 = arith.minimumf %cst_327, %800 : f32
    %802 = arith.fptosi %799 : f32 to i32
    %803 = arith.fptosi %801 : f32 to i32
    %804 = arith.sitofp %802 : i32 to f32
    %805 = arith.subf %799, %804 : f32
    %806 = arith.sitofp %803 : i32 to f32
    %807 = arith.subf %801, %806 : f32
    %cst_328 = arith.constant 1.000000e+00 : f32
    %808 = arith.subf %cst_328, %805 : f32
    %cst_329 = arith.constant 1.000000e+00 : f32
    %809 = arith.subf %cst_329, %807 : f32
    %c16_i32_330 = arith.constant 16 : i32
    %810 = arith.muli %802, %c16_i32_330 : i32
    %811 = arith.addi %593, %810 : i32
    %812 = arith.addi %811, %803 : i32
    %813 = arith.index_cast %812 : i32 to index
    %c0_331 = arith.constant 0 : index
    %814 = vector.load %arg2[%813, %c0_331] : memref<536x4xf32, #tpu.memory_space<vmem>>, vector<2x4xf32>
    %c16_i32_332 = arith.constant 16 : i32
    %815 = arith.addi %812, %c16_i32_332 : i32
    %816 = arith.index_cast %815 : i32 to index
    %c0_333 = arith.constant 0 : index
    %817 = vector.load %arg2[%816, %c0_333] : memref<536x4xf32, #tpu.memory_space<vmem>>, vector<2x4xf32>
    %818 = vector.extract_strided_slice %814 {offsets = [0, 0], sizes = [1, 4], strides = [1, 1]} : vector<2x4xf32> to vector<1x4xf32>
    %819 = vector.broadcast %809 : f32 to vector<1x4xf32>
    %820 = arith.mulf %819, %818 : vector<1x4xf32>
    %821 = vector.extract_strided_slice %814 {offsets = [1, 0], sizes = [1, 4], strides = [1, 1]} : vector<2x4xf32> to vector<1x4xf32>
    %822 = vector.broadcast %807 : f32 to vector<1x4xf32>
    %823 = arith.mulf %822, %821 : vector<1x4xf32>
    %824 = arith.addf %820, %823 : vector<1x4xf32>
    %825 = vector.broadcast %808 : f32 to vector<1x4xf32>
    %826 = arith.mulf %825, %824 : vector<1x4xf32>
    %827 = vector.extract_strided_slice %817 {offsets = [0, 0], sizes = [1, 4], strides = [1, 1]} : vector<2x4xf32> to vector<1x4xf32>
    %828 = vector.broadcast %809 : f32 to vector<1x4xf32>
    %829 = arith.mulf %828, %827 : vector<1x4xf32>
    %830 = vector.extract_strided_slice %817 {offsets = [1, 0], sizes = [1, 4], strides = [1, 1]} : vector<2x4xf32> to vector<1x4xf32>
    %831 = vector.broadcast %807 : f32 to vector<1x4xf32>
    %832 = arith.mulf %831, %830 : vector<1x4xf32>
    %833 = arith.addf %829, %832 : vector<1x4xf32>
    %834 = vector.broadcast %805 : f32 to vector<1x4xf32>
    %835 = arith.mulf %834, %833 : vector<1x4xf32>
    %836 = arith.addf %826, %835 : vector<1x4xf32>
    %cst_334 = arith.constant 0.000000e+00 : f32
    %837 = vector.broadcast %cst_334 : f32 to vector<1x4xf32>
    %838 = arith.select %797, %836, %837 : vector<1x4xf32>
    %839 = arith.addf %780, %838 : vector<1x4xf32>
    %cst_335 = arith.constant 1.000000e+00 : f32
    %840 = vector.broadcast %cst_335 : f32 to vector<1x4xf32>
    %841 = arith.mulf %839, %840 : vector<1x4xf32>
    %842 = tpu.concatenate %655, %717, %779, %841 in 0 : vector<1x4xf32>, vector<1x4xf32>, vector<1x4xf32>, vector<1x4xf32> -> vector<4x4xf32>
    %c4_i32_336 = arith.constant 4 : i32
    %843 = arith.muli %arg0, %c4_i32_336 : i32
    %c3_i32 = arith.constant 3 : i32
    %844 = arith.addi %843, %c3_i32 : i32
    %845 = arith.index_cast %844 : i32 to index
    %c0_337 = arith.constant 0 : index
    %846 = memref.load %arg1[%845, %c0_337] : memref<8x5xf32, #tpu.memory_space<smem>>
    %847 = arith.fptosi %846 : f32 to i32
    %c0_i32_338 = arith.constant 0 : i32
    %c1_i32_339 = arith.constant 1 : i32
    %848 = arith.maxsi %c0_i32_338, %847 : i32
    %849 = arith.minsi %c1_i32_339, %848 : i32
    %850 = arith.index_cast %844 : i32 to index
    %c1_340 = arith.constant 1 : index
    %851 = memref.load %arg1[%850, %c1_340] : memref<8x5xf32, #tpu.memory_space<smem>>
    %cst_341 = arith.constant -0.574780166 : f32
    %852 = arith.mulf %851, %cst_341 : f32
    %cst_342 = arith.constant 0.000000e+00 : f32
    %853 = arith.subf %852, %cst_342 : f32
    %854 = arith.index_cast %844 : i32 to index
    %c2_343 = arith.constant 2 : index
    %855 = memref.load %arg1[%854, %c2_343] : memref<8x5xf32, #tpu.memory_space<smem>>
    %cst_344 = arith.constant -0.574780166 : f32
    %856 = arith.mulf %855, %cst_344 : f32
    %cst_345 = arith.constant 0.000000e+00 : f32
    %857 = arith.subf %856, %cst_345 : f32
    %858 = arith.index_cast %844 : i32 to index
    %c3_346 = arith.constant 3 : index
    %859 = memref.load %arg1[%858, %c3_346] : memref<8x5xf32, #tpu.memory_space<smem>>
    %cst_347 = arith.constant 1.000000e+00 : f32
    %860 = arith.addf %859, %cst_347 : f32
    %cst_348 = arith.constant -0.574780166 : f32
    %861 = arith.mulf %860, %cst_348 : f32
    %cst_349 = arith.constant 0.000000e+00 : f32
    %862 = arith.subf %861, %cst_349 : f32
    %863 = arith.index_cast %844 : i32 to index
    %c4_350 = arith.constant 4 : index
    %864 = memref.load %arg1[%863, %c4_350] : memref<8x5xf32, #tpu.memory_space<smem>>
    %cst_351 = arith.constant 1.000000e+00 : f32
    %865 = arith.addf %864, %cst_351 : f32
    %cst_352 = arith.constant -0.574780166 : f32
    %866 = arith.mulf %865, %cst_352 : f32
    %cst_353 = arith.constant 0.000000e+00 : f32
    %867 = arith.subf %866, %cst_353 : f32
    %868 = arith.subf %862, %853 : f32
    %869 = arith.subf %867, %857 : f32
    %cst_354 = arith.constant 1.000000e+00 : f32
    %870 = arith.maximumf %868, %cst_354 : f32
    %cst_355 = arith.constant 1.000000e+00 : f32
    %871 = arith.maximumf %869, %cst_355 : f32
    %cst_356 = arith.constant 2.000000e+00 : f32
    %872 = arith.divf %871, %cst_356 : f32
    %cst_357 = arith.constant 2.000000e+00 : f32
    %873 = arith.divf %870, %cst_357 : f32
    %c256_i32_358 = arith.constant 256 : i32
    %874 = arith.muli %849, %c256_i32_358 : i32
    %cst_359 = arith.constant 0.000000e+00 : f32
    %875 = vector.broadcast %cst_359 : f32 to vector<1x4xf32>
    %cst_360 = arith.constant 0.000000e+00 : f32
    %876 = arith.mulf %cst_360, %872 : f32
    %877 = arith.addf %857, %876 : f32
    %cst_361 = arith.constant 5.000000e-01 : f32
    %878 = arith.mulf %cst_361, %872 : f32
    %cst_362 = arith.constant 1.000000e+00 : f32
    %879 = arith.divf %878, %cst_362 : f32
    %880 = arith.addf %877, %879 : f32
    %cst_363 = arith.constant 0.000000e+00 : f32
    %881 = arith.mulf %cst_363, %873 : f32
    %882 = arith.addf %853, %881 : f32
    %cst_364 = arith.constant 5.000000e-01 : f32
    %883 = arith.mulf %cst_364, %873 : f32
    %cst_365 = arith.constant 1.000000e+00 : f32
    %884 = arith.divf %883, %cst_365 : f32
    %885 = arith.addf %882, %884 : f32
    %cst_366 = arith.constant -1.000000e+00 : f32
    %886 = arith.cmpf oge, %880, %cst_366 : f32
    %cst_367 = arith.constant 1.600000e+01 : f32
    %887 = arith.cmpf ole, %880, %cst_367 : f32
    %888 = arith.andi %886, %887 : i1
    %cst_368 = arith.constant -1.000000e+00 : f32
    %889 = arith.cmpf oge, %885, %cst_368 : f32
    %890 = arith.andi %888, %889 : i1
    %cst_369 = arith.constant 1.600000e+01 : f32
    %891 = arith.cmpf ole, %885, %cst_369 : f32
    %892 = arith.andi %890, %891 : i1
    %cst_370 = arith.constant 0.000000e+00 : f32
    %cst_371 = arith.constant 1.500000e+01 : f32
    %893 = arith.maximumf %cst_370, %880 : f32
    %894 = arith.minimumf %cst_371, %893 : f32
    %cst_372 = arith.constant 0.000000e+00 : f32
    %cst_373 = arith.constant 1.500000e+01 : f32
    %895 = arith.maximumf %cst_372, %885 : f32
    %896 = arith.minimumf %cst_373, %895 : f32
    %897 = arith.fptosi %894 : f32 to i32
    %898 = arith.fptosi %896 : f32 to i32
    %899 = arith.sitofp %897 : i32 to f32
    %900 = arith.subf %894, %899 : f32
    %901 = arith.sitofp %898 : i32 to f32
    %902 = arith.subf %896, %901 : f32
    %cst_374 = arith.constant 1.000000e+00 : f32
    %903 = arith.subf %cst_374, %900 : f32
    %cst_375 = arith.constant 1.000000e+00 : f32
    %904 = arith.subf %cst_375, %902 : f32
    %c16_i32_376 = arith.constant 16 : i32
    %905 = arith.muli %897, %c16_i32_376 : i32
    %906 = arith.addi %874, %905 : i32
    %907 = arith.addi %906, %898 : i32
    %908 = arith.index_cast %907 : i32 to index
    %c0_377 = arith.constant 0 : index
    %909 = vector.load %arg2[%908, %c0_377] : memref<536x4xf32, #tpu.memory_space<vmem>>, vector<2x4xf32>
    %c16_i32_378 = arith.constant 16 : i32
    %910 = arith.addi %907, %c16_i32_378 : i32
    %911 = arith.index_cast %910 : i32 to index
    %c0_379 = arith.constant 0 : index
    %912 = vector.load %arg2[%911, %c0_379] : memref<536x4xf32, #tpu.memory_space<vmem>>, vector<2x4xf32>
    %913 = vector.extract_strided_slice %909 {offsets = [0, 0], sizes = [1, 4], strides = [1, 1]} : vector<2x4xf32> to vector<1x4xf32>
    %914 = vector.broadcast %904 : f32 to vector<1x4xf32>
    %915 = arith.mulf %914, %913 : vector<1x4xf32>
    %916 = vector.extract_strided_slice %909 {offsets = [1, 0], sizes = [1, 4], strides = [1, 1]} : vector<2x4xf32> to vector<1x4xf32>
    %917 = vector.broadcast %902 : f32 to vector<1x4xf32>
    %918 = arith.mulf %917, %916 : vector<1x4xf32>
    %919 = arith.addf %915, %918 : vector<1x4xf32>
    %920 = vector.broadcast %903 : f32 to vector<1x4xf32>
    %921 = arith.mulf %920, %919 : vector<1x4xf32>
    %922 = vector.extract_strided_slice %912 {offsets = [0, 0], sizes = [1, 4], strides = [1, 1]} : vector<2x4xf32> to vector<1x4xf32>
    %923 = vector.broadcast %904 : f32 to vector<1x4xf32>
    %924 = arith.mulf %923, %922 : vector<1x4xf32>
    %925 = vector.extract_strided_slice %912 {offsets = [1, 0], sizes = [1, 4], strides = [1, 1]} : vector<2x4xf32> to vector<1x4xf32>
    %926 = vector.broadcast %902 : f32 to vector<1x4xf32>
    %927 = arith.mulf %926, %925 : vector<1x4xf32>
    %928 = arith.addf %924, %927 : vector<1x4xf32>
    %929 = vector.broadcast %900 : f32 to vector<1x4xf32>
    %930 = arith.mulf %929, %928 : vector<1x4xf32>
    %931 = arith.addf %921, %930 : vector<1x4xf32>
    %cst_380 = arith.constant 0.000000e+00 : f32
    %932 = vector.broadcast %cst_380 : f32 to vector<1x4xf32>
    %933 = arith.select %892, %931, %932 : vector<1x4xf32>
    %934 = arith.addf %875, %933 : vector<1x4xf32>
    %cst_381 = arith.constant 1.000000e+00 : f32
    %935 = vector.broadcast %cst_381 : f32 to vector<1x4xf32>
    %936 = arith.mulf %934, %935 : vector<1x4xf32>
    %cst_382 = arith.constant 0.000000e+00 : f32
    %937 = vector.broadcast %cst_382 : f32 to vector<1x4xf32>
    %cst_383 = arith.constant 0.000000e+00 : f32
    %938 = arith.mulf %cst_383, %872 : f32
    %939 = arith.addf %857, %938 : f32
    %cst_384 = arith.constant 5.000000e-01 : f32
    %940 = arith.mulf %cst_384, %872 : f32
    %cst_385 = arith.constant 1.000000e+00 : f32
    %941 = arith.divf %940, %cst_385 : f32
    %942 = arith.addf %939, %941 : f32
    %cst_386 = arith.constant 1.000000e+00 : f32
    %943 = arith.mulf %cst_386, %873 : f32
    %944 = arith.addf %853, %943 : f32
    %cst_387 = arith.constant 5.000000e-01 : f32
    %945 = arith.mulf %cst_387, %873 : f32
    %cst_388 = arith.constant 1.000000e+00 : f32
    %946 = arith.divf %945, %cst_388 : f32
    %947 = arith.addf %944, %946 : f32
    %cst_389 = arith.constant -1.000000e+00 : f32
    %948 = arith.cmpf oge, %942, %cst_389 : f32
    %cst_390 = arith.constant 1.600000e+01 : f32
    %949 = arith.cmpf ole, %942, %cst_390 : f32
    %950 = arith.andi %948, %949 : i1
    %cst_391 = arith.constant -1.000000e+00 : f32
    %951 = arith.cmpf oge, %947, %cst_391 : f32
    %952 = arith.andi %950, %951 : i1
    %cst_392 = arith.constant 1.600000e+01 : f32
    %953 = arith.cmpf ole, %947, %cst_392 : f32
    %954 = arith.andi %952, %953 : i1
    %cst_393 = arith.constant 0.000000e+00 : f32
    %cst_394 = arith.constant 1.500000e+01 : f32
    %955 = arith.maximumf %cst_393, %942 : f32
    %956 = arith.minimumf %cst_394, %955 : f32
    %cst_395 = arith.constant 0.000000e+00 : f32
    %cst_396 = arith.constant 1.500000e+01 : f32
    %957 = arith.maximumf %cst_395, %947 : f32
    %958 = arith.minimumf %cst_396, %957 : f32
    %959 = arith.fptosi %956 : f32 to i32
    %960 = arith.fptosi %958 : f32 to i32
    %961 = arith.sitofp %959 : i32 to f32
    %962 = arith.subf %956, %961 : f32
    %963 = arith.sitofp %960 : i32 to f32
    %964 = arith.subf %958, %963 : f32
    %cst_397 = arith.constant 1.000000e+00 : f32
    %965 = arith.subf %cst_397, %962 : f32
    %cst_398 = arith.constant 1.000000e+00 : f32
    %966 = arith.subf %cst_398, %964 : f32
    %c16_i32_399 = arith.constant 16 : i32
    %967 = arith.muli %959, %c16_i32_399 : i32
    %968 = arith.addi %874, %967 : i32
    %969 = arith.addi %968, %960 : i32
    %970 = arith.index_cast %969 : i32 to index
    %c0_400 = arith.constant 0 : index
    %971 = vector.load %arg2[%970, %c0_400] : memref<536x4xf32, #tpu.memory_space<vmem>>, vector<2x4xf32>
    %c16_i32_401 = arith.constant 16 : i32
    %972 = arith.addi %969, %c16_i32_401 : i32
    %973 = arith.index_cast %972 : i32 to index
    %c0_402 = arith.constant 0 : index
    %974 = vector.load %arg2[%973, %c0_402] : memref<536x4xf32, #tpu.memory_space<vmem>>, vector<2x4xf32>
    %975 = vector.extract_strided_slice %971 {offsets = [0, 0], sizes = [1, 4], strides = [1, 1]} : vector<2x4xf32> to vector<1x4xf32>
    %976 = vector.broadcast %966 : f32 to vector<1x4xf32>
    %977 = arith.mulf %976, %975 : vector<1x4xf32>
    %978 = vector.extract_strided_slice %971 {offsets = [1, 0], sizes = [1, 4], strides = [1, 1]} : vector<2x4xf32> to vector<1x4xf32>
    %979 = vector.broadcast %964 : f32 to vector<1x4xf32>
    %980 = arith.mulf %979, %978 : vector<1x4xf32>
    %981 = arith.addf %977, %980 : vector<1x4xf32>
    %982 = vector.broadcast %965 : f32 to vector<1x4xf32>
    %983 = arith.mulf %982, %981 : vector<1x4xf32>
    %984 = vector.extract_strided_slice %974 {offsets = [0, 0], sizes = [1, 4], strides = [1, 1]} : vector<2x4xf32> to vector<1x4xf32>
    %985 = vector.broadcast %966 : f32 to vector<1x4xf32>
    %986 = arith.mulf %985, %984 : vector<1x4xf32>
    %987 = vector.extract_strided_slice %974 {offsets = [1, 0], sizes = [1, 4], strides = [1, 1]} : vector<2x4xf32> to vector<1x4xf32>
    %988 = vector.broadcast %964 : f32 to vector<1x4xf32>
    %989 = arith.mulf %988, %987 : vector<1x4xf32>
    %990 = arith.addf %986, %989 : vector<1x4xf32>
    %991 = vector.broadcast %962 : f32 to vector<1x4xf32>
    %992 = arith.mulf %991, %990 : vector<1x4xf32>
    %993 = arith.addf %983, %992 : vector<1x4xf32>
    %cst_403 = arith.constant 0.000000e+00 : f32
    %994 = vector.broadcast %cst_403 : f32 to vector<1x4xf32>
    %995 = arith.select %954, %993, %994 : vector<1x4xf32>
    %996 = arith.addf %937, %995 : vector<1x4xf32>
    %cst_404 = arith.constant 1.000000e+00 : f32
    %997 = vector.broadcast %cst_404 : f32 to vector<1x4xf32>
    %998 = arith.mulf %996, %997 : vector<1x4xf32>
    %cst_405 = arith.constant 0.000000e+00 : f32
    %999 = vector.broadcast %cst_405 : f32 to vector<1x4xf32>
    %cst_406 = arith.constant 1.000000e+00 : f32
    %1000 = arith.mulf %cst_406, %872 : f32
    %1001 = arith.addf %857, %1000 : f32
    %cst_407 = arith.constant 5.000000e-01 : f32
    %1002 = arith.mulf %cst_407, %872 : f32
    %cst_408 = arith.constant 1.000000e+00 : f32
    %1003 = arith.divf %1002, %cst_408 : f32
    %1004 = arith.addf %1001, %1003 : f32
    %cst_409 = arith.constant 0.000000e+00 : f32
    %1005 = arith.mulf %cst_409, %873 : f32
    %1006 = arith.addf %853, %1005 : f32
    %cst_410 = arith.constant 5.000000e-01 : f32
    %1007 = arith.mulf %cst_410, %873 : f32
    %cst_411 = arith.constant 1.000000e+00 : f32
    %1008 = arith.divf %1007, %cst_411 : f32
    %1009 = arith.addf %1006, %1008 : f32
    %cst_412 = arith.constant -1.000000e+00 : f32
    %1010 = arith.cmpf oge, %1004, %cst_412 : f32
    %cst_413 = arith.constant 1.600000e+01 : f32
    %1011 = arith.cmpf ole, %1004, %cst_413 : f32
    %1012 = arith.andi %1010, %1011 : i1
    %cst_414 = arith.constant -1.000000e+00 : f32
    %1013 = arith.cmpf oge, %1009, %cst_414 : f32
    %1014 = arith.andi %1012, %1013 : i1
    %cst_415 = arith.constant 1.600000e+01 : f32
    %1015 = arith.cmpf ole, %1009, %cst_415 : f32
    %1016 = arith.andi %1014, %1015 : i1
    %cst_416 = arith.constant 0.000000e+00 : f32
    %cst_417 = arith.constant 1.500000e+01 : f32
    %1017 = arith.maximumf %cst_416, %1004 : f32
    %1018 = arith.minimumf %cst_417, %1017 : f32
    %cst_418 = arith.constant 0.000000e+00 : f32
    %cst_419 = arith.constant 1.500000e+01 : f32
    %1019 = arith.maximumf %cst_418, %1009 : f32
    %1020 = arith.minimumf %cst_419, %1019 : f32
    %1021 = arith.fptosi %1018 : f32 to i32
    %1022 = arith.fptosi %1020 : f32 to i32
    %1023 = arith.sitofp %1021 : i32 to f32
    %1024 = arith.subf %1018, %1023 : f32
    %1025 = arith.sitofp %1022 : i32 to f32
    %1026 = arith.subf %1020, %1025 : f32
    %cst_420 = arith.constant 1.000000e+00 : f32
    %1027 = arith.subf %cst_420, %1024 : f32
    %cst_421 = arith.constant 1.000000e+00 : f32
    %1028 = arith.subf %cst_421, %1026 : f32
    %c16_i32_422 = arith.constant 16 : i32
    %1029 = arith.muli %1021, %c16_i32_422 : i32
    %1030 = arith.addi %874, %1029 : i32
    %1031 = arith.addi %1030, %1022 : i32
    %1032 = arith.index_cast %1031 : i32 to index
    %c0_423 = arith.constant 0 : index
    %1033 = vector.load %arg2[%1032, %c0_423] : memref<536x4xf32, #tpu.memory_space<vmem>>, vector<2x4xf32>
    %c16_i32_424 = arith.constant 16 : i32
    %1034 = arith.addi %1031, %c16_i32_424 : i32
    %1035 = arith.index_cast %1034 : i32 to index
    %c0_425 = arith.constant 0 : index
    %1036 = vector.load %arg2[%1035, %c0_425] : memref<536x4xf32, #tpu.memory_space<vmem>>, vector<2x4xf32>
    %1037 = vector.extract_strided_slice %1033 {offsets = [0, 0], sizes = [1, 4], strides = [1, 1]} : vector<2x4xf32> to vector<1x4xf32>
    %1038 = vector.broadcast %1028 : f32 to vector<1x4xf32>
    %1039 = arith.mulf %1038, %1037 : vector<1x4xf32>
    %1040 = vector.extract_strided_slice %1033 {offsets = [1, 0], sizes = [1, 4], strides = [1, 1]} : vector<2x4xf32> to vector<1x4xf32>
    %1041 = vector.broadcast %1026 : f32 to vector<1x4xf32>
    %1042 = arith.mulf %1041, %1040 : vector<1x4xf32>
    %1043 = arith.addf %1039, %1042 : vector<1x4xf32>
    %1044 = vector.broadcast %1027 : f32 to vector<1x4xf32>
    %1045 = arith.mulf %1044, %1043 : vector<1x4xf32>
    %1046 = vector.extract_strided_slice %1036 {offsets = [0, 0], sizes = [1, 4], strides = [1, 1]} : vector<2x4xf32> to vector<1x4xf32>
    %1047 = vector.broadcast %1028 : f32 to vector<1x4xf32>
    %1048 = arith.mulf %1047, %1046 : vector<1x4xf32>
    %1049 = vector.extract_strided_slice %1036 {offsets = [1, 0], sizes = [1, 4], strides = [1, 1]} : vector<2x4xf32> to vector<1x4xf32>
    %1050 = vector.broadcast %1026 : f32 to vector<1x4xf32>
    %1051 = arith.mulf %1050, %1049 : vector<1x4xf32>
    %1052 = arith.addf %1048, %1051 : vector<1x4xf32>
    %1053 = vector.broadcast %1024 : f32 to vector<1x4xf32>
    %1054 = arith.mulf %1053, %1052 : vector<1x4xf32>
    %1055 = arith.addf %1045, %1054 : vector<1x4xf32>
    %cst_426 = arith.constant 0.000000e+00 : f32
    %1056 = vector.broadcast %cst_426 : f32 to vector<1x4xf32>
    %1057 = arith.select %1016, %1055, %1056 : vector<1x4xf32>
    %1058 = arith.addf %999, %1057 : vector<1x4xf32>
    %cst_427 = arith.constant 1.000000e+00 : f32
    %1059 = vector.broadcast %cst_427 : f32 to vector<1x4xf32>
    %1060 = arith.mulf %1058, %1059 : vector<1x4xf32>
    %cst_428 = arith.constant 0.000000e+00 : f32
    %1061 = vector.broadcast %cst_428 : f32 to vector<1x4xf32>
    %cst_429 = arith.constant 1.000000e+00 : f32
    %1062 = arith.mulf %cst_429, %872 : f32
    %1063 = arith.addf %857, %1062 : f32
    %cst_430 = arith.constant 5.000000e-01 : f32
    %1064 = arith.mulf %cst_430, %872 : f32
    %cst_431 = arith.constant 1.000000e+00 : f32
    %1065 = arith.divf %1064, %cst_431 : f32
    %1066 = arith.addf %1063, %1065 : f32
    %cst_432 = arith.constant 1.000000e+00 : f32
    %1067 = arith.mulf %cst_432, %873 : f32
    %1068 = arith.addf %853, %1067 : f32
    %cst_433 = arith.constant 5.000000e-01 : f32
    %1069 = arith.mulf %cst_433, %873 : f32
    %cst_434 = arith.constant 1.000000e+00 : f32
    %1070 = arith.divf %1069, %cst_434 : f32
    %1071 = arith.addf %1068, %1070 : f32
    %cst_435 = arith.constant -1.000000e+00 : f32
    %1072 = arith.cmpf oge, %1066, %cst_435 : f32
    %cst_436 = arith.constant 1.600000e+01 : f32
    %1073 = arith.cmpf ole, %1066, %cst_436 : f32
    %1074 = arith.andi %1072, %1073 : i1
    %cst_437 = arith.constant -1.000000e+00 : f32
    %1075 = arith.cmpf oge, %1071, %cst_437 : f32
    %1076 = arith.andi %1074, %1075 : i1
    %cst_438 = arith.constant 1.600000e+01 : f32
    %1077 = arith.cmpf ole, %1071, %cst_438 : f32
    %1078 = arith.andi %1076, %1077 : i1
    %cst_439 = arith.constant 0.000000e+00 : f32
    %cst_440 = arith.constant 1.500000e+01 : f32
    %1079 = arith.maximumf %cst_439, %1066 : f32
    %1080 = arith.minimumf %cst_440, %1079 : f32
    %cst_441 = arith.constant 0.000000e+00 : f32
    %cst_442 = arith.constant 1.500000e+01 : f32
    %1081 = arith.maximumf %cst_441, %1071 : f32
    %1082 = arith.minimumf %cst_442, %1081 : f32
    %1083 = arith.fptosi %1080 : f32 to i32
    %1084 = arith.fptosi %1082 : f32 to i32
    %1085 = arith.sitofp %1083 : i32 to f32
    %1086 = arith.subf %1080, %1085 : f32
    %1087 = arith.sitofp %1084 : i32 to f32
    %1088 = arith.subf %1082, %1087 : f32
    %cst_443 = arith.constant 1.000000e+00 : f32
    %1089 = arith.subf %cst_443, %1086 : f32
    %cst_444 = arith.constant 1.000000e+00 : f32
    %1090 = arith.subf %cst_444, %1088 : f32
    %c16_i32_445 = arith.constant 16 : i32
    %1091 = arith.muli %1083, %c16_i32_445 : i32
    %1092 = arith.addi %874, %1091 : i32
    %1093 = arith.addi %1092, %1084 : i32
    %1094 = arith.index_cast %1093 : i32 to index
    %c0_446 = arith.constant 0 : index
    %1095 = vector.load %arg2[%1094, %c0_446] : memref<536x4xf32, #tpu.memory_space<vmem>>, vector<2x4xf32>
    %c16_i32_447 = arith.constant 16 : i32
    %1096 = arith.addi %1093, %c16_i32_447 : i32
    %1097 = arith.index_cast %1096 : i32 to index
    %c0_448 = arith.constant 0 : index
    %1098 = vector.load %arg2[%1097, %c0_448] : memref<536x4xf32, #tpu.memory_space<vmem>>, vector<2x4xf32>
    %1099 = vector.extract_strided_slice %1095 {offsets = [0, 0], sizes = [1, 4], strides = [1, 1]} : vector<2x4xf32> to vector<1x4xf32>
    %1100 = vector.broadcast %1090 : f32 to vector<1x4xf32>
    %1101 = arith.mulf %1100, %1099 : vector<1x4xf32>
    %1102 = vector.extract_strided_slice %1095 {offsets = [1, 0], sizes = [1, 4], strides = [1, 1]} : vector<2x4xf32> to vector<1x4xf32>
    %1103 = vector.broadcast %1088 : f32 to vector<1x4xf32>
    %1104 = arith.mulf %1103, %1102 : vector<1x4xf32>
    %1105 = arith.addf %1101, %1104 : vector<1x4xf32>
    %1106 = vector.broadcast %1089 : f32 to vector<1x4xf32>
    %1107 = arith.mulf %1106, %1105 : vector<1x4xf32>
    %1108 = vector.extract_strided_slice %1098 {offsets = [0, 0], sizes = [1, 4], strides = [1, 1]} : vector<2x4xf32> to vector<1x4xf32>
    %1109 = vector.broadcast %1090 : f32 to vector<1x4xf32>
    %1110 = arith.mulf %1109, %1108 : vector<1x4xf32>
    %1111 = vector.extract_strided_slice %1098 {offsets = [1, 0], sizes = [1, 4], strides = [1, 1]} : vector<2x4xf32> to vector<1x4xf32>
    %1112 = vector.broadcast %1088 : f32 to vector<1x4xf32>
    %1113 = arith.mulf %1112, %1111 : vector<1x4xf32>
    %1114 = arith.addf %1110, %1113 : vector<1x4xf32>
    %1115 = vector.broadcast %1086 : f32 to vector<1x4xf32>
    %1116 = arith.mulf %1115, %1114 : vector<1x4xf32>
    %1117 = arith.addf %1107, %1116 : vector<1x4xf32>
    %cst_449 = arith.constant 0.000000e+00 : f32
    %1118 = vector.broadcast %cst_449 : f32 to vector<1x4xf32>
    %1119 = arith.select %1078, %1117, %1118 : vector<1x4xf32>
    %1120 = arith.addf %1061, %1119 : vector<1x4xf32>
    %cst_450 = arith.constant 1.000000e+00 : f32
    %1121 = vector.broadcast %cst_450 : f32 to vector<1x4xf32>
    %1122 = arith.mulf %1120, %1121 : vector<1x4xf32>
    %1123 = tpu.concatenate %936, %998, %1060, %1122 in 0 : vector<1x4xf32>, vector<1x4xf32>, vector<1x4xf32>, vector<1x4xf32> -> vector<4x4xf32>
    %1124 = vector.shape_cast %280 : vector<4x4xf32> to vector<1x4x4xf32>
    %1125 = vector.shape_cast %561 : vector<4x4xf32> to vector<1x4x4xf32>
    %1126 = vector.shape_cast %842 : vector<4x4xf32> to vector<1x4x4xf32>
    %1127 = vector.shape_cast %1123 : vector<4x4xf32> to vector<1x4x4xf32>
    %1128 = tpu.concatenate %1124, %1125, %1126, %1127 in 0 : vector<1x4x4xf32>, vector<1x4x4xf32>, vector<1x4x4xf32>, vector<1x4x4xf32> -> vector<4x4x4xf32>
    %c0_451 = arith.constant 0 : index
    %c0_452 = arith.constant 0 : index
    %c0_453 = arith.constant 0 : index
    %1129 = vector.load %arg3[%c0_451, %c0_452, %c0_453] : memref<4x4x4xf32, #tpu.memory_space<vmem>>, vector<4x4x4xf32>
    tpu.vector_store %arg3[%c0_451, %c0_452, %c0_453], %1128 {strides = array<i32>} : memref<4x4x4xf32, #tpu.memory_space<vmem>>, vector<4x4x4xf32>,
    return
  }
  func.func @transform_0(%arg0: i32) -> (i32, i32) {
    %c0_i32 = arith.constant 0 : i32
    %c0_i32_0 = arith.constant 0 : i32
    %c0_i32_1 = arith.constant 0 : i32
    return %c0_i32, %c0_i32_0 : i32, i32
  }
  func.func @transform_1(%arg0: i32) -> (i32, i32) {
    %c0_i32 = arith.constant 0 : i32
    %c0_i32_0 = arith.constant 0 : i32
    %c0_i32_1 = arith.constant 0 : i32
    return %c0_i32, %c0_i32_0 : i32, i32
  }
  func.func @transform_2(%arg0: i32) -> (i32, i32, i32) {
    %c0_i32 = arith.constant 0 : i32
    %c0_i32_0 = arith.constant 0 : i32
    %c0_i32_1 = arith.constant 0 : i32
    return %arg0, %c0_i32, %c0_i32_0 : i32, i32, i32
  }
}

module attributes {stable_mosaic.version = 11 : i64} {
  func.func @_roi_align_kernel(%arg0: i32, %arg1: memref<8x5xf32, #tpu.memory_space<smem>>, %arg2: memref<536x4xf32, #tpu.memory_space<vmem>>, %arg3: memref<4x4x4xf32, #tpu.memory_space<vmem>>) attributes {dimension_semantics = [#tpu.dimension_semantics<parallel>], iteration_bounds = array<i64: 2>, scalar_prefetch = 0 : i64, scratch_operands = 0 : i64, tpu.core_type = #tpu.core_type<tc>, window_params = [{transform_indices = @transform_0, window_bounds = array<i64: 8, 5>}, {pipeline_mode = #tpu.pipeline_mode<synchronous>, transform_indices = @transform_1, window_bounds = array<i64: 536, 4>}, {transform_indices = @transform_2, window_bounds = array<i64: 4, 4, 4>}]} {
    %c4_i32 = arith.constant 4 : i32
    %0 = arith.muli %arg0, %c4_i32 : i32
    %c0_i32 = arith.constant 0 : i32
    %1 = arith.addi %0, %c0_i32 : i32
    %2 = arith.index_cast %1 : i32 to index
    %c0 = arith.constant 0 : index
    %3 = memref.load %arg1[%2, %c0] : memref<8x5xf32, #tpu.memory_space<smem>>
    %4 = arith.fptosi %3 : f32 to i32
    %c0_i32_0 = arith.constant 0 : i32
    %c1_i32 = arith.constant 1 : i32
    %5 = arith.maxsi %c0_i32_0, %4 : i32
    %6 = arith.minsi %c1_i32, %5 : i32
    %7 = arith.index_cast %1 : i32 to index
    %c1 = arith.constant 1 : index
    %8 = memref.load %arg1[%7, %c1] : memref<8x5xf32, #tpu.memory_space<smem>>
    %cst = arith.constant -0.574780166 : f32
    %9 = arith.mulf %8, %cst : f32
    %cst_1 = arith.constant 0.000000e+00 : f32
    %10 = arith.subf %9, %cst_1 : f32
    %11 = arith.index_cast %1 : i32 to index
    %c2 = arith.constant 2 : index
    %12 = memref.load %arg1[%11, %c2] : memref<8x5xf32, #tpu.memory_space<smem>>
    %cst_2 = arith.constant -0.574780166 : f32
    %13 = arith.mulf %12, %cst_2 : f32
    %cst_3 = arith.constant 0.000000e+00 : f32
    %14 = arith.subf %13, %cst_3 : f32
    %15 = arith.index_cast %1 : i32 to index
    %c3 = arith.constant 3 : index
    %16 = memref.load %arg1[%15, %c3] : memref<8x5xf32, #tpu.memory_space<smem>>
    %cst_4 = arith.constant 1.000000e+00 : f32
    %17 = arith.addf %16, %cst_4 : f32
    %cst_5 = arith.constant -0.574780166 : f32
    %18 = arith.mulf %17, %cst_5 : f32
    %cst_6 = arith.constant 0.000000e+00 : f32
    %19 = arith.subf %18, %cst_6 : f32
    %20 = arith.index_cast %1 : i32 to index
    %c4 = arith.constant 4 : index
    %21 = memref.load %arg1[%20, %c4] : memref<8x5xf32, #tpu.memory_space<smem>>
    %cst_7 = arith.constant 1.000000e+00 : f32
    %22 = arith.addf %21, %cst_7 : f32
    %cst_8 = arith.constant -0.574780166 : f32
    %23 = arith.mulf %22, %cst_8 : f32
    %cst_9 = arith.constant 0.000000e+00 : f32
    %24 = arith.subf %23, %cst_9 : f32
    %25 = arith.subf %19, %10 : f32
    %26 = arith.subf %24, %14 : f32
    %cst_10 = arith.constant 1.000000e+00 : f32
    %27 = arith.maximumf %25, %cst_10 : f32
    %cst_11 = arith.constant 1.000000e+00 : f32
    %28 = arith.maximumf %26, %cst_11 : f32
    %cst_12 = arith.constant 2.000000e+00 : f32
    %29 = arith.divf %28, %cst_12 : f32
    %cst_13 = arith.constant 2.000000e+00 : f32
    %30 = arith.divf %27, %cst_13 : f32
    %c256_i32 = arith.constant 256 : i32
    %31 = arith.muli %6, %c256_i32 : i32
    %cst_14 = arith.constant 0.000000e+00 : f32
    %32 = vector.broadcast %cst_14 : f32 to vector<1x4xf32>
    %cst_15 = arith.constant 0.000000e+00 : f32
    %33 = arith.mulf %cst_15, %29 : f32
    %34 = arith.addf %14, %33 : f32
    %cst_16 = arith.constant 5.000000e-01 : f32
    %35 = arith.mulf %cst_16, %29 : f32
    %cst_17 = arith.constant 1.000000e+00 : f32
    %36 = arith.divf %35, %cst_17 : f32
    %37 = arith.addf %34, %36 : f32
    %cst_18 = arith.constant 0.000000e+00 : f32
    %38 = arith.mulf %cst_18, %30 : f32
    %39 = arith.addf %10, %38 : f32
    %cst_19 = arith.constant 5.000000e-01 : f32
    %40 = arith.mulf %cst_19, %30 : f32
    %cst_20 = arith.constant 1.000000e+00 : f32
    %41 = arith.divf %40, %cst_20 : f32
    %42 = arith.addf %39, %41 : f32
    %cst_21 = arith.constant -1.000000e+00 : f32
    %43 = arith.cmpf oge, %37, %cst_21 : f32
    %cst_22 = arith.constant 1.600000e+01 : f32
    %44 = arith.cmpf ole, %37, %cst_22 : f32
    %45 = arith.andi %43, %44 : i1
    %cst_23 = arith.constant -1.000000e+00 : f32
    %46 = arith.cmpf oge, %42, %cst_23 : f32
    %47 = arith.andi %45, %46 : i1
    %cst_24 = arith.constant 1.600000e+01 : f32
    %48 = arith.cmpf ole, %42, %cst_24 : f32
    %49 = arith.andi %47, %48 : i1
    %cst_25 = arith.constant 0.000000e+00 : f32
    %cst_26 = arith.constant 1.500000e+01 : f32
    %50 = arith.maximumf %cst_25, %37 : f32
    %51 = arith.minimumf %cst_26, %50 : f32
    %cst_27 = arith.constant 0.000000e+00 : f32
    %cst_28 = arith.constant 1.500000e+01 : f32
    %52 = arith.maximumf %cst_27, %42 : f32
    %53 = arith.minimumf %cst_28, %52 : f32
    %54 = arith.fptosi %51 : f32 to i32
    %55 = arith.fptosi %53 : f32 to i32
    %56 = arith.sitofp %54 : i32 to f32
    %57 = arith.subf %51, %56 : f32
    %58 = arith.sitofp %55 : i32 to f32
    %59 = arith.subf %53, %58 : f32
    %cst_29 = arith.constant 1.000000e+00 : f32
    %60 = arith.subf %cst_29, %57 : f32
    %cst_30 = arith.constant 1.000000e+00 : f32
    %61 = arith.subf %cst_30, %59 : f32
    %c16_i32 = arith.constant 16 : i32
    %62 = arith.muli %54, %c16_i32 : i32
    %63 = arith.addi %31, %62 : i32
    %64 = arith.addi %63, %55 : i32
    %65 = arith.index_cast %64 : i32 to index
    %c0_31 = arith.constant 0 : index
    %66 = vector.load %arg2[%65, %c0_31] : memref<536x4xf32, #tpu.memory_space<vmem>>, vector<2x4xf32>
    %c16_i32_32 = arith.constant 16 : i32
    %67 = arith.addi %64, %c16_i32_32 : i32
    %68 = arith.index_cast %67 : i32 to index
    %c0_33 = arith.constant 0 : index
    %69 = vector.load %arg2[%68, %c0_33] : memref<536x4xf32, #tpu.memory_space<vmem>>, vector<2x4xf32>
    %70 = vector.extract_strided_slice %66 {offsets = [0, 0], sizes = [1, 4], strides = [1, 1]} : vector<2x4xf32> to vector<1x4xf32>
    %71 = vector.broadcast %61 : f32 to vector<1x4xf32>
    %72 = arith.mulf %71, %70 : vector<1x4xf32>
    %73 = vector.extract_strided_slice %66 {offsets = [1, 0], sizes = [1, 4], strides = [1, 1]} : vector<2x4xf32> to vector<1x4xf32>
    %74 = vector.broadcast %59 : f32 to vector<1x4xf32>
    %75 = arith.mulf %74, %73 : vector<1x4xf32>
    %76 = arith.addf %72, %75 : vector<1x4xf32>
    %77 = vector.broadcast %60 : f32 to vector<1x4xf32>
    %78 = arith.mulf %77, %76 : vector<1x4xf32>
    %79 = vector.extract_strided_slice %69 {offsets = [0, 0], sizes = [1, 4], strides = [1, 1]} : vector<2x4xf32> to vector<1x4xf32>
    %80 = vector.broadcast %61 : f32 to vector<1x4xf32>
    %81 = arith.mulf %80, %79 : vector<1x4xf32>
    %82 = vector.extract_strided_slice %69 {offsets = [1, 0], sizes = [1, 4], strides = [1, 1]} : vector<2x4xf32> to vector<1x4xf32>
    %83 = vector.broadcast %59 : f32 to vector<1x4xf32>
    %84 = arith.mulf %83, %82 : vector<1x4xf32>
    %85 = arith.addf %81, %84 : vector<1x4xf32>
    %86 = vector.broadcast %57 : f32 to vector<1x4xf32>
    %87 = arith.mulf %86, %85 : vector<1x4xf32>
    %88 = arith.addf %78, %87 : vector<1x4xf32>
    %cst_34 = arith.constant 0.000000e+00 : f32
    %89 = vector.broadcast %cst_34 : f32 to vector<1x4xf32>
    %90 = arith.select %49, %88, %89 : vector<1x4xf32>
    %91 = arith.addf %32, %90 : vector<1x4xf32>
    %cst_35 = arith.constant 1.000000e+00 : f32
    %92 = vector.broadcast %cst_35 : f32 to vector<1x4xf32>
    %93 = arith.mulf %91, %92 : vector<1x4xf32>
    %cst_36 = arith.constant 0.000000e+00 : f32
    %94 = vector.broadcast %cst_36 : f32 to vector<1x4xf32>
    %cst_37 = arith.constant 0.000000e+00 : f32
    %95 = arith.mulf %cst_37, %29 : f32
    %96 = arith.addf %14, %95 : f32
    %cst_38 = arith.constant 5.000000e-01 : f32
    %97 = arith.mulf %cst_38, %29 : f32
    %cst_39 = arith.constant 1.000000e+00 : f32
    %98 = arith.divf %97, %cst_39 : f32
    %99 = arith.addf %96, %98 : f32
    %cst_40 = arith.constant 1.000000e+00 : f32
    %100 = arith.mulf %cst_40, %30 : f32
    %101 = arith.addf %10, %100 : f32
    %cst_41 = arith.constant 5.000000e-01 : f32
    %102 = arith.mulf %cst_41, %30 : f32
    %cst_42 = arith.constant 1.000000e+00 : f32
    %103 = arith.divf %102, %cst_42 : f32
    %104 = arith.addf %101, %103 : f32
    %cst_43 = arith.constant -1.000000e+00 : f32
    %105 = arith.cmpf oge, %99, %cst_43 : f32
    %cst_44 = arith.constant 1.600000e+01 : f32
    %106 = arith.cmpf ole, %99, %cst_44 : f32
    %107 = arith.andi %105, %106 : i1
    %cst_45 = arith.constant -1.000000e+00 : f32
    %108 = arith.cmpf oge, %104, %cst_45 : f32
    %109 = arith.andi %107, %108 : i1
    %cst_46 = arith.constant 1.600000e+01 : f32
    %110 = arith.cmpf ole, %104, %cst_46 : f32
    %111 = arith.andi %109, %110 : i1
    %cst_47 = arith.constant 0.000000e+00 : f32
    %cst_48 = arith.constant 1.500000e+01 : f32
    %112 = arith.maximumf %cst_47, %99 : f32
    %113 = arith.minimumf %cst_48, %112 : f32
    %cst_49 = arith.constant 0.000000e+00 : f32
    %cst_50 = arith.constant 1.500000e+01 : f32
    %114 = arith.maximumf %cst_49, %104 : f32
    %115 = arith.minimumf %cst_50, %114 : f32
    %116 = arith.fptosi %113 : f32 to i32
    %117 = arith.fptosi %115 : f32 to i32
    %118 = arith.sitofp %116 : i32 to f32
    %119 = arith.subf %113, %118 : f32
    %120 = arith.sitofp %117 : i32 to f32
    %121 = arith.subf %115, %120 : f32
    %cst_51 = arith.constant 1.000000e+00 : f32
    %122 = arith.subf %cst_51, %119 : f32
    %cst_52 = arith.constant 1.000000e+00 : f32
    %123 = arith.subf %cst_52, %121 : f32
    %c16_i32_53 = arith.constant 16 : i32
    %124 = arith.muli %116, %c16_i32_53 : i32
    %125 = arith.addi %31, %124 : i32
    %126 = arith.addi %125, %117 : i32
    %127 = arith.index_cast %126 : i32 to index
    %c0_54 = arith.constant 0 : index
    %128 = vector.load %arg2[%127, %c0_54] : memref<536x4xf32, #tpu.memory_space<vmem>>, vector<2x4xf32>
    %c16_i32_55 = arith.constant 16 : i32
    %129 = arith.addi %126, %c16_i32_55 : i32
    %130 = arith.index_cast %129 : i32 to index
    %c0_56 = arith.constant 0 : index
    %131 = vector.load %arg2[%130, %c0_56] : memref<536x4xf32, #tpu.memory_space<vmem>>, vector<2x4xf32>
    %132 = vector.extract_strided_slice %128 {offsets = [0, 0], sizes = [1, 4], strides = [1, 1]} : vector<2x4xf32> to vector<1x4xf32>
    %133 = vector.broadcast %123 : f32 to vector<1x4xf32>
    %134 = arith.mulf %133, %132 : vector<1x4xf32>
    %135 = vector.extract_strided_slice %128 {offsets = [1, 0], sizes = [1, 4], strides = [1, 1]} : vector<2x4xf32> to vector<1x4xf32>
    %136 = vector.broadcast %121 : f32 to vector<1x4xf32>
    %137 = arith.mulf %136, %135 : vector<1x4xf32>
    %138 = arith.addf %134, %137 : vector<1x4xf32>
    %139 = vector.broadcast %122 : f32 to vector<1x4xf32>
    %140 = arith.mulf %139, %138 : vector<1x4xf32>
    %141 = vector.extract_strided_slice %131 {offsets = [0, 0], sizes = [1, 4], strides = [1, 1]} : vector<2x4xf32> to vector<1x4xf32>
    %142 = vector.broadcast %123 : f32 to vector<1x4xf32>
    %143 = arith.mulf %142, %141 : vector<1x4xf32>
    %144 = vector.extract_strided_slice %131 {offsets = [1, 0], sizes = [1, 4], strides = [1, 1]} : vector<2x4xf32> to vector<1x4xf32>
    %145 = vector.broadcast %121 : f32 to vector<1x4xf32>
    %146 = arith.mulf %145, %144 : vector<1x4xf32>
    %147 = arith.addf %143, %146 : vector<1x4xf32>
    %148 = vector.broadcast %119 : f32 to vector<1x4xf32>
    %149 = arith.mulf %148, %147 : vector<1x4xf32>
    %150 = arith.addf %140, %149 : vector<1x4xf32>
    %cst_57 = arith.constant 0.000000e+00 : f32
    %151 = vector.broadcast %cst_57 : f32 to vector<1x4xf32>
    %152 = arith.select %111, %150, %151 : vector<1x4xf32>
    %153 = arith.addf %94, %152 : vector<1x4xf32>
    %cst_58 = arith.constant 1.000000e+00 : f32
    %154 = vector.broadcast %cst_58 : f32 to vector<1x4xf32>
    %155 = arith.mulf %153, %154 : vector<1x4xf32>
    %cst_59 = arith.constant 0.000000e+00 : f32
    %156 = vector.broadcast %cst_59 : f32 to vector<1x4xf32>
    %cst_60 = arith.constant 1.000000e+00 : f32
    %157 = arith.mulf %cst_60, %29 : f32
    %158 = arith.addf %14, %157 : f32
    %cst_61 = arith.constant 5.000000e-01 : f32
    %159 = arith.mulf %cst_61, %29 : f32
    %cst_62 = arith.constant 1.000000e+00 : f32
    %160 = arith.divf %159, %cst_62 : f32
    %161 = arith.addf %158, %160 : f32
    %cst_63 = arith.constant 0.000000e+00 : f32
    %162 = arith.mulf %cst_63, %30 : f32
    %163 = arith.addf %10, %162 : f32
    %cst_64 = arith.constant 5.000000e-01 : f32
    %164 = arith.mulf %cst_64, %30 : f32
    %cst_65 = arith.constant 1.000000e+00 : f32
    %165 = arith.divf %164, %cst_65 : f32
    %166 = arith.addf %163, %165 : f32
    %cst_66 = arith.constant -1.000000e+00 : f32
    %167 = arith.cmpf oge, %161, %cst_66 : f32
    %cst_67 = arith.constant 1.600000e+01 : f32
    %168 = arith.cmpf ole, %161, %cst_67 : f32
    %169 = arith.andi %167, %168 : i1
    %cst_68 = arith.constant -1.000000e+00 : f32
    %170 = arith.cmpf oge, %166, %cst_68 : f32
    %171 = arith.andi %169, %170 : i1
    %cst_69 = arith.constant 1.600000e+01 : f32
    %172 = arith.cmpf ole, %166, %cst_69 : f32
    %173 = arith.andi %171, %172 : i1
    %cst_70 = arith.constant 0.000000e+00 : f32
    %cst_71 = arith.constant 1.500000e+01 : f32
    %174 = arith.maximumf %cst_70, %161 : f32
    %175 = arith.minimumf %cst_71, %174 : f32
    %cst_72 = arith.constant 0.000000e+00 : f32
    %cst_73 = arith.constant 1.500000e+01 : f32
    %176 = arith.maximumf %cst_72, %166 : f32
    %177 = arith.minimumf %cst_73, %176 : f32
    %178 = arith.fptosi %175 : f32 to i32
    %179 = arith.fptosi %177 : f32 to i32
    %180 = arith.sitofp %178 : i32 to f32
    %181 = arith.subf %175, %180 : f32
    %182 = arith.sitofp %179 : i32 to f32
    %183 = arith.subf %177, %182 : f32
    %cst_74 = arith.constant 1.000000e+00 : f32
    %184 = arith.subf %cst_74, %181 : f32
    %cst_75 = arith.constant 1.000000e+00 : f32
    %185 = arith.subf %cst_75, %183 : f32
    %c16_i32_76 = arith.constant 16 : i32
    %186 = arith.muli %178, %c16_i32_76 : i32
    %187 = arith.addi %31, %186 : i32
    %188 = arith.addi %187, %179 : i32
    %189 = arith.index_cast %188 : i32 to index
    %c0_77 = arith.constant 0 : index
    %190 = vector.load %arg2[%189, %c0_77] : memref<536x4xf32, #tpu.memory_space<vmem>>, vector<2x4xf32>
    %c16_i32_78 = arith.constant 16 : i32
    %191 = arith.addi %188, %c16_i32_78 : i32
    %192 = arith.index_cast %191 : i32 to index
    %c0_79 = arith.constant 0 : index
    %193 = vector.load %arg2[%192, %c0_79] : memref<536x4xf32, #tpu.memory_space<vmem>>, vector<2x4xf32>
    %194 = vector.extract_strided_slice %190 {offsets = [0, 0], sizes = [1, 4], strides = [1, 1]} : vector<2x4xf32> to vector<1x4xf32>
    %195 = vector.broadcast %185 : f32 to vector<1x4xf32>
    %196 = arith.mulf %195, %194 : vector<1x4xf32>
    %197 = vector.extract_strided_slice %190 {offsets = [1, 0], sizes = [1, 4], strides = [1, 1]} : vector<2x4xf32> to vector<1x4xf32>
    %198 = vector.broadcast %183 : f32 to vector<1x4xf32>
    %199 = arith.mulf %198, %197 : vector<1x4xf32>
    %200 = arith.addf %196, %199 : vector<1x4xf32>
    %201 = vector.broadcast %184 : f32 to vector<1x4xf32>
    %202 = arith.mulf %201, %200 : vector<1x4xf32>
    %203 = vector.extract_strided_slice %193 {offsets = [0, 0], sizes = [1, 4], strides = [1, 1]} : vector<2x4xf32> to vector<1x4xf32>
    %204 = vector.broadcast %185 : f32 to vector<1x4xf32>
    %205 = arith.mulf %204, %203 : vector<1x4xf32>
    %206 = vector.extract_strided_slice %193 {offsets = [1, 0], sizes = [1, 4], strides = [1, 1]} : vector<2x4xf32> to vector<1x4xf32>
    %207 = vector.broadcast %183 : f32 to vector<1x4xf32>
    %208 = arith.mulf %207, %206 : vector<1x4xf32>
    %209 = arith.addf %205, %208 : vector<1x4xf32>
    %210 = vector.broadcast %181 : f32 to vector<1x4xf32>
    %211 = arith.mulf %210, %209 : vector<1x4xf32>
    %212 = arith.addf %202, %211 : vector<1x4xf32>
    %cst_80 = arith.constant 0.000000e+00 : f32
    %213 = vector.broadcast %cst_80 : f32 to vector<1x4xf32>
    %214 = arith.select %173, %212, %213 : vector<1x4xf32>
    %215 = arith.addf %156, %214 : vector<1x4xf32>
    %cst_81 = arith.constant 1.000000e+00 : f32
    %216 = vector.broadcast %cst_81 : f32 to vector<1x4xf32>
    %217 = arith.mulf %215, %216 : vector<1x4xf32>
    %cst_82 = arith.constant 0.000000e+00 : f32
    %218 = vector.broadcast %cst_82 : f32 to vector<1x4xf32>
    %cst_83 = arith.constant 1.000000e+00 : f32
    %219 = arith.mulf %cst_83, %29 : f32
    %220 = arith.addf %14, %219 : f32
    %cst_84 = arith.constant 5.000000e-01 : f32
    %221 = arith.mulf %cst_84, %29 : f32
    %cst_85 = arith.constant 1.000000e+00 : f32
    %222 = arith.divf %221, %cst_85 : f32
    %223 = arith.addf %220, %222 : f32
    %cst_86 = arith.constant 1.000000e+00 : f32
    %224 = arith.mulf %cst_86, %30 : f32
    %225 = arith.addf %10, %224 : f32
    %cst_87 = arith.constant 5.000000e-01 : f32
    %226 = arith.mulf %cst_87, %30 : f32
    %cst_88 = arith.constant 1.000000e+00 : f32
    %227 = arith.divf %226, %cst_88 : f32
    %228 = arith.addf %225, %227 : f32
    %cst_89 = arith.constant -1.000000e+00 : f32
    %229 = arith.cmpf oge, %223, %cst_89 : f32
    %cst_90 = arith.constant 1.600000e+01 : f32
    %230 = arith.cmpf ole, %223, %cst_90 : f32
    %231 = arith.andi %229, %230 : i1
    %cst_91 = arith.constant -1.000000e+00 : f32
    %232 = arith.cmpf oge, %228, %cst_91 : f32
    %233 = arith.andi %231, %232 : i1
    %cst_92 = arith.constant 1.600000e+01 : f32
    %234 = arith.cmpf ole, %228, %cst_92 : f32
    %235 = arith.andi %233, %234 : i1
    %cst_93 = arith.constant 0.000000e+00 : f32
    %cst_94 = arith.constant 1.500000e+01 : f32
    %236 = arith.maximumf %cst_93, %223 : f32
    %237 = arith.minimumf %cst_94, %236 : f32
    %cst_95 = arith.constant 0.000000e+00 : f32
    %cst_96 = arith.constant 1.500000e+01 : f32
    %238 = arith.maximumf %cst_95, %228 : f32
    %239 = arith.minimumf %cst_96, %238 : f32
    %240 = arith.fptosi %237 : f32 to i32
    %241 = arith.fptosi %239 : f32 to i32
    %242 = arith.sitofp %240 : i32 to f32
    %243 = arith.subf %237, %242 : f32
    %244 = arith.sitofp %241 : i32 to f32
    %245 = arith.subf %239, %244 : f32
    %cst_97 = arith.constant 1.000000e+00 : f32
    %246 = arith.subf %cst_97, %243 : f32
    %cst_98 = arith.constant 1.000000e+00 : f32
    %247 = arith.subf %cst_98, %245 : f32
    %c16_i32_99 = arith.constant 16 : i32
    %248 = arith.muli %240, %c16_i32_99 : i32
    %249 = arith.addi %31, %248 : i32
    %250 = arith.addi %249, %241 : i32
    %251 = arith.index_cast %250 : i32 to index
    %c0_100 = arith.constant 0 : index
    %252 = vector.load %arg2[%251, %c0_100] : memref<536x4xf32, #tpu.memory_space<vmem>>, vector<2x4xf32>
    %c16_i32_101 = arith.constant 16 : i32
    %253 = arith.addi %250, %c16_i32_101 : i32
    %254 = arith.index_cast %253 : i32 to index
    %c0_102 = arith.constant 0 : index
    %255 = vector.load %arg2[%254, %c0_102] : memref<536x4xf32, #tpu.memory_space<vmem>>, vector<2x4xf32>
    %256 = vector.extract_strided_slice %252 {offsets = [0, 0], sizes = [1, 4], strides = [1, 1]} : vector<2x4xf32> to vector<1x4xf32>
    %257 = vector.broadcast %247 : f32 to vector<1x4xf32>
    %258 = arith.mulf %257, %256 : vector<1x4xf32>
    %259 = vector.extract_strided_slice %252 {offsets = [1, 0], sizes = [1, 4], strides = [1, 1]} : vector<2x4xf32> to vector<1x4xf32>
    %260 = vector.broadcast %245 : f32 to vector<1x4xf32>
    %261 = arith.mulf %260, %259 : vector<1x4xf32>
    %262 = arith.addf %258, %261 : vector<1x4xf32>
    %263 = vector.broadcast %246 : f32 to vector<1x4xf32>
    %264 = arith.mulf %263, %262 : vector<1x4xf32>
    %265 = vector.extract_strided_slice %255 {offsets = [0, 0], sizes = [1, 4], strides = [1, 1]} : vector<2x4xf32> to vector<1x4xf32>
    %266 = vector.broadcast %247 : f32 to vector<1x4xf32>
    %267 = arith.mulf %266, %265 : vector<1x4xf32>
    %268 = vector.extract_strided_slice %255 {offsets = [1, 0], sizes = [1, 4], strides = [1, 1]} : vector<2x4xf32> to vector<1x4xf32>
    %269 = vector.broadcast %245 : f32 to vector<1x4xf32>
    %270 = arith.mulf %269, %268 : vector<1x4xf32>
    %271 = arith.addf %267, %270 : vector<1x4xf32>
    %272 = vector.broadcast %243 : f32 to vector<1x4xf32>
    %273 = arith.mulf %272, %271 : vector<1x4xf32>
    %274 = arith.addf %264, %273 : vector<1x4xf32>
    %cst_103 = arith.constant 0.000000e+00 : f32
    %275 = vector.broadcast %cst_103 : f32 to vector<1x4xf32>
    %276 = arith.select %235, %274, %275 : vector<1x4xf32>
    %277 = arith.addf %218, %276 : vector<1x4xf32>
    %cst_104 = arith.constant 1.000000e+00 : f32
    %278 = vector.broadcast %cst_104 : f32 to vector<1x4xf32>
    %279 = arith.mulf %277, %278 : vector<1x4xf32>
    %280 = tpu.concatenate %93, %155, %217, %279 in 0 : vector<1x4xf32>, vector<1x4xf32>, vector<1x4xf32>, vector<1x4xf32> -> vector<4x4xf32>
    %c4_i32_105 = arith.constant 4 : i32
    %281 = arith.muli %arg0, %c4_i32_105 : i32
    %c1_i32_106 = arith.constant 1 : i32
    %282 = arith.addi %281, %c1_i32_106 : i32
    %283 = arith.index_cast %282 : i32 to index
    %c0_107 = arith.constant 0 : index
    %284 = memref.load %arg1[%283, %c0_107] : memref<8x5xf32, #tpu.memory_space<smem>>
    %285 = arith.fptosi %284 : f32 to i32
    %c0_i32_108 = arith.constant 0 : i32
    %c1_i32_109 = arith.constant 1 : i32
    %286 = arith.maxsi %c0_i32_108, %285 : i32
    %287 = arith.minsi %c1_i32_109, %286 : i32
    %288 = arith.index_cast %282 : i32 to index
    %c1_110 = arith.constant 1 : index
    %289 = memref.load %arg1[%288, %c1_110] : memref<8x5xf32, #tpu.memory_space<smem>>
    %cst_111 = arith.constant -0.574780166 : f32
    %290 = arith.mulf %289, %cst_111 : f32
    %cst_112 = arith.constant 0.000000e+00 : f32
    %291 = arith.subf %290, %cst_112 : f32
    %292 = arith.index_cast %282 : i32 to index
    %c2_113 = arith.constant 2 : index
    %293 = memref.load %arg1[%292, %c2_113] : memref<8x5xf32, #tpu.memory_space<smem>>
    %cst_114 = arith.constant -0.574780166 : f32
    %294 = arith.mulf %293, %cst_114 : f32
    %cst_115 = arith.constant 0.000000e+00 : f32
    %295 = arith.subf %294, %cst_115 : f32
    %296 = arith.index_cast %282 : i32 to index
    %c3_116 = arith.constant 3 : index
    %297 = memref.load %arg1[%296, %c3_116] : memref<8x5xf32, #tpu.memory_space<smem>>
    %cst_117 = arith.constant 1.000000e+00 : f32
    %298 = arith.addf %297, %cst_117 : f32
    %cst_118 = arith.constant -0.574780166 : f32
    %299 = arith.mulf %298, %cst_118 : f32
    %cst_119 = arith.constant 0.000000e+00 : f32
    %300 = arith.subf %299, %cst_119 : f32
    %301 = arith.index_cast %282 : i32 to index
    %c4_120 = arith.constant 4 : index
    %302 = memref.load %arg1[%301, %c4_120] : memref<8x5xf32, #tpu.memory_space<smem>>
    %cst_121 = arith.constant 1.000000e+00 : f32
    %303 = arith.addf %302, %cst_121 : f32
    %cst_122 = arith.constant -0.574780166 : f32
    %304 = arith.mulf %303, %cst_122 : f32
    %cst_123 = arith.constant 0.000000e+00 : f32
    %305 = arith.subf %304, %cst_123 : f32
    %306 = arith.subf %300, %291 : f32
    %307 = arith.subf %305, %295 : f32
    %cst_124 = arith.constant 1.000000e+00 : f32
    %308 = arith.maximumf %306, %cst_124 : f32
    %cst_125 = arith.constant 1.000000e+00 : f32
    %309 = arith.maximumf %307, %cst_125 : f32
    %cst_126 = arith.constant 2.000000e+00 : f32
    %310 = arith.divf %309, %cst_126 : f32
    %cst_127 = arith.constant 2.000000e+00 : f32
    %311 = arith.divf %308, %cst_127 : f32
    %c256_i32_128 = arith.constant 256 : i32
    %312 = arith.muli %287, %c256_i32_128 : i32
    %cst_129 = arith.constant 0.000000e+00 : f32
    %313 = vector.broadcast %cst_129 : f32 to vector<1x4xf32>
    %cst_130 = arith.constant 0.000000e+00 : f32
    %314 = arith.mulf %cst_130, %310 : f32
    %315 = arith.addf %295, %314 : f32
    %cst_131 = arith.constant 5.000000e-01 : f32
    %316 = arith.mulf %cst_131, %310 : f32
    %cst_132 = arith.constant 1.000000e+00 : f32
    %317 = arith.divf %316, %cst_132 : f32
    %318 = arith.addf %315, %317 : f32
    %cst_133 = arith.constant 0.000000e+00 : f32
    %319 = arith.mulf %cst_133, %311 : f32
    %320 = arith.addf %291, %319 : f32
    %cst_134 = arith.constant 5.000000e-01 : f32
    %321 = arith.mulf %cst_134, %311 : f32
    %cst_135 = arith.constant 1.000000e+00 : f32
    %322 = arith.divf %321, %cst_135 : f32
    %323 = arith.addf %320, %322 : f32
    %cst_136 = arith.constant -1.000000e+00 : f32
    %324 = arith.cmpf oge, %318, %cst_136 : f32
    %cst_137 = arith.constant 1.600000e+01 : f32
    %325 = arith.cmpf ole, %318, %cst_137 : f32
    %326 = arith.andi %324, %325 : i1
    %cst_138 = arith.constant -1.000000e+00 : f32
    %327 = arith.cmpf oge, %323, %cst_138 : f32
    %328 = arith.andi %326, %327 : i1
    %cst_139 = arith.constant 1.600000e+01 : f32
    %329 = arith.cmpf ole, %323, %cst_139 : f32
    %330 = arith.andi %328, %329 : i1
    %cst_140 = arith.constant 0.000000e+00 : f32
    %cst_141 = arith.constant 1.500000e+01 : f32
    %331 = arith.maximumf %cst_140, %318 : f32
    %332 = arith.minimumf %cst_141, %331 : f32
    %cst_142 = arith.constant 0.000000e+00 : f32
    %cst_143 = arith.constant 1.500000e+01 : f32
    %333 = arith.maximumf %cst_142, %323 : f32
    %334 = arith.minimumf %cst_143, %333 : f32
    %335 = arith.fptosi %332 : f32 to i32
    %336 = arith.fptosi %334 : f32 to i32
    %337 = arith.sitofp %335 : i32 to f32
    %338 = arith.subf %332, %337 : f32
    %339 = arith.sitofp %336 : i32 to f32
    %340 = arith.subf %334, %339 : f32
    %cst_144 = arith.constant 1.000000e+00 : f32
    %341 = arith.subf %cst_144, %338 : f32
    %cst_145 = arith.constant 1.000000e+00 : f32
    %342 = arith.subf %cst_145, %340 : f32
    %c16_i32_146 = arith.constant 16 : i32
    %343 = arith.muli %335, %c16_i32_146 : i32
    %344 = arith.addi %312, %343 : i32
    %345 = arith.addi %344, %336 : i32
    %346 = arith.index_cast %345 : i32 to index
    %c0_147 = arith.constant 0 : index
    %347 = vector.load %arg2[%346, %c0_147] : memref<536x4xf32, #tpu.memory_space<vmem>>, vector<2x4xf32>
    %c16_i32_148 = arith.constant 16 : i32
    %348 = arith.addi %345, %c16_i32_148 : i32
    %349 = arith.index_cast %348 : i32 to index
    %c0_149 = arith.constant 0 : index
    %350 = vector.load %arg2[%349, %c0_149] : memref<536x4xf32, #tpu.memory_space<vmem>>, vector<2x4xf32>
    %351 = vector.extract_strided_slice %347 {offsets = [0, 0], sizes = [1, 4], strides = [1, 1]} : vector<2x4xf32> to vector<1x4xf32>
    %352 = vector.broadcast %342 : f32 to vector<1x4xf32>
    %353 = arith.mulf %352, %351 : vector<1x4xf32>
    %354 = vector.extract_strided_slice %347 {offsets = [1, 0], sizes = [1, 4], strides = [1, 1]} : vector<2x4xf32> to vector<1x4xf32>
    %355 = vector.broadcast %340 : f32 to vector<1x4xf32>
    %356 = arith.mulf %355, %354 : vector<1x4xf32>
    %357 = arith.addf %353, %356 : vector<1x4xf32>
    %358 = vector.broadcast %341 : f32 to vector<1x4xf32>
    %359 = arith.mulf %358, %357 : vector<1x4xf32>
    %360 = vector.extract_strided_slice %350 {offsets = [0, 0], sizes = [1, 4], strides = [1, 1]} : vector<2x4xf32> to vector<1x4xf32>
    %361 = vector.broadcast %342 : f32 to vector<1x4xf32>
    %362 = arith.mulf %361, %360 : vector<1x4xf32>
    %363 = vector.extract_strided_slice %350 {offsets = [1, 0], sizes = [1, 4], strides = [1, 1]} : vector<2x4xf32> to vector<1x4xf32>
    %364 = vector.broadcast %340 : f32 to vector<1x4xf32>
    %365 = arith.mulf %364, %363 : vector<1x4xf32>
    %366 = arith.addf %362, %365 : vector<1x4xf32>
    %367 = vector.broadcast %338 : f32 to vector<1x4xf32>
    %368 = arith.mulf %367, %366 : vector<1x4xf32>
    %369 = arith.addf %359, %368 : vector<1x4xf32>
    %cst_150 = arith.constant 0.000000e+00 : f32
    %370 = vector.broadcast %cst_150 : f32 to vector<1x4xf32>
    %371 = arith.select %330, %369, %370 : vector<1x4xf32>
    %372 = arith.addf %313, %371 : vector<1x4xf32>
    %cst_151 = arith.constant 1.000000e+00 : f32
    %373 = vector.broadcast %cst_151 : f32 to vector<1x4xf32>
    %374 = arith.mulf %372, %373 : vector<1x4xf32>
    %cst_152 = arith.constant 0.000000e+00 : f32
    %375 = vector.broadcast %cst_152 : f32 to vector<1x4xf32>
    %cst_153 = arith.constant 0.000000e+00 : f32
    %376 = arith.mulf %cst_153, %310 : f32
    %377 = arith.addf %295, %376 : f32
    %cst_154 = arith.constant 5.000000e-01 : f32
    %378 = arith.mulf %cst_154, %310 : f32
    %cst_155 = arith.constant 1.000000e+00 : f32
    %379 = arith.divf %378, %cst_155 : f32
    %380 = arith.addf %377, %379 : f32
    %cst_156 = arith.constant 1.000000e+00 : f32
    %381 = arith.mulf %cst_156, %311 : f32
    %382 = arith.addf %291, %381 : f32
    %cst_157 = arith.constant 5.000000e-01 : f32
    %383 = arith.mulf %cst_157, %311 : f32
    %cst_158 = arith.constant 1.000000e+00 : f32
    %384 = arith.divf %383, %cst_158 : f32
    %385 = arith.addf %382, %384 : f32
    %cst_159 = arith.constant -1.000000e+00 : f32
    %386 = arith.cmpf oge, %380, %cst_159 : f32
    %cst_160 = arith.constant 1.600000e+01 : f32
    %387 = arith.cmpf ole, %380, %cst_160 : f32
    %388 = arith.andi %386, %387 : i1
    %cst_161 = arith.constant -1.000000e+00 : f32
    %389 = arith.cmpf oge, %385, %cst_161 : f32
    %390 = arith.andi %388, %389 : i1
    %cst_162 = arith.constant 1.600000e+01 : f32
    %391 = arith.cmpf ole, %385, %cst_162 : f32
    %392 = arith.andi %390, %391 : i1
    %cst_163 = arith.constant 0.000000e+00 : f32
    %cst_164 = arith.constant 1.500000e+01 : f32
    %393 = arith.maximumf %cst_163, %380 : f32
    %394 = arith.minimumf %cst_164, %393 : f32
    %cst_165 = arith.constant 0.000000e+00 : f32
    %cst_166 = arith.constant 1.500000e+01 : f32
    %395 = arith.maximumf %cst_165, %385 : f32
    %396 = arith.minimumf %cst_166, %395 : f32
    %397 = arith.fptosi %394 : f32 to i32
    %398 = arith.fptosi %396 : f32 to i32
    %399 = arith.sitofp %397 : i32 to f32
    %400 = arith.subf %394, %399 : f32
    %401 = arith.sitofp %398 : i32 to f32
    %402 = arith.subf %396, %401 : f32
    %cst_167 = arith.constant 1.000000e+00 : f32
    %403 = arith.subf %cst_167, %400 : f32
    %cst_168 = arith.constant 1.000000e+00 : f32
    %404 = arith.subf %cst_168, %402 : f32
    %c16_i32_169 = arith.constant 16 : i32
    %405 = arith.muli %397, %c16_i32_169 : i32
    %406 = arith.addi %312, %405 : i32
    %407 = arith.addi %406, %398 : i32
    %408 = arith.index_cast %407 : i32 to index
    %c0_170 = arith.constant 0 : index
    %409 = vector.load %arg2[%408, %c0_170] : memref<536x4xf32, #tpu.memory_space<vmem>>, vector<2x4xf32>
    %c16_i32_171 = arith.constant 16 : i32
    %410 = arith.addi %407, %c16_i32_171 : i32
    %411 = arith.index_cast %410 : i32 to index
    %c0_172 = arith.constant 0 : index
    %412 = vector.load %arg2[%411, %c0_172] : memref<536x4xf32, #tpu.memory_space<vmem>>, vector<2x4xf32>
    %413 = vector.extract_strided_slice %409 {offsets = [0, 0], sizes = [1, 4], strides = [1, 1]} : vector<2x4xf32> to vector<1x4xf32>
    %414 = vector.broadcast %404 : f32 to vector<1x4xf32>
    %415 = arith.mulf %414, %413 : vector<1x4xf32>
    %416 = vector.extract_strided_slice %409 {offsets = [1, 0], sizes = [1, 4], strides = [1, 1]} : vector<2x4xf32> to vector<1x4xf32>
    %417 = vector.broadcast %402 : f32 to vector<1x4xf32>
    %418 = arith.mulf %417, %416 : vector<1x4xf32>
    %419 = arith.addf %415, %418 : vector<1x4xf32>
    %420 = vector.broadcast %403 : f32 to vector<1x4xf32>
    %421 = arith.mulf %420, %419 : vector<1x4xf32>
    %422 = vector.extract_strided_slice %412 {offsets = [0, 0], sizes = [1, 4], strides = [1, 1]} : vector<2x4xf32> to vector<1x4xf32>
    %423 = vector.broadcast %404 : f32 to vector<1x4xf32>
    %424 = arith.mulf %423, %422 : vector<1x4xf32>
    %425 = vector.extract_strided_slice %412 {offsets = [1, 0], sizes = [1, 4], strides = [1, 1]} : vector<2x4xf32> to vector<1x4xf32>
    %426 = vector.broadcast %402 : f32 to vector<1x4xf32>
    %427 = arith.mulf %426, %425 : vector<1x4xf32>
    %428 = arith.addf %424, %427 : vector<1x4xf32>
    %429 = vector.broadcast %400 : f32 to vector<1x4xf32>
    %430 = arith.mulf %429, %428 : vector<1x4xf32>
    %431 = arith.addf %421, %430 : vector<1x4xf32>
    %cst_173 = arith.constant 0.000000e+00 : f32
    %432 = vector.broadcast %cst_173 : f32 to vector<1x4xf32>
    %433 = arith.select %392, %431, %432 : vector<1x4xf32>
    %434 = arith.addf %375, %433 : vector<1x4xf32>
    %cst_174 = arith.constant 1.000000e+00 : f32
    %435 = vector.broadcast %cst_174 : f32 to vector<1x4xf32>
    %436 = arith.mulf %434, %435 : vector<1x4xf32>
    %cst_175 = arith.constant 0.000000e+00 : f32
    %437 = vector.broadcast %cst_175 : f32 to vector<1x4xf32>
    %cst_176 = arith.constant 1.000000e+00 : f32
    %438 = arith.mulf %cst_176, %310 : f32
    %439 = arith.addf %295, %438 : f32
    %cst_177 = arith.constant 5.000000e-01 : f32
    %440 = arith.mulf %cst_177, %310 : f32
    %cst_178 = arith.constant 1.000000e+00 : f32
    %441 = arith.divf %440, %cst_178 : f32
    %442 = arith.addf %439, %441 : f32
    %cst_179 = arith.constant 0.000000e+00 : f32
    %443 = arith.mulf %cst_179, %311 : f32
    %444 = arith.addf %291, %443 : f32
    %cst_180 = arith.constant 5.000000e-01 : f32
    %445 = arith.mulf %cst_180, %311 : f32
    %cst_181 = arith.constant 1.000000e+00 : f32
    %446 = arith.divf %445, %cst_181 : f32
    %447 = arith.addf %444, %446 : f32
    %cst_182 = arith.constant -1.000000e+00 : f32
    %448 = arith.cmpf oge, %442, %cst_182 : f32
    %cst_183 = arith.constant 1.600000e+01 : f32
    %449 = arith.cmpf ole, %442, %cst_183 : f32
    %450 = arith.andi %448, %449 : i1
    %cst_184 = arith.constant -1.000000e+00 : f32
    %451 = arith.cmpf oge, %447, %cst_184 : f32
    %452 = arith.andi %450, %451 : i1
    %cst_185 = arith.constant 1.600000e+01 : f32
    %453 = arith.cmpf ole, %447, %cst_185 : f32
    %454 = arith.andi %452, %453 : i1
    %cst_186 = arith.constant 0.000000e+00 : f32
    %cst_187 = arith.constant 1.500000e+01 : f32
    %455 = arith.maximumf %cst_186, %442 : f32
    %456 = arith.minimumf %cst_187, %455 : f32
    %cst_188 = arith.constant 0.000000e+00 : f32
    %cst_189 = arith.constant 1.500000e+01 : f32
    %457 = arith.maximumf %cst_188, %447 : f32
    %458 = arith.minimumf %cst_189, %457 : f32
    %459 = arith.fptosi %456 : f32 to i32
    %460 = arith.fptosi %458 : f32 to i32
    %461 = arith.sitofp %459 : i32 to f32
    %462 = arith.subf %456, %461 : f32
    %463 = arith.sitofp %460 : i32 to f32
    %464 = arith.subf %458, %463 : f32
    %cst_190 = arith.constant 1.000000e+00 : f32
    %465 = arith.subf %cst_190, %462 : f32
    %cst_191 = arith.constant 1.000000e+00 : f32
    %466 = arith.subf %cst_191, %464 : f32
    %c16_i32_192 = arith.constant 16 : i32
    %467 = arith.muli %459, %c16_i32_192 : i32
    %468 = arith.addi %312, %467 : i32
    %469 = arith.addi %468, %460 : i32
    %470 = arith.index_cast %469 : i32 to index
    %c0_193 = arith.constant 0 : index
    %471 = vector.load %arg2[%470, %c0_193] : memref<536x4xf32, #tpu.memory_space<vmem>>, vector<2x4xf32>
    %c16_i32_194 = arith.constant 16 : i32
    %472 = arith.addi %469, %c16_i32_194 : i32
    %473 = arith.index_cast %472 : i32 to index
    %c0_195 = arith.constant 0 : index
    %474 = vector.load %arg2[%473, %c0_195] : memref<536x4xf32, #tpu.memory_space<vmem>>, vector<2x4xf32>
    %475 = vector.extract_strided_slice %471 {offsets = [0, 0], sizes = [1, 4], strides = [1, 1]} : vector<2x4xf32> to vector<1x4xf32>
    %476 = vector.broadcast %466 : f32 to vector<1x4xf32>
    %477 = arith.mulf %476, %475 : vector<1x4xf32>
    %478 = vector.extract_strided_slice %471 {offsets = [1, 0], sizes = [1, 4], strides = [1, 1]} : vector<2x4xf32> to vector<1x4xf32>
    %479 = vector.broadcast %464 : f32 to vector<1x4xf32>
    %480 = arith.mulf %479, %478 : vector<1x4xf32>
    %481 = arith.addf %477, %480 : vector<1x4xf32>
    %482 = vector.broadcast %465 : f32 to vector<1x4xf32>
    %483 = arith.mulf %482, %481 : vector<1x4xf32>
    %484 = vector.extract_strided_slice %474 {offsets = [0, 0], sizes = [1, 4], strides = [1, 1]} : vector<2x4xf32> to vector<1x4xf32>
    %485 = vector.broadcast %466 : f32 to vector<1x4xf32>
    %486 = arith.mulf %485, %484 : vector<1x4xf32>
    %487 = vector.extract_strided_slice %474 {offsets = [1, 0], sizes = [1, 4], strides = [1, 1]} : vector<2x4xf32> to vector<1x4xf32>
    %488 = vector.broadcast %464 : f32 to vector<1x4xf32>
    %489 = arith.mulf %488, %487 : vector<1x4xf32>
    %490 = arith.addf %486, %489 : vector<1x4xf32>
    %491 = vector.broadcast %462 : f32 to vector<1x4xf32>
    %492 = arith.mulf %491, %490 : vector<1x4xf32>
    %493 = arith.addf %483, %492 : vector<1x4xf32>
    %cst_196 = arith.constant 0.000000e+00 : f32
    %494 = vector.broadcast %cst_196 : f32 to vector<1x4xf32>
    %495 = arith.select %454, %493, %494 : vector<1x4xf32>
    %496 = arith.addf %437, %495 : vector<1x4xf32>
    %cst_197 = arith.constant 1.000000e+00 : f32
    %497 = vector.broadcast %cst_197 : f32 to vector<1x4xf32>
    %498 = arith.mulf %496, %497 : vector<1x4xf32>
    %cst_198 = arith.constant 0.000000e+00 : f32
    %499 = vector.broadcast %cst_198 : f32 to vector<1x4xf32>
    %cst_199 = arith.constant 1.000000e+00 : f32
    %500 = arith.mulf %cst_199, %310 : f32
    %501 = arith.addf %295, %500 : f32
    %cst_200 = arith.constant 5.000000e-01 : f32
    %502 = arith.mulf %cst_200, %310 : f32
    %cst_201 = arith.constant 1.000000e+00 : f32
    %503 = arith.divf %502, %cst_201 : f32
    %504 = arith.addf %501, %503 : f32
    %cst_202 = arith.constant 1.000000e+00 : f32
    %505 = arith.mulf %cst_202, %311 : f32
    %506 = arith.addf %291, %505 : f32
    %cst_203 = arith.constant 5.000000e-01 : f32
    %507 = arith.mulf %cst_203, %311 : f32
    %cst_204 = arith.constant 1.000000e+00 : f32
    %508 = arith.divf %507, %cst_204 : f32
    %509 = arith.addf %506, %508 : f32
    %cst_205 = arith.constant -1.000000e+00 : f32
    %510 = arith.cmpf oge, %504, %cst_205 : f32
    %cst_206 = arith.constant 1.600000e+01 : f32
    %511 = arith.cmpf ole, %504, %cst_206 : f32
    %512 = arith.andi %510, %511 : i1
    %cst_207 = arith.constant -1.000000e+00 : f32
    %513 = arith.cmpf oge, %509, %cst_207 : f32
    %514 = arith.andi %512, %513 : i1
    %cst_208 = arith.constant 1.600000e+01 : f32
    %515 = arith.cmpf ole, %509, %cst_208 : f32
    %516 = arith.andi %514, %515 : i1
    %cst_209 = arith.constant 0.000000e+00 : f32
    %cst_210 = arith.constant 1.500000e+01 : f32
    %517 = arith.maximumf %cst_209, %504 : f32
    %518 = arith.minimumf %cst_210, %517 : f32
    %cst_211 = arith.constant 0.000000e+00 : f32
    %cst_212 = arith.constant 1.500000e+01 : f32
    %519 = arith.maximumf %cst_211, %509 : f32
    %520 = arith.minimumf %cst_212, %519 : f32
    %521 = arith.fptosi %518 : f32 to i32
    %522 = arith.fptosi %520 : f32 to i32
    %523 = arith.sitofp %521 : i32 to f32
    %524 = arith.subf %518, %523 : f32
    %525 = arith.sitofp %522 : i32 to f32
    %526 = arith.subf %520, %525 : f32
    %cst_213 = arith.constant 1.000000e+00 : f32
    %527 = arith.subf %cst_213, %524 : f32
    %cst_214 = arith.constant 1.000000e+00 : f32
    %528 = arith.subf %cst_214, %526 : f32
    %c16_i32_215 = arith.constant 16 : i32
    %529 = arith.muli %521, %c16_i32_215 : i32
    %530 = arith.addi %312, %529 : i32
    %531 = arith.addi %530, %522 : i32
    %532 = arith.index_cast %531 : i32 to index
    %c0_216 = arith.constant 0 : index
    %533 = vector.load %arg2[%532, %c0_216] : memref<536x4xf32, #tpu.memory_space<vmem>>, vector<2x4xf32>
    %c16_i32_217 = arith.constant 16 : i32
    %534 = arith.addi %531, %c16_i32_217 : i32
    %535 = arith.index_cast %534 : i32 to index
    %c0_218 = arith.constant 0 : index
    %536 = vector.load %arg2[%535, %c0_218] : memref<536x4xf32, #tpu.memory_space<vmem>>, vector<2x4xf32>
    %537 = vector.extract_strided_slice %533 {offsets = [0, 0], sizes = [1, 4], strides = [1, 1]} : vector<2x4xf32> to vector<1x4xf32>
    %538 = vector.broadcast %528 : f32 to vector<1x4xf32>
    %539 = arith.mulf %538, %537 : vector<1x4xf32>
    %540 = vector.extract_strided_slice %533 {offsets = [1, 0], sizes = [1, 4], strides = [1, 1]} : vector<2x4xf32> to vector<1x4xf32>
    %541 = vector.broadcast %526 : f32 to vector<1x4xf32>
    %542 = arith.mulf %541, %540 : vector<1x4xf32>
    %543 = arith.addf %539, %542 : vector<1x4xf32>
    %544 = vector.broadcast %527 : f32 to vector<1x4xf32>
    %545 = arith.mulf %544, %543 : vector<1x4xf32>
    %546 = vector.extract_strided_slice %536 {offsets = [0, 0], sizes = [1, 4], strides = [1, 1]} : vector<2x4xf32> to vector<1x4xf32>
    %547 = vector.broadcast %528 : f32 to vector<1x4xf32>
    %548 = arith.mulf %547, %546 : vector<1x4xf32>
    %549 = vector.extract_strided_slice %536 {offsets = [1, 0], sizes = [1, 4], strides = [1, 1]} : vector<2x4xf32> to vector<1x4xf32>
    %550 = vector.broadcast %526 : f32 to vector<1x4xf32>
    %551 = arith.mulf %550, %549 : vector<1x4xf32>
    %552 = arith.addf %548, %551 : vector<1x4xf32>
    %553 = vector.broadcast %524 : f32 to vector<1x4xf32>
    %554 = arith.mulf %553, %552 : vector<1x4xf32>
    %555 = arith.addf %545, %554 : vector<1x4xf32>
    %cst_219 = arith.constant 0.000000e+00 : f32
    %556 = vector.broadcast %cst_219 : f32 to vector<1x4xf32>
    %557 = arith.select %516, %555, %556 : vector<1x4xf32>
    %558 = arith.addf %499, %557 : vector<1x4xf32>
    %cst_220 = arith.constant 1.000000e+00 : f32
    %559 = vector.broadcast %cst_220 : f32 to vector<1x4xf32>
    %560 = arith.mulf %558, %559 : vector<1x4xf32>
    %561 = tpu.concatenate %374, %436, %498, %560 in 0 : vector<1x4xf32>, vector<1x4xf32>, vector<1x4xf32>, vector<1x4xf32> -> vector<4x4xf32>
    %c4_i32_221 = arith.constant 4 : i32
    %562 = arith.muli %arg0, %c4_i32_221 : i32
    %c2_i32 = arith.constant 2 : i32
    %563 = arith.addi %562, %c2_i32 : i32
    %564 = arith.index_cast %563 : i32 to index
    %c0_222 = arith.constant 0 : index
    %565 = memref.load %arg1[%564, %c0_222] : memref<8x5xf32, #tpu.memory_space<smem>>
    %566 = arith.fptosi %565 : f32 to i32
    %c0_i32_223 = arith.constant 0 : i32
    %c1_i32_224 = arith.constant 1 : i32
    %567 = arith.maxsi %c0_i32_223, %566 : i32
    %568 = arith.minsi %c1_i32_224, %567 : i32
    %569 = arith.index_cast %563 : i32 to index
    %c1_225 = arith.constant 1 : index
    %570 = memref.load %arg1[%569, %c1_225] : memref<8x5xf32, #tpu.memory_space<smem>>
    %cst_226 = arith.constant -0.574780166 : f32
    %571 = arith.mulf %570, %cst_226 : f32
    %cst_227 = arith.constant 0.000000e+00 : f32
    %572 = arith.subf %571, %cst_227 : f32
    %573 = arith.index_cast %563 : i32 to index
    %c2_228 = arith.constant 2 : index
    %574 = memref.load %arg1[%573, %c2_228] : memref<8x5xf32, #tpu.memory_space<smem>>
    %cst_229 = arith.constant -0.574780166 : f32
    %575 = arith.mulf %574, %cst_229 : f32
    %cst_230 = arith.constant 0.000000e+00 : f32
    %576 = arith.subf %575, %cst_230 : f32
    %577 = arith.index_cast %563 : i32 to index
    %c3_231 = arith.constant 3 : index
    %578 = memref.load %arg1[%577, %c3_231] : memref<8x5xf32, #tpu.memory_space<smem>>
    %cst_232 = arith.constant 1.000000e+00 : f32
    %579 = arith.addf %578, %cst_232 : f32
    %cst_233 = arith.constant -0.574780166 : f32
    %580 = arith.mulf %579, %cst_233 : f32
    %cst_234 = arith.constant 0.000000e+00 : f32
    %581 = arith.subf %580, %cst_234 : f32
    %582 = arith.index_cast %563 : i32 to index
    %c4_235 = arith.constant 4 : index
    %583 = memref.load %arg1[%582, %c4_235] : memref<8x5xf32, #tpu.memory_space<smem>>
    %cst_236 = arith.constant 1.000000e+00 : f32
    %584 = arith.addf %583, %cst_236 : f32
    %cst_237 = arith.constant -0.574780166 : f32
    %585 = arith.mulf %584, %cst_237 : f32
    %cst_238 = arith.constant 0.000000e+00 : f32
    %586 = arith.subf %585, %cst_238 : f32
    %587 = arith.subf %581, %572 : f32
    %588 = arith.subf %586, %576 : f32
    %cst_239 = arith.constant 1.000000e+00 : f32
    %589 = arith.maximumf %587, %cst_239 : f32
    %cst_240 = arith.constant 1.000000e+00 : f32
    %590 = arith.maximumf %588, %cst_240 : f32
    %cst_241 = arith.constant 2.000000e+00 : f32
    %591 = arith.divf %590, %cst_241 : f32
    %cst_242 = arith.constant 2.000000e+00 : f32
    %592 = arith.divf %589, %cst_242 : f32
    %c256_i32_243 = arith.constant 256 : i32
    %593 = arith.muli %568, %c256_i32_243 : i32
    %cst_244 = arith.constant 0.000000e+00 : f32
    %594 = vector.broadcast %cst_244 : f32 to vector<1x4xf32>
    %cst_245 = arith.constant 0.000000e+00 : f32
    %595 = arith.mulf %cst_245, %591 : f32
    %596 = arith.addf %576, %595 : f32
    %cst_246 = arith.constant 5.000000e-01 : f32
    %597 = arith.mulf %cst_246, %591 : f32
    %cst_247 = arith.constant 1.000000e+00 : f32
    %598 = arith.divf %597, %cst_247 : f32
    %599 = arith.addf %596, %598 : f32
    %cst_248 = arith.constant 0.000000e+00 : f32
    %600 = arith.mulf %cst_248, %592 : f32
    %601 = arith.addf %572, %600 : f32
    %cst_249 = arith.constant 5.000000e-01 : f32
    %602 = arith.mulf %cst_249, %592 : f32
    %cst_250 = arith.constant 1.000000e+00 : f32
    %603 = arith.divf %602, %cst_250 : f32
    %604 = arith.addf %601, %603 : f32
    %cst_251 = arith.constant -1.000000e+00 : f32
    %605 = arith.cmpf oge, %599, %cst_251 : f32
    %cst_252 = arith.constant 1.600000e+01 : f32
    %606 = arith.cmpf ole, %599, %cst_252 : f32
    %607 = arith.andi %605, %606 : i1
    %cst_253 = arith.constant -1.000000e+00 : f32
    %608 = arith.cmpf oge, %604, %cst_253 : f32
    %609 = arith.andi %607, %608 : i1
    %cst_254 = arith.constant 1.600000e+01 : f32
    %610 = arith.cmpf ole, %604, %cst_254 : f32
    %611 = arith.andi %609, %610 : i1
    %cst_255 = arith.constant 0.000000e+00 : f32
    %cst_256 = arith.constant 1.500000e+01 : f32
    %612 = arith.maximumf %cst_255, %599 : f32
    %613 = arith.minimumf %cst_256, %612 : f32
    %cst_257 = arith.constant 0.000000e+00 : f32
    %cst_258 = arith.constant 1.500000e+01 : f32
    %614 = arith.maximumf %cst_257, %604 : f32
    %615 = arith.minimumf %cst_258, %614 : f32
    %616 = arith.fptosi %613 : f32 to i32
    %617 = arith.fptosi %615 : f32 to i32
    %618 = arith.sitofp %616 : i32 to f32
    %619 = arith.subf %613, %618 : f32
    %620 = arith.sitofp %617 : i32 to f32
    %621 = arith.subf %615, %620 : f32
    %cst_259 = arith.constant 1.000000e+00 : f32
    %622 = arith.subf %cst_259, %619 : f32
    %cst_260 = arith.constant 1.000000e+00 : f32
    %623 = arith.subf %cst_260, %621 : f32
    %c16_i32_261 = arith.constant 16 : i32
    %624 = arith.muli %616, %c16_i32_261 : i32
    %625 = arith.addi %593, %624 : i32
    %626 = arith.addi %625, %617 : i32
    %627 = arith.index_cast %626 : i32 to index
    %c0_262 = arith.constant 0 : index
    %628 = vector.load %arg2[%627, %c0_262] : memref<536x4xf32, #tpu.memory_space<vmem>>, vector<2x4xf32>
    %c16_i32_263 = arith.constant 16 : i32
    %629 = arith.addi %626, %c16_i32_263 : i32
    %630 = arith.index_cast %629 : i32 to index
    %c0_264 = arith.constant 0 : index
    %631 = vector.load %arg2[%630, %c0_264] : memref<536x4xf32, #tpu.memory_space<vmem>>, vector<2x4xf32>
    %632 = vector.extract_strided_slice %628 {offsets = [0, 0], sizes = [1, 4], strides = [1, 1]} : vector<2x4xf32> to vector<1x4xf32>
    %633 = vector.broadcast %623 : f32 to vector<1x4xf32>
    %634 = arith.mulf %633, %632 : vector<1x4xf32>
    %635 = vector.extract_strided_slice %628 {offsets = [1, 0], sizes = [1, 4], strides = [1, 1]} : vector<2x4xf32> to vector<1x4xf32>
    %636 = vector.broadcast %621 : f32 to vector<1x4xf32>
    %637 = arith.mulf %636, %635 : vector<1x4xf32>
    %638 = arith.addf %634, %637 : vector<1x4xf32>
    %639 = vector.broadcast %622 : f32 to vector<1x4xf32>
    %640 = arith.mulf %639, %638 : vector<1x4xf32>
    %641 = vector.extract_strided_slice %631 {offsets = [0, 0], sizes = [1, 4], strides = [1, 1]} : vector<2x4xf32> to vector<1x4xf32>
    %642 = vector.broadcast %623 : f32 to vector<1x4xf32>
    %643 = arith.mulf %642, %641 : vector<1x4xf32>
    %644 = vector.extract_strided_slice %631 {offsets = [1, 0], sizes = [1, 4], strides = [1, 1]} : vector<2x4xf32> to vector<1x4xf32>
    %645 = vector.broadcast %621 : f32 to vector<1x4xf32>
    %646 = arith.mulf %645, %644 : vector<1x4xf32>
    %647 = arith.addf %643, %646 : vector<1x4xf32>
    %648 = vector.broadcast %619 : f32 to vector<1x4xf32>
    %649 = arith.mulf %648, %647 : vector<1x4xf32>
    %650 = arith.addf %640, %649 : vector<1x4xf32>
    %cst_265 = arith.constant 0.000000e+00 : f32
    %651 = vector.broadcast %cst_265 : f32 to vector<1x4xf32>
    %652 = arith.select %611, %650, %651 : vector<1x4xf32>
    %653 = arith.addf %594, %652 : vector<1x4xf32>
    %cst_266 = arith.constant 1.000000e+00 : f32
    %654 = vector.broadcast %cst_266 : f32 to vector<1x4xf32>
    %655 = arith.mulf %653, %654 : vector<1x4xf32>
    %cst_267 = arith.constant 0.000000e+00 : f32
    %656 = vector.broadcast %cst_267 : f32 to vector<1x4xf32>
    %cst_268 = arith.constant 0.000000e+00 : f32
    %657 = arith.mulf %cst_268, %591 : f32
    %658 = arith.addf %576, %657 : f32
    %cst_269 = arith.constant 5.000000e-01 : f32
    %659 = arith.mulf %cst_269, %591 : f32
    %cst_270 = arith.constant 1.000000e+00 : f32
    %660 = arith.divf %659, %cst_270 : f32
    %661 = arith.addf %658, %660 : f32
    %cst_271 = arith.constant 1.000000e+00 : f32
    %662 = arith.mulf %cst_271, %592 : f32
    %663 = arith.addf %572, %662 : f32
    %cst_272 = arith.constant 5.000000e-01 : f32
    %664 = arith.mulf %cst_272, %592 : f32
    %cst_273 = arith.constant 1.000000e+00 : f32
    %665 = arith.divf %664, %cst_273 : f32
    %666 = arith.addf %663, %665 : f32
    %cst_274 = arith.constant -1.000000e+00 : f32
    %667 = arith.cmpf oge, %661, %cst_274 : f32
    %cst_275 = arith.constant 1.600000e+01 : f32
    %668 = arith.cmpf ole, %661, %cst_275 : f32
    %669 = arith.andi %667, %668 : i1
    %cst_276 = arith.constant -1.000000e+00 : f32
    %670 = arith.cmpf oge, %666, %cst_276 : f32
    %671 = arith.andi %669, %670 : i1
    %cst_277 = arith.constant 1.600000e+01 : f32
    %672 = arith.cmpf ole, %666, %cst_277 : f32
    %673 = arith.andi %671, %672 : i1
    %cst_278 = arith.constant 0.000000e+00 : f32
    %cst_279 = arith.constant 1.500000e+01 : f32
    %674 = arith.maximumf %cst_278, %661 : f32
    %675 = arith.minimumf %cst_279, %674 : f32
    %cst_280 = arith.constant 0.000000e+00 : f32
    %cst_281 = arith.constant 1.500000e+01 : f32
    %676 = arith.maximumf %cst_280, %666 : f32
    %677 = arith.minimumf %cst_281, %676 : f32
    %678 = arith.fptosi %675 : f32 to i32
    %679 = arith.fptosi %677 : f32 to i32
    %680 = arith.sitofp %678 : i32 to f32
    %681 = arith.subf %675, %680 : f32
    %682 = arith.sitofp %679 : i32 to f32
    %683 = arith.subf %677, %682 : f32
    %cst_282 = arith.constant 1.000000e+00 : f32
    %684 = arith.subf %cst_282, %681 : f32
    %cst_283 = arith.constant 1.000000e+00 : f32
    %685 = arith.subf %cst_283, %683 : f32
    %c16_i32_284 = arith.constant 16 : i32
    %686 = arith.muli %678, %c16_i32_284 : i32
    %687 = arith.addi %593, %686 : i32
    %688 = arith.addi %687, %679 : i32
    %689 = arith.index_cast %688 : i32 to index
    %c0_285 = arith.constant 0 : index
    %690 = vector.load %arg2[%689, %c0_285] : memref<536x4xf32, #tpu.memory_space<vmem>>, vector<2x4xf32>
    %c16_i32_286 = arith.constant 16 : i32
    %691 = arith.addi %688, %c16_i32_286 : i32
    %692 = arith.index_cast %691 : i32 to index
    %c0_287 = arith.constant 0 : index
    %693 = vector.load %arg2[%692, %c0_287] : memref<536x4xf32, #tpu.memory_space<vmem>>, vector<2x4xf32>
    %694 = vector.extract_strided_slice %690 {offsets = [0, 0], sizes = [1, 4], strides = [1, 1]} : vector<2x4xf32> to vector<1x4xf32>
    %695 = vector.broadcast %685 : f32 to vector<1x4xf32>
    %696 = arith.mulf %695, %694 : vector<1x4xf32>
    %697 = vector.extract_strided_slice %690 {offsets = [1, 0], sizes = [1, 4], strides = [1, 1]} : vector<2x4xf32> to vector<1x4xf32>
    %698 = vector.broadcast %683 : f32 to vector<1x4xf32>
    %699 = arith.mulf %698, %697 : vector<1x4xf32>
    %700 = arith.addf %696, %699 : vector<1x4xf32>
    %701 = vector.broadcast %684 : f32 to vector<1x4xf32>
    %702 = arith.mulf %701, %700 : vector<1x4xf32>
    %703 = vector.extract_strided_slice %693 {offsets = [0, 0], sizes = [1, 4], strides = [1, 1]} : vector<2x4xf32> to vector<1x4xf32>
    %704 = vector.broadcast %685 : f32 to vector<1x4xf32>
    %705 = arith.mulf %704, %703 : vector<1x4xf32>
    %706 = vector.extract_strided_slice %693 {offsets = [1, 0], sizes = [1, 4], strides = [1, 1]} : vector<2x4xf32> to vector<1x4xf32>
    %707 = vector.broadcast %683 : f32 to vector<1x4xf32>
    %708 = arith.mulf %707, %706 : vector<1x4xf32>
    %709 = arith.addf %705, %708 : vector<1x4xf32>
    %710 = vector.broadcast %681 : f32 to vector<1x4xf32>
    %711 = arith.mulf %710, %709 : vector<1x4xf32>
    %712 = arith.addf %702, %711 : vector<1x4xf32>
    %cst_288 = arith.constant 0.000000e+00 : f32
    %713 = vector.broadcast %cst_288 : f32 to vector<1x4xf32>
    %714 = arith.select %673, %712, %713 : vector<1x4xf32>
    %715 = arith.addf %656, %714 : vector<1x4xf32>
    %cst_289 = arith.constant 1.000000e+00 : f32
    %716 = vector.broadcast %cst_289 : f32 to vector<1x4xf32>
    %717 = arith.mulf %715, %716 : vector<1x4xf32>
    %cst_290 = arith.constant 0.000000e+00 : f32
    %718 = vector.broadcast %cst_290 : f32 to vector<1x4xf32>
    %cst_291 = arith.constant 1.000000e+00 : f32
    %719 = arith.mulf %cst_291, %591 : f32
    %720 = arith.addf %576, %719 : f32
    %cst_292 = arith.constant 5.000000e-01 : f32
    %721 = arith.mulf %cst_292, %591 : f32
    %cst_293 = arith.constant 1.000000e+00 : f32
    %722 = arith.divf %721, %cst_293 : f32
    %723 = arith.addf %720, %722 : f32
    %cst_294 = arith.constant 0.000000e+00 : f32
    %724 = arith.mulf %cst_294, %592 : f32
    %725 = arith.addf %572, %724 : f32
    %cst_295 = arith.constant 5.000000e-01 : f32
    %726 = arith.mulf %cst_295, %592 : f32
    %cst_296 = arith.constant 1.000000e+00 : f32
    %727 = arith.divf %726, %cst_296 : f32
    %728 = arith.addf %725, %727 : f32
    %cst_297 = arith.constant -1.000000e+00 : f32
    %729 = arith.cmpf oge, %723, %cst_297 : f32
    %cst_298 = arith.constant 1.600000e+01 : f32
    %730 = arith.cmpf ole, %723, %cst_298 : f32
    %731 = arith.andi %729, %730 : i1
    %cst_299 = arith.constant -1.000000e+00 : f32
    %732 = arith.cmpf oge, %728, %cst_299 : f32
    %733 = arith.andi %731, %732 : i1
    %cst_300 = arith.constant 1.600000e+01 : f32
    %734 = arith.cmpf ole, %728, %cst_300 : f32
    %735 = arith.andi %733, %734 : i1
    %cst_301 = arith.constant 0.000000e+00 : f32
    %cst_302 = arith.constant 1.500000e+01 : f32
    %736 = arith.maximumf %cst_301, %723 : f32
    %737 = arith.minimumf %cst_302, %736 : f32
    %cst_303 = arith.constant 0.000000e+00 : f32
    %cst_304 = arith.constant 1.500000e+01 : f32
    %738 = arith.maximumf %cst_303, %728 : f32
    %739 = arith.minimumf %cst_304, %738 : f32
    %740 = arith.fptosi %737 : f32 to i32
    %741 = arith.fptosi %739 : f32 to i32
    %742 = arith.sitofp %740 : i32 to f32
    %743 = arith.subf %737, %742 : f32
    %744 = arith.sitofp %741 : i32 to f32
    %745 = arith.subf %739, %744 : f32
    %cst_305 = arith.constant 1.000000e+00 : f32
    %746 = arith.subf %cst_305, %743 : f32
    %cst_306 = arith.constant 1.000000e+00 : f32
    %747 = arith.subf %cst_306, %745 : f32
    %c16_i32_307 = arith.constant 16 : i32
    %748 = arith.muli %740, %c16_i32_307 : i32
    %749 = arith.addi %593, %748 : i32
    %750 = arith.addi %749, %741 : i32
    %751 = arith.index_cast %750 : i32 to index
    %c0_308 = arith.constant 0 : index
    %752 = vector.load %arg2[%751, %c0_308] : memref<536x4xf32, #tpu.memory_space<vmem>>, vector<2x4xf32>
    %c16_i32_309 = arith.constant 16 : i32
    %753 = arith.addi %750, %c16_i32_309 : i32
    %754 = arith.index_cast %753 : i32 to index
    %c0_310 = arith.constant 0 : index
    %755 = vector.load %arg2[%754, %c0_310] : memref<536x4xf32, #tpu.memory_space<vmem>>, vector<2x4xf32>
    %756 = vector.extract_strided_slice %752 {offsets = [0, 0], sizes = [1, 4], strides = [1, 1]} : vector<2x4xf32> to vector<1x4xf32>
    %757 = vector.broadcast %747 : f32 to vector<1x4xf32>
    %758 = arith.mulf %757, %756 : vector<1x4xf32>
    %759 = vector.extract_strided_slice %752 {offsets = [1, 0], sizes = [1, 4], strides = [1, 1]} : vector<2x4xf32> to vector<1x4xf32>
    %760 = vector.broadcast %745 : f32 to vector<1x4xf32>
    %761 = arith.mulf %760, %759 : vector<1x4xf32>
    %762 = arith.addf %758, %761 : vector<1x4xf32>
    %763 = vector.broadcast %746 : f32 to vector<1x4xf32>
    %764 = arith.mulf %763, %762 : vector<1x4xf32>
    %765 = vector.extract_strided_slice %755 {offsets = [0, 0], sizes = [1, 4], strides = [1, 1]} : vector<2x4xf32> to vector<1x4xf32>
    %766 = vector.broadcast %747 : f32 to vector<1x4xf32>
    %767 = arith.mulf %766, %765 : vector<1x4xf32>
    %768 = vector.extract_strided_slice %755 {offsets = [1, 0], sizes = [1, 4], strides = [1, 1]} : vector<2x4xf32> to vector<1x4xf32>
    %769 = vector.broadcast %745 : f32 to vector<1x4xf32>
    %770 = arith.mulf %769, %768 : vector<1x4xf32>
    %771 = arith.addf %767, %770 : vector<1x4xf32>
    %772 = vector.broadcast %743 : f32 to vector<1x4xf32>
    %773 = arith.mulf %772, %771 : vector<1x4xf32>
    %774 = arith.addf %764, %773 : vector<1x4xf32>
    %cst_311 = arith.constant 0.000000e+00 : f32
    %775 = vector.broadcast %cst_311 : f32 to vector<1x4xf32>
    %776 = arith.select %735, %774, %775 : vector<1x4xf32>
    %777 = arith.addf %718, %776 : vector<1x4xf32>
    %cst_312 = arith.constant 1.000000e+00 : f32
    %778 = vector.broadcast %cst_312 : f32 to vector<1x4xf32>
    %779 = arith.mulf %777, %778 : vector<1x4xf32>
    %cst_313 = arith.constant 0.000000e+00 : f32
    %780 = vector.broadcast %cst_313 : f32 to vector<1x4xf32>
    %cst_314 = arith.constant 1.000000e+00 : f32
    %781 = arith.mulf %cst_314, %591 : f32
    %782 = arith.addf %576, %781 : f32
    %cst_315 = arith.constant 5.000000e-01 : f32
    %783 = arith.mulf %cst_315, %591 : f32
    %cst_316 = arith.constant 1.000000e+00 : f32
    %784 = arith.divf %783, %cst_316 : f32
    %785 = arith.addf %782, %784 : f32
    %cst_317 = arith.constant 1.000000e+00 : f32
    %786 = arith.mulf %cst_317, %592 : f32
    %787 = arith.addf %572, %786 : f32
    %cst_318 = arith.constant 5.000000e-01 : f32
    %788 = arith.mulf %cst_318, %592 : f32
    %cst_319 = arith.constant 1.000000e+00 : f32
    %789 = arith.divf %788, %cst_319 : f32
    %790 = arith.addf %787, %789 : f32
    %cst_320 = arith.constant -1.000000e+00 : f32
    %791 = arith.cmpf oge, %785, %cst_320 : f32
    %cst_321 = arith.constant 1.600000e+01 : f32
    %792 = arith.cmpf ole, %785, %cst_321 : f32
    %793 = arith.andi %791, %792 : i1
    %cst_322 = arith.constant -1.000000e+00 : f32
    %794 = arith.cmpf oge, %790, %cst_322 : f32
    %795 = arith.andi %793, %794 : i1
    %cst_323 = arith.constant 1.600000e+01 : f32
    %796 = arith.cmpf ole, %790, %cst_323 : f32
    %797 = arith.andi %795, %796 : i1
    %cst_324 = arith.constant 0.000000e+00 : f32
    %cst_325 = arith.constant 1.500000e+01 : f32
    %798 = arith.maximumf %cst_324, %785 : f32
    %799 = arith.minimumf %cst_325, %798 : f32
    %cst_326 = arith.constant 0.000000e+00 : f32
    %cst_327 = arith.constant 1.500000e+01 : f32
    %800 = arith.maximumf %cst_326, %790 : f32
    %801 = arith.minimumf %cst_327, %800 : f32
    %802 = arith.fptosi %799 : f32 to i32
    %803 = arith.fptosi %801 : f32 to i32
    %804 = arith.sitofp %802 : i32 to f32
    %805 = arith.subf %799, %804 : f32
    %806 = arith.sitofp %803 : i32 to f32
    %807 = arith.subf %801, %806 : f32
    %cst_328 = arith.constant 1.000000e+00 : f32
    %808 = arith.subf %cst_328, %805 : f32
    %cst_329 = arith.constant 1.000000e+00 : f32
    %809 = arith.subf %cst_329, %807 : f32
    %c16_i32_330 = arith.constant 16 : i32
    %810 = arith.muli %802, %c16_i32_330 : i32
    %811 = arith.addi %593, %810 : i32
    %812 = arith.addi %811, %803 : i32
    %813 = arith.index_cast %812 : i32 to index
    %c0_331 = arith.constant 0 : index
    %814 = vector.load %arg2[%813, %c0_331] : memref<536x4xf32, #tpu.memory_space<vmem>>, vector<2x4xf32>
    %c16_i32_332 = arith.constant 16 : i32
    %815 = arith.addi %812, %c16_i32_332 : i32
    %816 = arith.index_cast %815 : i32 to index
    %c0_333 = arith.constant 0 : index
    %817 = vector.load %arg2[%816, %c0_333] : memref<536x4xf32, #tpu.memory_space<vmem>>, vector<2x4xf32>
    %818 = vector.extract_strided_slice %814 {offsets = [0, 0], sizes = [1, 4], strides = [1, 1]} : vector<2x4xf32> to vector<1x4xf32>
    %819 = vector.broadcast %809 : f32 to vector<1x4xf32>
    %820 = arith.mulf %819, %818 : vector<1x4xf32>
    %821 = vector.extract_strided_slice %814 {offsets = [1, 0], sizes = [1, 4], strides = [1, 1]} : vector<2x4xf32> to vector<1x4xf32>
    %822 = vector.broadcast %807 : f32 to vector<1x4xf32>
    %823 = arith.mulf %822, %821 : vector<1x4xf32>
    %824 = arith.addf %820, %823 : vector<1x4xf32>
    %825 = vector.broadcast %808 : f32 to vector<1x4xf32>
    %826 = arith.mulf %825, %824 : vector<1x4xf32>
    %827 = vector.extract_strided_slice %817 {offsets = [0, 0], sizes = [1, 4], strides = [1, 1]} : vector<2x4xf32> to vector<1x4xf32>
    %828 = vector.broadcast %809 : f32 to vector<1x4xf32>
    %829 = arith.mulf %828, %827 : vector<1x4xf32>
    %830 = vector.extract_strided_slice %817 {offsets = [1, 0], sizes = [1, 4], strides = [1, 1]} : vector<2x4xf32> to vector<1x4xf32>
    %831 = vector.broadcast %807 : f32 to vector<1x4xf32>
    %832 = arith.mulf %831, %830 : vector<1x4xf32>
    %833 = arith.addf %829, %832 : vector<1x4xf32>
    %834 = vector.broadcast %805 : f32 to vector<1x4xf32>
    %835 = arith.mulf %834, %833 : vector<1x4xf32>
    %836 = arith.addf %826, %835 : vector<1x4xf32>
    %cst_334 = arith.constant 0.000000e+00 : f32
    %837 = vector.broadcast %cst_334 : f32 to vector<1x4xf32>
    %838 = arith.select %797, %836, %837 : vector<1x4xf32>
    %839 = arith.addf %780, %838 : vector<1x4xf32>
    %cst_335 = arith.constant 1.000000e+00 : f32
    %840 = vector.broadcast %cst_335 : f32 to vector<1x4xf32>
    %841 = arith.mulf %839, %840 : vector<1x4xf32>
    %842 = tpu.concatenate %655, %717, %779, %841 in 0 : vector<1x4xf32>, vector<1x4xf32>, vector<1x4xf32>, vector<1x4xf32> -> vector<4x4xf32>
    %c4_i32_336 = arith.constant 4 : i32
    %843 = arith.muli %arg0, %c4_i32_336 : i32
    %c3_i32 = arith.constant 3 : i32
    %844 = arith.addi %843, %c3_i32 : i32
    %845 = arith.index_cast %844 : i32 to index
    %c0_337 = arith.constant 0 : index
    %846 = memref.load %arg1[%845, %c0_337] : memref<8x5xf32, #tpu.memory_space<smem>>
    %847 = arith.fptosi %846 : f32 to i32
    %c0_i32_338 = arith.constant 0 : i32
    %c1_i32_339 = arith.constant 1 : i32
    %848 = arith.maxsi %c0_i32_338, %847 : i32
    %849 = arith.minsi %c1_i32_339, %848 : i32
    %850 = arith.index_cast %844 : i32 to index
    %c1_340 = arith.constant 1 : index
    %851 = memref.load %arg1[%850, %c1_340] : memref<8x5xf32, #tpu.memory_space<smem>>
    %cst_341 = arith.constant -0.574780166 : f32
    %852 = arith.mulf %851, %cst_341 : f32
    %cst_342 = arith.constant 0.000000e+00 : f32
    %853 = arith.subf %852, %cst_342 : f32
    %854 = arith.index_cast %844 : i32 to index
    %c2_343 = arith.constant 2 : index
    %855 = memref.load %arg1[%854, %c2_343] : memref<8x5xf32, #tpu.memory_space<smem>>
    %cst_344 = arith.constant -0.574780166 : f32
    %856 = arith.mulf %855, %cst_344 : f32
    %cst_345 = arith.constant 0.000000e+00 : f32
    %857 = arith.subf %856, %cst_345 : f32
    %858 = arith.index_cast %844 : i32 to index
    %c3_346 = arith.constant 3 : index
    %859 = memref.load %arg1[%858, %c3_346] : memref<8x5xf32, #tpu.memory_space<smem>>
    %cst_347 = arith.constant 1.000000e+00 : f32
    %860 = arith.addf %859, %cst_347 : f32
    %cst_348 = arith.constant -0.574780166 : f32
    %861 = arith.mulf %860, %cst_348 : f32
    %cst_349 = arith.constant 0.000000e+00 : f32
    %862 = arith.subf %861, %cst_349 : f32
    %863 = arith.index_cast %844 : i32 to index
    %c4_350 = arith.constant 4 : index
    %864 = memref.load %arg1[%863, %c4_350] : memref<8x5xf32, #tpu.memory_space<smem>>
    %cst_351 = arith.constant 1.000000e+00 : f32
    %865 = arith.addf %864, %cst_351 : f32
    %cst_352 = arith.constant -0.574780166 : f32
    %866 = arith.mulf %865, %cst_352 : f32
    %cst_353 = arith.constant 0.000000e+00 : f32
    %867 = arith.subf %866, %cst_353 : f32
    %868 = arith.subf %862, %853 : f32
    %869 = arith.subf %867, %857 : f32
    %cst_354 = arith.constant 1.000000e+00 : f32
    %870 = arith.maximumf %868, %cst_354 : f32
    %cst_355 = arith.constant 1.000000e+00 : f32
    %871 = arith.maximumf %869, %cst_355 : f32
    %cst_356 = arith.constant 2.000000e+00 : f32
    %872 = arith.divf %871, %cst_356 : f32
    %cst_357 = arith.constant 2.000000e+00 : f32
    %873 = arith.divf %870, %cst_357 : f32
    %c256_i32_358 = arith.constant 256 : i32
    %874 = arith.muli %849, %c256_i32_358 : i32
    %cst_359 = arith.constant 0.000000e+00 : f32
    %875 = vector.broadcast %cst_359 : f32 to vector<1x4xf32>
    %cst_360 = arith.constant 0.000000e+00 : f32
    %876 = arith.mulf %cst_360, %872 : f32
    %877 = arith.addf %857, %876 : f32
    %cst_361 = arith.constant 5.000000e-01 : f32
    %878 = arith.mulf %cst_361, %872 : f32
    %cst_362 = arith.constant 1.000000e+00 : f32
    %879 = arith.divf %878, %cst_362 : f32
    %880 = arith.addf %877, %879 : f32
    %cst_363 = arith.constant 0.000000e+00 : f32
    %881 = arith.mulf %cst_363, %873 : f32
    %882 = arith.addf %853, %881 : f32
    %cst_364 = arith.constant 5.000000e-01 : f32
    %883 = arith.mulf %cst_364, %873 : f32
    %cst_365 = arith.constant 1.000000e+00 : f32
    %884 = arith.divf %883, %cst_365 : f32
    %885 = arith.addf %882, %884 : f32
    %cst_366 = arith.constant -1.000000e+00 : f32
    %886 = arith.cmpf oge, %880, %cst_366 : f32
    %cst_367 = arith.constant 1.600000e+01 : f32
    %887 = arith.cmpf ole, %880, %cst_367 : f32
    %888 = arith.andi %886, %887 : i1
    %cst_368 = arith.constant -1.000000e+00 : f32
    %889 = arith.cmpf oge, %885, %cst_368 : f32
    %890 = arith.andi %888, %889 : i1
    %cst_369 = arith.constant 1.600000e+01 : f32
    %891 = arith.cmpf ole, %885, %cst_369 : f32
    %892 = arith.andi %890, %891 : i1
    %cst_370 = arith.constant 0.000000e+00 : f32
    %cst_371 = arith.constant 1.500000e+01 : f32
    %893 = arith.maximumf %cst_370, %880 : f32
    %894 = arith.minimumf %cst_371, %893 : f32
    %cst_372 = arith.constant 0.000000e+00 : f32
    %cst_373 = arith.constant 1.500000e+01 : f32
    %895 = arith.maximumf %cst_372, %885 : f32
    %896 = arith.minimumf %cst_373, %895 : f32
    %897 = arith.fptosi %894 : f32 to i32
    %898 = arith.fptosi %896 : f32 to i32
    %899 = arith.sitofp %897 : i32 to f32
    %900 = arith.subf %894, %899 : f32
    %901 = arith.sitofp %898 : i32 to f32
    %902 = arith.subf %896, %901 : f32
    %cst_374 = arith.constant 1.000000e+00 : f32
    %903 = arith.subf %cst_374, %900 : f32
    %cst_375 = arith.constant 1.000000e+00 : f32
    %904 = arith.subf %cst_375, %902 : f32
    %c16_i32_376 = arith.constant 16 : i32
    %905 = arith.muli %897, %c16_i32_376 : i32
    %906 = arith.addi %874, %905 : i32
    %907 = arith.addi %906, %898 : i32
    %908 = arith.index_cast %907 : i32 to index
    %c0_377 = arith.constant 0 : index
    %909 = vector.load %arg2[%908, %c0_377] : memref<536x4xf32, #tpu.memory_space<vmem>>, vector<2x4xf32>
    %c16_i32_378 = arith.constant 16 : i32
    %910 = arith.addi %907, %c16_i32_378 : i32
    %911 = arith.index_cast %910 : i32 to index
    %c0_379 = arith.constant 0 : index
    %912 = vector.load %arg2[%911, %c0_379] : memref<536x4xf32, #tpu.memory_space<vmem>>, vector<2x4xf32>
    %913 = vector.extract_strided_slice %909 {offsets = [0, 0], sizes = [1, 4], strides = [1, 1]} : vector<2x4xf32> to vector<1x4xf32>
    %914 = vector.broadcast %904 : f32 to vector<1x4xf32>
    %915 = arith.mulf %914, %913 : vector<1x4xf32>
    %916 = vector.extract_strided_slice %909 {offsets = [1, 0], sizes = [1, 4], strides = [1, 1]} : vector<2x4xf32> to vector<1x4xf32>
    %917 = vector.broadcast %902 : f32 to vector<1x4xf32>
    %918 = arith.mulf %917, %916 : vector<1x4xf32>
    %919 = arith.addf %915, %918 : vector<1x4xf32>
    %920 = vector.broadcast %903 : f32 to vector<1x4xf32>
    %921 = arith.mulf %920, %919 : vector<1x4xf32>
    %922 = vector.extract_strided_slice %912 {offsets = [0, 0], sizes = [1, 4], strides = [1, 1]} : vector<2x4xf32> to vector<1x4xf32>
    %923 = vector.broadcast %904 : f32 to vector<1x4xf32>
    %924 = arith.mulf %923, %922 : vector<1x4xf32>
    %925 = vector.extract_strided_slice %912 {offsets = [1, 0], sizes = [1, 4], strides = [1, 1]} : vector<2x4xf32> to vector<1x4xf32>
    %926 = vector.broadcast %902 : f32 to vector<1x4xf32>
    %927 = arith.mulf %926, %925 : vector<1x4xf32>
    %928 = arith.addf %924, %927 : vector<1x4xf32>
    %929 = vector.broadcast %900 : f32 to vector<1x4xf32>
    %930 = arith.mulf %929, %928 : vector<1x4xf32>
    %931 = arith.addf %921, %930 : vector<1x4xf32>
    %cst_380 = arith.constant 0.000000e+00 : f32
    %932 = vector.broadcast %cst_380 : f32 to vector<1x4xf32>
    %933 = arith.select %892, %931, %932 : vector<1x4xf32>
    %934 = arith.addf %875, %933 : vector<1x4xf32>
    %cst_381 = arith.constant 1.000000e+00 : f32
    %935 = vector.broadcast %cst_381 : f32 to vector<1x4xf32>
    %936 = arith.mulf %934, %935 : vector<1x4xf32>
    %cst_382 = arith.constant 0.000000e+00 : f32
    %937 = vector.broadcast %cst_382 : f32 to vector<1x4xf32>
    %cst_383 = arith.constant 0.000000e+00 : f32
    %938 = arith.mulf %cst_383, %872 : f32
    %939 = arith.addf %857, %938 : f32
    %cst_384 = arith.constant 5.000000e-01 : f32
    %940 = arith.mulf %cst_384, %872 : f32
    %cst_385 = arith.constant 1.000000e+00 : f32
    %941 = arith.divf %940, %cst_385 : f32
    %942 = arith.addf %939, %941 : f32
    %cst_386 = arith.constant 1.000000e+00 : f32
    %943 = arith.mulf %cst_386, %873 : f32
    %944 = arith.addf %853, %943 : f32
    %cst_387 = arith.constant 5.000000e-01 : f32
    %945 = arith.mulf %cst_387, %873 : f32
    %cst_388 = arith.constant 1.000000e+00 : f32
    %946 = arith.divf %945, %cst_388 : f32
    %947 = arith.addf %944, %946 : f32
    %cst_389 = arith.constant -1.000000e+00 : f32
    %948 = arith.cmpf oge, %942, %cst_389 : f32
    %cst_390 = arith.constant 1.600000e+01 : f32
    %949 = arith.cmpf ole, %942, %cst_390 : f32
    %950 = arith.andi %948, %949 : i1
    %cst_391 = arith.constant -1.000000e+00 : f32
    %951 = arith.cmpf oge, %947, %cst_391 : f32
    %952 = arith.andi %950, %951 : i1
    %cst_392 = arith.constant 1.600000e+01 : f32
    %953 = arith.cmpf ole, %947, %cst_392 : f32
    %954 = arith.andi %952, %953 : i1
    %cst_393 = arith.constant 0.000000e+00 : f32
    %cst_394 = arith.constant 1.500000e+01 : f32
    %955 = arith.maximumf %cst_393, %942 : f32
    %956 = arith.minimumf %cst_394, %955 : f32
    %cst_395 = arith.constant 0.000000e+00 : f32
    %cst_396 = arith.constant 1.500000e+01 : f32
    %957 = arith.maximumf %cst_395, %947 : f32
    %958 = arith.minimumf %cst_396, %957 : f32
    %959 = arith.fptosi %956 : f32 to i32
    %960 = arith.fptosi %958 : f32 to i32
    %961 = arith.sitofp %959 : i32 to f32
    %962 = arith.subf %956, %961 : f32
    %963 = arith.sitofp %960 : i32 to f32
    %964 = arith.subf %958, %963 : f32
    %cst_397 = arith.constant 1.000000e+00 : f32
    %965 = arith.subf %cst_397, %962 : f32
    %cst_398 = arith.constant 1.000000e+00 : f32
    %966 = arith.subf %cst_398, %964 : f32
    %c16_i32_399 = arith.constant 16 : i32
    %967 = arith.muli %959, %c16_i32_399 : i32
    %968 = arith.addi %874, %967 : i32
    %969 = arith.addi %968, %960 : i32
    %970 = arith.index_cast %969 : i32 to index
    %c0_400 = arith.constant 0 : index
    %971 = vector.load %arg2[%970, %c0_400] : memref<536x4xf32, #tpu.memory_space<vmem>>, vector<2x4xf32>
    %c16_i32_401 = arith.constant 16 : i32
    %972 = arith.addi %969, %c16_i32_401 : i32
    %973 = arith.index_cast %972 : i32 to index
    %c0_402 = arith.constant 0 : index
    %974 = vector.load %arg2[%973, %c0_402] : memref<536x4xf32, #tpu.memory_space<vmem>>, vector<2x4xf32>
    %975 = vector.extract_strided_slice %971 {offsets = [0, 0], sizes = [1, 4], strides = [1, 1]} : vector<2x4xf32> to vector<1x4xf32>
    %976 = vector.broadcast %966 : f32 to vector<1x4xf32>
    %977 = arith.mulf %976, %975 : vector<1x4xf32>
    %978 = vector.extract_strided_slice %971 {offsets = [1, 0], sizes = [1, 4], strides = [1, 1]} : vector<2x4xf32> to vector<1x4xf32>
    %979 = vector.broadcast %964 : f32 to vector<1x4xf32>
    %980 = arith.mulf %979, %978 : vector<1x4xf32>
    %981 = arith.addf %977, %980 : vector<1x4xf32>
    %982 = vector.broadcast %965 : f32 to vector<1x4xf32>
    %983 = arith.mulf %982, %981 : vector<1x4xf32>
    %984 = vector.extract_strided_slice %974 {offsets = [0, 0], sizes = [1, 4], strides = [1, 1]} : vector<2x4xf32> to vector<1x4xf32>
    %985 = vector.broadcast %966 : f32 to vector<1x4xf32>
    %986 = arith.mulf %985, %984 : vector<1x4xf32>
    %987 = vector.extract_strided_slice %974 {offsets = [1, 0], sizes = [1, 4], strides = [1, 1]} : vector<2x4xf32> to vector<1x4xf32>
    %988 = vector.broadcast %964 : f32 to vector<1x4xf32>
    %989 = arith.mulf %988, %987 : vector<1x4xf32>
    %990 = arith.addf %986, %989 : vector<1x4xf32>
    %991 = vector.broadcast %962 : f32 to vector<1x4xf32>
    %992 = arith.mulf %991, %990 : vector<1x4xf32>
    %993 = arith.addf %983, %992 : vector<1x4xf32>
    %cst_403 = arith.constant 0.000000e+00 : f32
    %994 = vector.broadcast %cst_403 : f32 to vector<1x4xf32>
    %995 = arith.select %954, %993, %994 : vector<1x4xf32>
    %996 = arith.addf %937, %995 : vector<1x4xf32>
    %cst_404 = arith.constant 1.000000e+00 : f32
    %997 = vector.broadcast %cst_404 : f32 to vector<1x4xf32>
    %998 = arith.mulf %996, %997 : vector<1x4xf32>
    %cst_405 = arith.constant 0.000000e+00 : f32
    %999 = vector.broadcast %cst_405 : f32 to vector<1x4xf32>
    %cst_406 = arith.constant 1.000000e+00 : f32
    %1000 = arith.mulf %cst_406, %872 : f32
    %1001 = arith.addf %857, %1000 : f32
    %cst_407 = arith.constant 5.000000e-01 : f32
    %1002 = arith.mulf %cst_407, %872 : f32
    %cst_408 = arith.constant 1.000000e+00 : f32
    %1003 = arith.divf %1002, %cst_408 : f32
    %1004 = arith.addf %1001, %1003 : f32
    %cst_409 = arith.constant 0.000000e+00 : f32
    %1005 = arith.mulf %cst_409, %873 : f32
    %1006 = arith.addf %853, %1005 : f32
    %cst_410 = arith.constant 5.000000e-01 : f32
    %1007 = arith.mulf %cst_410, %873 : f32
    %cst_411 = arith.constant 1.000000e+00 : f32
    %1008 = arith.divf %1007, %cst_411 : f32
    %1009 = arith.addf %1006, %1008 : f32
    %cst_412 = arith.constant -1.000000e+00 : f32
    %1010 = arith.cmpf oge, %1004, %cst_412 : f32
    %cst_413 = arith.constant 1.600000e+01 : f32
    %1011 = arith.cmpf ole, %1004, %cst_413 : f32
    %1012 = arith.andi %1010, %1011 : i1
    %cst_414 = arith.constant -1.000000e+00 : f32
    %1013 = arith.cmpf oge, %1009, %cst_414 : f32
    %1014 = arith.andi %1012, %1013 : i1
    %cst_415 = arith.constant 1.600000e+01 : f32
    %1015 = arith.cmpf ole, %1009, %cst_415 : f32
    %1016 = arith.andi %1014, %1015 : i1
    %cst_416 = arith.constant 0.000000e+00 : f32
    %cst_417 = arith.constant 1.500000e+01 : f32
    %1017 = arith.maximumf %cst_416, %1004 : f32
    %1018 = arith.minimumf %cst_417, %1017 : f32
    %cst_418 = arith.constant 0.000000e+00 : f32
    %cst_419 = arith.constant 1.500000e+01 : f32
    %1019 = arith.maximumf %cst_418, %1009 : f32
    %1020 = arith.minimumf %cst_419, %1019 : f32
    %1021 = arith.fptosi %1018 : f32 to i32
    %1022 = arith.fptosi %1020 : f32 to i32
    %1023 = arith.sitofp %1021 : i32 to f32
    %1024 = arith.subf %1018, %1023 : f32
    %1025 = arith.sitofp %1022 : i32 to f32
    %1026 = arith.subf %1020, %1025 : f32
    %cst_420 = arith.constant 1.000000e+00 : f32
    %1027 = arith.subf %cst_420, %1024 : f32
    %cst_421 = arith.constant 1.000000e+00 : f32
    %1028 = arith.subf %cst_421, %1026 : f32
    %c16_i32_422 = arith.constant 16 : i32
    %1029 = arith.muli %1021, %c16_i32_422 : i32
    %1030 = arith.addi %874, %1029 : i32
    %1031 = arith.addi %1030, %1022 : i32
    %1032 = arith.index_cast %1031 : i32 to index
    %c0_423 = arith.constant 0 : index
    %1033 = vector.load %arg2[%1032, %c0_423] : memref<536x4xf32, #tpu.memory_space<vmem>>, vector<2x4xf32>
    %c16_i32_424 = arith.constant 16 : i32
    %1034 = arith.addi %1031, %c16_i32_424 : i32
    %1035 = arith.index_cast %1034 : i32 to index
    %c0_425 = arith.constant 0 : index
    %1036 = vector.load %arg2[%1035, %c0_425] : memref<536x4xf32, #tpu.memory_space<vmem>>, vector<2x4xf32>
    %1037 = vector.extract_strided_slice %1033 {offsets = [0, 0], sizes = [1, 4], strides = [1, 1]} : vector<2x4xf32> to vector<1x4xf32>
    %1038 = vector.broadcast %1028 : f32 to vector<1x4xf32>
    %1039 = arith.mulf %1038, %1037 : vector<1x4xf32>
    %1040 = vector.extract_strided_slice %1033 {offsets = [1, 0], sizes = [1, 4], strides = [1, 1]} : vector<2x4xf32> to vector<1x4xf32>
    %1041 = vector.broadcast %1026 : f32 to vector<1x4xf32>
    %1042 = arith.mulf %1041, %1040 : vector<1x4xf32>
    %1043 = arith.addf %1039, %1042 : vector<1x4xf32>
    %1044 = vector.broadcast %1027 : f32 to vector<1x4xf32>
    %1045 = arith.mulf %1044, %1043 : vector<1x4xf32>
    %1046 = vector.extract_strided_slice %1036 {offsets = [0, 0], sizes = [1, 4], strides = [1, 1]} : vector<2x4xf32> to vector<1x4xf32>
    %1047 = vector.broadcast %1028 : f32 to vector<1x4xf32>
    %1048 = arith.mulf %1047, %1046 : vector<1x4xf32>
    %1049 = vector.extract_strided_slice %1036 {offsets = [1, 0], sizes = [1, 4], strides = [1, 1]} : vector<2x4xf32> to vector<1x4xf32>
    %1050 = vector.broadcast %1026 : f32 to vector<1x4xf32>
    %1051 = arith.mulf %1050, %1049 : vector<1x4xf32>
    %1052 = arith.addf %1048, %1051 : vector<1x4xf32>
    %1053 = vector.broadcast %1024 : f32 to vector<1x4xf32>
    %1054 = arith.mulf %1053, %1052 : vector<1x4xf32>
    %1055 = arith.addf %1045, %1054 : vector<1x4xf32>
    %cst_426 = arith.constant 0.000000e+00 : f32
    %1056 = vector.broadcast %cst_426 : f32 to vector<1x4xf32>
    %1057 = arith.select %1016, %1055, %1056 : vector<1x4xf32>
    %1058 = arith.addf %999, %1057 : vector<1x4xf32>
    %cst_427 = arith.constant 1.000000e+00 : f32
    %1059 = vector.broadcast %cst_427 : f32 to vector<1x4xf32>
    %1060 = arith.mulf %1058, %1059 : vector<1x4xf32>
    %cst_428 = arith.constant 0.000000e+00 : f32
    %1061 = vector.broadcast %cst_428 : f32 to vector<1x4xf32>
    %cst_429 = arith.constant 1.000000e+00 : f32
    %1062 = arith.mulf %cst_429, %872 : f32
    %1063 = arith.addf %857, %1062 : f32
    %cst_430 = arith.constant 5.000000e-01 : f32
    %1064 = arith.mulf %cst_430, %872 : f32
    %cst_431 = arith.constant 1.000000e+00 : f32
    %1065 = arith.divf %1064, %cst_431 : f32
    %1066 = arith.addf %1063, %1065 : f32
    %cst_432 = arith.constant 1.000000e+00 : f32
    %1067 = arith.mulf %cst_432, %873 : f32
    %1068 = arith.addf %853, %1067 : f32
    %cst_433 = arith.constant 5.000000e-01 : f32
    %1069 = arith.mulf %cst_433, %873 : f32
    %cst_434 = arith.constant 1.000000e+00 : f32
    %1070 = arith.divf %1069, %cst_434 : f32
    %1071 = arith.addf %1068, %1070 : f32
    %cst_435 = arith.constant -1.000000e+00 : f32
    %1072 = arith.cmpf oge, %1066, %cst_435 : f32
    %cst_436 = arith.constant 1.600000e+01 : f32
    %1073 = arith.cmpf ole, %1066, %cst_436 : f32
    %1074 = arith.andi %1072, %1073 : i1
    %cst_437 = arith.constant -1.000000e+00 : f32
    %1075 = arith.cmpf oge, %1071, %cst_437 : f32
    %1076 = arith.andi %1074, %1075 : i1
    %cst_438 = arith.constant 1.600000e+01 : f32
    %1077 = arith.cmpf ole, %1071, %cst_438 : f32
    %1078 = arith.andi %1076, %1077 : i1
    %cst_439 = arith.constant 0.000000e+00 : f32
    %cst_440 = arith.constant 1.500000e+01 : f32
    %1079 = arith.maximumf %cst_439, %1066 : f32
    %1080 = arith.minimumf %cst_440, %1079 : f32
    %cst_441 = arith.constant 0.000000e+00 : f32
    %cst_442 = arith.constant 1.500000e+01 : f32
    %1081 = arith.maximumf %cst_441, %1071 : f32
    %1082 = arith.minimumf %cst_442, %1081 : f32
    %1083 = arith.fptosi %1080 : f32 to i32
    %1084 = arith.fptosi %1082 : f32 to i32
    %1085 = arith.sitofp %1083 : i32 to f32
    %1086 = arith.subf %1080, %1085 : f32
    %1087 = arith.sitofp %1084 : i32 to f32
    %1088 = arith.subf %1082, %1087 : f32
    %cst_443 = arith.constant 1.000000e+00 : f32
    %1089 = arith.subf %cst_443, %1086 : f32
    %cst_444 = arith.constant 1.000000e+00 : f32
    %1090 = arith.subf %cst_444, %1088 : f32
    %c16_i32_445 = arith.constant 16 : i32
    %1091 = arith.muli %1083, %c16_i32_445 : i32
    %1092 = arith.addi %874, %1091 : i32
    %1093 = arith.addi %1092, %1084 : i32
    %1094 = arith.index_cast %1093 : i32 to index
    %c0_446 = arith.constant 0 : index
    %1095 = vector.load %arg2[%1094, %c0_446] : memref<536x4xf32, #tpu.memory_space<vmem>>, vector<2x4xf32>
    %c16_i32_447 = arith.constant 16 : i32
    %1096 = arith.addi %1093, %c16_i32_447 : i32
    %1097 = arith.index_cast %1096 : i32 to index
    %c0_448 = arith.constant 0 : index
    %1098 = vector.load %arg2[%1097, %c0_448] : memref<536x4xf32, #tpu.memory_space<vmem>>, vector<2x4xf32>
    %1099 = vector.extract_strided_slice %1095 {offsets = [0, 0], sizes = [1, 4], strides = [1, 1]} : vector<2x4xf32> to vector<1x4xf32>
    %1100 = vector.broadcast %1090 : f32 to vector<1x4xf32>
    %1101 = arith.mulf %1100, %1099 : vector<1x4xf32>
    %1102 = vector.extract_strided_slice %1095 {offsets = [1, 0], sizes = [1, 4], strides = [1, 1]} : vector<2x4xf32> to vector<1x4xf32>
    %1103 = vector.broadcast %1088 : f32 to vector<1x4xf32>
    %1104 = arith.mulf %1103, %1102 : vector<1x4xf32>
    %1105 = arith.addf %1101, %1104 : vector<1x4xf32>
    %1106 = vector.broadcast %1089 : f32 to vector<1x4xf32>
    %1107 = arith.mulf %1106, %1105 : vector<1x4xf32>
    %1108 = vector.extract_strided_slice %1098 {offsets = [0, 0], sizes = [1, 4], strides = [1, 1]} : vector<2x4xf32> to vector<1x4xf32>
    %1109 = vector.broadcast %1090 : f32 to vector<1x4xf32>
    %1110 = arith.mulf %1109, %1108 : vector<1x4xf32>
    %1111 = vector.extract_strided_slice %1098 {offsets = [1, 0], sizes = [1, 4], strides = [1, 1]} : vector<2x4xf32> to vector<1x4xf32>
    %1112 = vector.broadcast %1088 : f32 to vector<1x4xf32>
    %1113 = arith.mulf %1112, %1111 : vector<1x4xf32>
    %1114 = arith.addf %1110, %1113 : vector<1x4xf32>
    %1115 = vector.broadcast %1086 : f32 to vector<1x4xf32>
    %1116 = arith.mulf %1115, %1114 : vector<1x4xf32>
    %1117 = arith.addf %1107, %1116 : vector<1x4xf32>
    %cst_449 = arith.constant 0.000000e+00 : f32
    %1118 = vector.broadcast %cst_449 : f32 to vector<1x4xf32>
    %1119 = arith.select %1078, %1117, %1118 : vector<1x4xf32>
    %1120 = arith.addf %1061, %1119 : vector<1x4xf32>
    %cst_450 = arith.constant 1.000000e+00 : f32
    %1121 = vector.broadcast %cst_450 : f32 to vector<1x4xf32>
    %1122 = arith.mulf %1120, %1121 : vector<1x4xf32>
    %1123 = tpu.concatenate %936, %998, %1060, %1122 in 0 : vector<1x4xf32>, vector<1x4xf32>, vector<1x4xf32>, vector<1x4xf32> -> vector<4x4xf32>
    %1124 = vector.shape_cast %280 : vector<4x4xf32> to vector<1x4x4xf32>
    %1125 = vector.shape_cast %561 : vector<4x4xf32> to vector<1x4x4xf32>
    %1126 = vector.shape_cast %842 : vector<4x4xf32> to vector<1x4x4xf32>
    %1127 = vector.shape_cast %1123 : vector<4x4xf32> to vector<1x4x4xf32>
    %1128 = tpu.concatenate %1124, %1125, %1126, %1127 in 0 : vector<1x4x4xf32>, vector<1x4x4xf32>, vector<1x4x4xf32>, vector<1x4x4xf32> -> vector<4x4x4xf32>
    %c0_451 = arith.constant 0 : index
    %c0_452 = arith.constant 0 : index
    %c0_453 = arith.constant 0 : index
    %1129 = vector.load %arg3[%c0_451, %c0_452, %c0_453] : memref<4x4x4xf32, #tpu.memory_space<vmem>>, vector<4x4x4xf32>
    tpu.vector_store %arg3[%c0_451, %c0_452, %c0_453], %1128 {strides = array<i32>} : memref<4x4x4xf32, #tpu.memory_space<vmem>>, vector<4x4x4xf32>,
    return
  }
  func.func @transform_0(%arg0: i32) -> (i32, i32) {
    %c0_i32 = arith.constant 0 : i32
    %c0_i32_0 = arith.constant 0 : i32
    %c0_i32_1 = arith.constant 0 : i32
    return %c0_i32, %c0_i32_0 : i32, i32
  }
  func.func @transform_1(%arg0: i32) -> (i32, i32) {
    %c0_i32 = arith.constant 0 : i32
    %c0_i32_0 = arith.constant 0 : i32
    %c0_i32_1 = arith.constant 0 : i32
    return %c0_i32, %c0_i32_0 : i32, i32
  }
  func.func @transform_2(%arg0: i32) -> (i32, i32, i32) {
    %c0_i32 = arith.constant 0 : i32
    %c0_i32_0 = arith.constant 0 : i32
    %c0_i32_1 = arith.constant 0 : i32
    return %arg0, %c0_i32, %c0_i32_0 : i32, i32, i32
  }
}

</mosaic_0001>

<bundles_post_ra>
// kernel: tpu_custom_call.1
= control target key start
LH: loop header
LB: loop body
LE: loop exit
PB: predicated region body
PF: predicated region fallthrough
CT: control target
= control target key end

     0   :  { %s2651_s0 = inlined_call_operand.vmem [shape: f32[8,5], index: 0, kind: input, shape index: {}]   ;;  %s2652_s1 = inlined_call_operand.vmem [shape: f32[536,4], index: 1, kind: input, shape index: {}]   ;;  %s2653_s2 = inlined_call_operand.vmem [shape: f32[8,4,4], index: 2, kind: output, shape index: {}]  }
   0x1   :  { %2681 = sst [smem:[#allocation17_spill]] %s2651_s0 }
   0x2   :  { %2682 = sst [smem:[#allocation18_spill]] %s2652_s1 }
   0x3   :  { %2683 = sst [smem:[#allocation19_spill]] %s2653_s2 }
   0x4   :  { %7 = vsyncpa [#allocation3], 0  ;;  %s1576_s9 = smov 0  }
   0x5 LB: > { %2684 = sst [smem:[#allocation5_spill]] %s1555_s9  ;;  %s1582_s10 = sadd.s32 4294967295, %s1555_s9   ;;  %s1555_s9 = sphi %s1576_s9, %s13_s9  }
   0x6   : > { %p1281_p0 = scmp.ge.s32.totalorder %s1555_s9, 1  ;;  %p86_p1 = scmp.lt.s32.totalorder %s1555_s9, 3 }
   0x7   : > { %s2685_s0 = sld [smem:[#allocation17_spill]]  ;;  %p1516_p3 = scmp.eq.s32.totalorder %s1582_s10, 0 }
   0x8   : > { %p1589_p2 = pnand %p1281_p0, %p86_p1 }
   0xa   : > { %p1512_p4 = pneg %p1589_p2 }
   0xc   : > { %p1513_p5 = pnand %p1516_p3, %p1512_p4 }
   0xd   : > { %s99_s13 = sshll.u32 %s2685_s0, 4  ;;  %s100_s13 = int_to_ptr.vmem [resolvable:$true] %s99_s13 }
   0xe   : > { %s1530_s15 = scalar_lea.vmem %s100_s13, 128  ;;  %p1532_p7 = pneg %p1513_p5 }
   0xf   : > { %p1531_p6 = scmp.ne.s32.totalorder %s100_s13, %s1530_s15  ;;  %p1538_p10 = scmp.lt.s32.totalorder %s100_s13, %s100_s13 }
  0x10   : > { %p1539_p11 = scmp.lt.s32.totalorder %s1530_s15, %s1530_s15 }
  0x11   : > { %p1533_p8 = pnand %p1532_p7, %p1531_p6 }
  0x12   : > { %p1540_p12 = por %p1539_p11, %p1538_p10 }
  0x13   : > { %p1534_p9 = pneg %p1533_p8 }
  0x15   : > { %p1541_p13 = pnand %p1540_p12, %p1534_p9 }
  0x17   : > { %1544 = shalt.err (!%p1541_p13)
}
  0x18   : > { %s1557_s16 = smov [#allocation2]   ;;  %115 = sbr.rel (%p1589_p2) target bundleno = 341 (0x155), region = 28 }
  0x19   : > { %1515 = dma.vmem_to_smem (!%p1513_p5), %s100_s13, 128, %s1557_s16, [#allocation3]  }
  0x1d   : > { %1550 = dma.done.wait (%p1516_p3), [#allocation3], 128  }
  0x1e   : > { %1552 = vsyncadd (%p1516_p3), [#allocation3], 4294967168 }
  0x1f   : > { %121 = sfence }
  0x20   : > { %s1285_s17 = sshll.u32 %s1582_s10, 2  ;;  %s1606_s18 = sshll.u32 %s1582_s10, 9  ;;  %vm361_vm5 = vcmask 1040384   ;;  %vm363_vm9 = vcmask 1041408   ;;  %vm365_vm10 = vcmask 1042432   ;;  %vm1042_vm11 = vcmask 27648  }
  0x21   : > { %2687 = sst [smem:[#allocation6_spill]] %s1606_s18  ;;  %p134_p0 = scmp.lt.s32.totalorder %s1285_s17, 7 }
  0x22   : > { %s141_s19 = sld [smem:[#allocation2 + %s1606_s18]]  ;;  %s147_s20 = sadd.s32 1, %s1606_s18 }
  0x23   : > { %s150_s21 = sadd.s32 2, %s1606_s18  ;;  %s2784_s17 = smov (!%p134_p0, %s1285_s17), 7 }
  0x24   : > { %s148_s22 = sld [smem:[#allocation2 + %s147_s20]]  ;;  %s153_s23 = sadd.s32 3, %s1606_s18 }
  0x25   : > { %s151_s24 = sld [smem:[#allocation2 + %s150_s21]]  ;;  %s157_s28 = sadd.s32 4, %s1606_s18 }
  0x26   : > { %s154_s25 = sld [smem:[#allocation2 + %s153_s23]]  ;;  %s1286_s29 = sshll.u32 %s2784_s17, 2 }
  0x27   : > { %s158_s30 = sld [smem:[#allocation2 + %s157_s28]]  ;;  %s1626_s15 = sadd.s32 128, %s1606_s18 }
  0x28   : > { %p1408_p1 = scmp.lt.s32.totalorder %s141_s19, 0  ;;  %s1409_s26 = sceil.f32 %s141_s19 }
  0x29   : > { %s1410_s27 = sfloor.f32 %s141_s19  ;;  %s2688_s2 = sld [smem:[#allocation19_spill]] }
  0x2a   : > { %s2786_s26 = smov (!%p1408_p1, %s1409_s26), %s1410_s27  ;;  %s1613_s4 = smul.f32 -0.57478017, %s148_s22 }
  0x2b   : > { %s1412_s3 = scvt.f32.s32 %s2786_s26  ;;  %s1615_s5 = smul.f32 -0.57478017, %s151_s24 }
  0x2c   : > { %s155_s6 = sadd.f32 1.0, %s154_s25  ;;  %s2654_s17 = smov 1.0  }
  0x2d   : > { %p143_p2 = scmp.gt.s32.totalorder %s1412_s3, 0  ;;  %p1289_p3 = scmp.lt.s32.totalorder %s1412_s3, 1 }
  0x2e   : > { %s156_s11 = smul.f32 -0.57478017, %s155_s6  ;;  %s159_s12 = sadd.f32 1.0, %s158_s30 }
  0x2f   : > { %s1620_s10 = scalar_lea.vmem %s2688_s2, %s1286_s29  ;;  %s2788_s3 = smov (!%p143_p2, %s1412_s3), 0 }
  0x30   : > { %2689 = sst [smem:[#allocation7_spill]] %s1620_s10  ;;  %s2790_s3 = smov (!%p1289_p3, %s2788_s3), 1 }
  0x31   : > { %s160_s13 = smul.f32 -0.57478017, %s159_s12  ;;  %s161_s14 = ssub.f32 %s156_s11, %s1613_s4 }
  0x32   : > { %s1633_s21 = sld [smem:[#allocation2 + %s1626_s15]]  ;;  %s375_s23 = sadd.s32 1, %s1626_s15 }
  0x33   : > { %s162_s16 = ssub.f32 %s160_s13, %s1615_s5  ;;  %s163_s19 = smax.f32 %s2654_s17, %s161_s14 }
  0x34   : > { %s1630_s20 = smul.f32 0.5, %s163_s19  ;;  %s1640_s27 = sld [smem:[#allocation2 + %s375_s23]] }
  0x35   : > { %s164_s22 = smax.f32 %s2654_s17, %s162_s16  ;;  %s2660_s12 = sshll.u32 %s2790_s3, 8 }
  0x36   : > { %s167_s24 = smul.f32 0.5, %s164_s22  ;;  %s2656_s22 = smov 15.0  }
  0x37   : > { %s176_s26 = smul.f32 0.0, %s1630_s20  ;;  %s2696_s1 = sld [smem:[#allocation18_spill]] }
  0x38   : > { %s172_s28 = smul.f32 0.0, %s167_s24  ;;  %s276_s29 = sadd.f32 %s167_s24, %s1615_s5 }
  0x39   : > { %s174_s30 = smul.f32 0.5, %s167_s24  ;;  %s177_s6 = sadd.f32 %s176_s26, %s1613_s4 }
  0x3a   : > { %s173_s7 = sadd.f32 %s172_s28, %s1615_s5  ;;  %s178_s8 = smul.f32 0.5, %s1630_s20 }
  0x3b   : > { %s1646_s11 = sadd.f32 %s276_s29, %s174_s30  ;;  %p1433_p4 = scmp.lt.s32.totalorder %s1633_s21, 0 }
  0x3c   : > { %s175_s13 = sadd.f32 %s174_s30, %s173_s7  ;;  %s2658_s5 = smov 0.0  }
  0x3d   : > { %s1651_s14 = sadd.f32 %s178_s8, %s177_s6  ;;  %p278_p1 = scmp.ge.f32.partialorder %s1646_s11, -1.0 }
  0x3e   : > { %p180_p5 = scmp.ge.f32.partialorder %s175_s13, -1.0  ;;  %p181_p6 = scmp.le.f32.partialorder %s175_s13, 16.0 }
  0x3f   : > { %p184_p7 = scmp.ge.f32.partialorder %s1651_s14, -1.0  ;;  %p187_p8 = scmp.le.f32.partialorder %s1651_s14, 16.0 }
  0x40   : > { %p1656_p9 = pnand %p181_p6, %p180_p5  ;;  %s190_s19 = smax.f32 %s2658_s5, %s175_s13 }
  0x41   : > { %s191_s23 = smin.f32 %s2656_s22, %s190_s19  ;;  %s192_s24 = smax.f32 %s2658_s5, %s1651_s14 }
  0x42   : > { %p183_p10 = pneg %p1656_p9  ;;  %s1667_s26 = smin.f32 %s2656_s22, %s192_s24 }
  0x43   : > { %p1413_p11 = scmp.lt.s32.totalorder %s191_s23, 0  ;;  %s1414_s28 = sceil.f32 %s191_s23 }
  0x44   : > { %p1674_p12 = pnand %p184_p7, %p183_p10  ;;  %s1415_s30 = sfloor.f32 %s191_s23 }
  0x45   : > { %s2792_s28 = smov (!%p1413_p11, %s1414_s28), %s1415_s30  ;;  %p1418_p0 = scmp.lt.s32.totalorder %s1667_s26, 0 }
  0x46   : > { %p186_p13 = pneg %p1674_p12  ;;  %s1417_s6 = scvt.f32.s32 %s2792_s28 }
  0x47   : > { %s1419_s7 = sceil.f32 %s1667_s26  ;;  %s1420_s13 = sfloor.f32 %s1667_s26 }
  0x48   : > { %s2794_s7 = smov (!%p1418_p0, %s1419_s7), %s1420_s13  ;;  %s196_s19 = scvt.s32.f32 %s1417_s6 }
  0x49   : > { %s1295_s24 = sshll.u32 %s1417_s6, 4  ;;  %p1686_p2 = pnand %p187_p8, %p186_p13 }
  0x4a   : > { %s1690_s28 = scvt.f32.s32 %s2794_s7  ;;  %s1692_s29 = ssub.f32 %s191_s23, %s196_s19 }
  0x4b   : > { %s2692_s17 = scalar_select %p1686_p2, 1, 0 }
  0x4c   : > { %2694 = sst [smem:[#allocation9_spill]] %s1692_s29  ;;  %p279_p3 = scmp.le.f32.partialorder %s1646_s11, 16.0 }
  0x4d   : > { %2693 = sst [smem:[#allocation8_spill]] %s2692_s17  ;;  %s1697_s30 = sadd.s32 %s1295_s24, %s2660_s12 }
  0x4e   : > { %s198_s13 = scvt.s32.f32 %s1690_s28  ;;  %s204_s22 = sadd.s32 %s1690_s28, %s1697_s30 }
  0x4f   : > { %p1706_p5 = pnand %p279_p3, %p278_p1  ;;  %s1715_s24 = scalar_lea.vmem %s2696_s1, %s204_s22 }
  0x50   : > { %s2697_s6 = sadd.f32 %s1630_s20, %s1613_s4  ;;  %s2698_s5 = smov 0.0   ;;  %v206_v3 = vld [vmem:[%s1715_s24] sm:$0x3]  ;;  %v1298_v4 = vld [vmem:[%s1715_s24 + $0x10] sm:$0x3] }
  0x51   : > { %p281_p6 = pneg %p1706_p5  ;;  %s286_s0 = smax.f32 %s2698_s5, %s1646_s11 }
  0x52   : > { %s1724_s12 = sadd.f32 %s2697_s6, %s178_s8  ;;  %s2700_s4 = smov 15.0  }
  0x53   : > { %s1729_s2 = ssub.f32 %s1667_s26, %s198_s13  ;;  %p1736_p11 = pnand %p281_p6, %p184_p7 }
  0x54   : > { %p236_p12 = scmp.ge.f32.partialorder %s1724_s12, -1.0  ;;  %s1742_s20 = smin.f32 %s2700_s4, %s286_s0 }
  0x55   : > { %p239_p13 = scmp.le.f32.partialorder %s1724_s12, 16.0  ;;  %s242_s8 = smax.f32 %s2698_s5, %s1724_s12  ;;  %v212_v5 = vstv %s1729_s2 }
  0x56   : > { %p237_p0 = pnand %p236_p12, %p183_p10  ;;  %s243_s11 = smin.f32 %s2700_s4, %s242_s8  ;;  %v213_v10 = vmul.f32 %v212_v5, %v206_v3  ;;  %v221_v11 = vmul.f32 %v1298_v4, %v212_v5 }
  0x57   : > { %p1423_p7 = scmp.lt.s32.totalorder %s243_s11, 0  ;;  %s1424_s26 = sceil.f32 %s243_s11 }
  0x58   : > { %p238_p1 = pneg %p237_p0  ;;  %s1425_s0 = sfloor.f32 %s243_s11  ;;  %v215_v18 = vrot.slane %v213_v10, 1  ;;  %v223_v20 = vrot.slane %v221_v11, 1 }
  0x59   : > { %s2796_s26 = smov (!%p1423_p7, %s1424_s26), %s1425_s0  ;;  %p283_p9 = pneg %p1736_p11 }
  0x5a   : > { %p1755_p3 = pnand %p239_p13, %p238_p1  ;;  %s1761_s16 = scvt.f32.s32 %s2796_s26 }
  0x5b   : > { %p1428_p10 = scmp.lt.s32.totalorder %s1742_s20, 0  ;;  %s1429_s0 = sceil.f32 %s1742_s20 }
  0x5c   : > { %s2701_s6 = scalar_select %p1755_p3, 1, 0 }
  0x5d   : > { %s245_s19 = scvt.s32.f32 %s1761_s16  ;;  %s248_s8 = sadd.s32 %s1761_s16, %s1697_s30 }
  0x5e   : > { %2702 = sst [smem:[#allocation10_spill]] %s2701_s6  ;;  %p1773_p0 = pnand %p283_p9, %p187_p8 }
  0x5f   : > { %s1430_s26 = sfloor.f32 %s1742_s20  ;;  %s1781_s13 = scalar_lea.vmem %s2696_s1, %s248_s8 }
  0x60   : > { %s2703_s22 = scalar_select %p1773_p0, 1, 0  ;;  %v250_v0 = vld [vmem:[%s1781_s13] sm:$0x3]  ;;  %v1302_v1 = vld [vmem:[%s1781_s13 + $0x10] sm:$0x3] }
  0x61   : > { %s2798_s0 = smov (!%p1428_p10, %s1429_s0), %s1430_s26  ;;  %p322_p11 = pnand %p281_p6, %p236_p12 }
  0x62   : > { %2704 = sst [smem:[#allocation11_spill]] %s2703_s22  ;;  %s1432_s30 = scvt.f32.s32 %s2798_s0 }
  0x63   : > { %s1788_s14 = ssub.f32 %s243_s11, %s245_s19  ;;  %s2705_s9 = sshll.u32 %s2790_s3, 8 }
  0x64   : > { %s289_s26 = scvt.s32.f32 %s1432_s30  ;;  %s1304_s10 = sshll.u32 %s1432_s30, 4 }
  0x65   : > { %s1794_s23 = sadd.s32 %s1304_s10, %s2705_s9  ;;  %p323_p8 = pneg %p322_p11  ;;  %v1903_v2 = vstv %s1788_s14 }
  0x66   : > { %s1797_s25 = ssub.f32 %s1742_s20, %s289_s26  ;;  %s294_s11 = sadd.s32 %s1690_s28, %s1794_s23  ;;  %v257_v6 = vmul.f32 %v1903_v2, %v250_v0  ;;  %v264_v7 = vmul.f32 %v1302_v1, %v1903_v2 }
  0x67   : > { %p1804_p5 = pnand %p323_p8, %p239_p13  ;;  %s1811_s3 = scalar_lea.vmem %s2696_s1, %s294_s11 }
  0x68   : > { %2706 = sst [smem:[#allocation12_spill]] %s1797_s25  ;;  %s1435_s10 = sfloor.f32 %s1633_s21  ;;  %v259_v13 = vrot.slane %v257_v6, 1  ;;  %v266_v15 = vrot.slane %v264_v7, 1 }
  0x69   : > { %s2707_s8 = scalar_select %p1804_p5, 1, 0 }
  0x6a   : > { %2709 = sst [smem:[#allocation14_spill]] %s1811_s3  ;;  %s326_s20 = sadd.s32 %s1761_s16, %s1794_s23 }
  0x6b   : > { %2708 = sst [smem:[#allocation13_spill]] %s2707_s8  ;;  %s2710_s28 = sceil.f32 %s1633_s21 }
  0x6c   : > { %s2800_s28 = smov (!%p1433_p4, %s2710_s28), %s1435_s10  ;;  %s378_s12 = sadd.s32 2, %s1626_s15 }
  0x6d   : > { %s381_s9 = sadd.s32 3, %s1626_s15  ;;  %s1437_s19 = scvt.f32.s32 %s2800_s28 }
  0x6e   : > { %s379_s22 = sld [smem:[#allocation2 + %s378_s12]]  ;;  %s385_s6 = sadd.s32 4, %s1626_s15 }
  0x6f   : > { %s382_s17 = sld [smem:[#allocation2 + %s381_s9]]  ;;  %p371_p6 = scmp.gt.s32.totalorder %s1437_s19, 0 }
  0x70   : > { %p1314_p12 = scmp.lt.s32.totalorder %s1437_s19, 1  ;;  %s386_s7 = sld [smem:[#allocation2 + %s385_s6]] }
  0x71   : > { %s1827_s11 = sadd.s32 256, %s1606_s18  ;;  %s2802_s19 = smov (!%p371_p6, %s1437_s19), 0 }
  0x72   : > { %s1830_s16 = smul.f32 -0.57478017, %s1640_s27  ;;  %s1833_s21 = sld [smem:[#allocation2 + %s1827_s11]] }
  0x73   : > { %s2804_s19 = smov (!%p1314_p12, %s2802_s19), 1  ;;  %s600_s23 = sadd.s32 1, %s1827_s11 }
  0x74   : > { %s1841_s10 = scalar_lea.vmem %s2696_s1, %s326_s20  ;;  %s380_s28 = smul.f32 -0.57478017, %s379_s22 }
  0x75   : > { %s383_s15 = sadd.f32 1.0, %s382_s17  ;;  %s603_s18 = sadd.s32 2, %s1827_s11 }
  0x76   : > { %2711 = sst [smem:[#allocation15_spill]] %s1841_s10  ;;  %s2713_s29 = smov 1.0  }
  0x77   : > { %s384_s12 = smul.f32 -0.57478017, %s383_s15  ;;  %s387_s27 = sadd.f32 1.0, %s386_s7 }
  0x78   : > { %s1844_s26 = sld [smem:[#allocation2 + %s600_s23]] }
  0x79   : > { %s388_s30 = smul.f32 -0.57478017, %s387_s27  ;;  %s389_s8 = ssub.f32 %s384_s12, %s1830_s16 }
  0x7a   : > { %s1858_s6 = sld [smem:[#allocation2 + %s603_s18]] }
  0x7b   : > { %s390_s17 = ssub.f32 %s388_s30, %s380_s28  ;;  %s391_s3 = smax.f32 %s2713_s29, %s389_s8 }
  0x7c   : > { %s1850_s0 = smul.f32 0.5, %s391_s3 }
  0x7d   : > { %s392_s22 = smax.f32 %s2713_s29, %s390_s17 }
  0x7e   : > { %2712 = sst [smem:[#allocation16_spill]] %s1844_s26  ;;  %s395_s7 = smul.f32 0.5, %s392_s22 }
  0x7f   : > { %s404_s23 = smul.f32 0.0, %s1850_s0  ;;  %s2719_s26 = sld [smem:[#allocation18_spill]] }
  0x80   : > { %s400_s30 = smul.f32 0.0, %s395_s7  ;;  %s504_s12 = sadd.f32 %s395_s7, %s380_s28 }
  0x81   : > { %s402_s8 = smul.f32 0.5, %s395_s7  ;;  %s405_s27 = sadd.f32 %s404_s23, %s1830_s16 }
  0x82   : > { %s401_s3 = sadd.f32 %s400_s30, %s380_s28  ;;  %s406_s25 = smul.f32 0.5, %s1850_s0 }
  0x83   : > { %s1862_s9 = sadd.f32 %s504_s12, %s402_s8 }
  0x84   : > { %s403_s10 = sadd.f32 %s402_s8, %s401_s3 }
  0x85   : > { %s1868_s17 = sadd.f32 %s406_s25, %s405_s27  ;;  %p506_p13 = scmp.ge.f32.partialorder %s1862_s9, -1.0 }
  0x86   : > { %p408_p7 = scmp.ge.f32.partialorder %s403_s10, -1.0  ;;  %p409_p1 = scmp.le.f32.partialorder %s403_s10, 16.0 }
  0x87   : > { %p412_p9 = scmp.ge.f32.partialorder %s1868_s17, -1.0  ;;  %p2676_p10 = scmp.le.f32.partialorder %s1868_s17, 16.0 }
  0x88   : > { %p1873_p11 = pnand %p409_p1, %p408_p7  ;;  %s418_s28 = smax.f32 %s2698_s5, %s403_s10 }
  0x89   : > { %s419_s22 = smin.f32 %s2700_s4, %s418_s28  ;;  %s420_s7 = smax.f32 %s2698_s5, %s1868_s17 }
  0x8a   : > { %p411_p8 = pneg %p1873_p11  ;;  %s1884_s23 = smin.f32 %s2700_s4, %s420_s7 }
  0x8b   : > { %p1438_p6 = scmp.lt.s32.totalorder %s419_s22, 0  ;;  %s1439_s30 = sceil.f32 %s419_s22 }
  0x8c   : > { %p413_p12 = pnand %p412_p9, %p411_p8  ;;  %s1440_s10 = sfloor.f32 %s419_s22 }
  0x8d   : > { %s2806_s30 = smov (!%p1438_p6, %s1439_s30), %s1440_s10  ;;  %p1443_p1 = scmp.lt.s32.totalorder %s1884_s23, 0 }
  0x8e   : > { %p414_p7 = pneg %p413_p12  ;;  %s1442_s12 = scvt.f32.s32 %s2806_s30 }
  0x8f   : > { %s1444_s8 = sceil.f32 %s1884_s23  ;;  %s1445_s3 = sfloor.f32 %s1884_s23 }
  0x90   : > { %p1895_p4 = pnand %p2676_p10, %p414_p7  ;;  %s2808_s8 = smov (!%p1443_p1, %s1444_s8), %s1445_s3 }
  0x91   : > { %s424_s28 = scvt.s32.f32 %s1442_s12  ;;  %s1320_s7 = sshll.u32 %s1442_s12, 4 }
  0x92   : > { %s1905_s10 = scvt.f32.s32 %s2808_s8  ;;  %s2716_s30 = sshll.u32 %s2804_s19, 8 }
  0x93   : > { %s1909_s1 = sadd.s32 %s1320_s7, %s2716_s30  ;;  %s1916_s13 = ssub.f32 %s419_s22, %s424_s28 }
  0x94   : > { %p507_p6 = scmp.le.f32.partialorder %s1862_s9, 16.0  ;;  %s2717_s12 = ssub.f32 1.0, %s1788_s14 }
  0x95   : > { %s426_s8 = scvt.s32.f32 %s1905_s10  ;;  %s2718_s3 = sld [smem:[#allocation14_spill]] }
  0x96   : > { %v1921_v8 = vstv %s2717_s12  ;;  %s432_s7 = sadd.s32 %s1905_s10, %s1909_s1  ;;  %s428_s24 = ssub.f32 1.0, %s1916_s13 }
  0x97   : > { %s1930_s15 = scalar_lea.vmem %s2719_s26, %s432_s7  ;;  %s2720_s22 = ssub.f32 1.0, %s1729_s2  ;;  %v255_v12 = vmul.f32 %v1921_v8, %v250_v0  ;;  %v263_v14 = vmul.f32 %v1302_v1, %v1921_v8 }
  0x98   : > { %s1935_s14 = ssub.f32 %s1884_s23, %s426_s8  ;;  %p1939_p12 = pnand %p507_p6, %p506_p13  ;;  %v434_v37 = vld [vmem:[%s1930_s15] sm:$0x3]  ;;  %v1323_v43 = vld [vmem:[%s1930_s15 + $0x10] sm:$0x3] }
  0x99   : > { %v210_v9 = vstv %s2720_s22  ;;  %s2722_s23 = sld [smem:[#allocation9_spill]]  ;;  %s514_s7 = smax.f32 %s2698_s5, %s1862_s9  ;;  %v261_v21 = vadd.f32 %v259_v13, %v255_v12  ;;  %v268_v22 = vadd.f32 %v266_v15, %v263_v14 }
  0x9a   : > { %s429_s20 = ssub.f32 1.0, %s1935_s14  ;;  %p2675_p7 = pneg %p1939_p12  ;;  %v211_v17 = vmul.f32 %v210_v9, %v206_v3  ;;  %v220_v19 = vmul.f32 %v1298_v4, %v210_v9  ;;  %v2006_v38 = vstv %s1935_s14 }
  0x9b   : > { %v296_v16 = vld [vmem:[%s2718_s3] sm:$0x3]  ;;  %s2723_s12 = sadd.f32 %s1850_s0, %s1830_s16  ;;  %v1307_v23 = vld [vmem:[%s2718_s3 + $0x10] sm:$0x3]  ;;  %v441_v49 = vmul.f32 %v2006_v38, %v434_v37  ;;  %v449_v53 = vmul.f32 %v1323_v43, %v2006_v38 }
  0x9c   : > { %p1965_p13 = pnand %p2675_p7, %p412_p9  ;;  %s2725_s16 = sld [smem:[#allocation15_spill]]  ;;  %v301_v26 = vmul.f32 %v296_v16, %v212_v5  ;;  %v309_v27 = vmul.f32 %v1307_v23, %v212_v5  ;;  %v217_v28 = vadd.f32 %v215_v18, %v211_v17  ;;  %v225_v29 = vadd.f32 %v223_v20, %v220_v19 }
  0x9d   : > { %s1956_s8 = sadd.f32 %s2723_s12, %s406_s25  ;;  %s1970_s25 = smin.f32 %s2700_s4, %s514_s7  ;;  %v300_v34 = vmul.f32 %v296_v16, %v210_v9  ;;  %v308_v39 = vmul.f32 %v1307_v23, %v210_v9  ;;  %v2045_v52 = vstv %s429_s20  ;;  %v451_v5 = vrot.slane %v449_v53, 1 }
  0x9e   : > { %p511_p9 = pneg %p1965_p13  ;;  %v303_v35 = vrot.slane %v301_v26, 1  ;;  %v311_v40 = vrot.slane %v309_v27, 1  ;;  %s2734_s22 = sld [smem:[#allocation12_spill]]  ;;  %v439_v1 = vmul.f32 %v2045_v52, %v434_v37  ;;  %v448_v4 = vmul.f32 %v1323_v43, %v2045_v52 }
  0x9f   : > { %p2677_p1 = scmp.ge.f32.partialorder %s1956_s8, -1.0  ;;  %p467_p6 = scmp.le.f32.partialorder %s1956_s8, 16.0  ;;  %v226_v25 = vstv %s2722_s23  ;;  %v446_v17 = vstv %s428_s24  ;;  %v454_v18 = vstv %s1916_s13 }
  0xa0   : > { %s2726_s9 = ssub.f32 1.0, %s2722_s23  ;;  %s470_s0 = smax.f32 %s2698_s5, %s1956_s8  ;;  %v269_v31 = vmul.f32 %v268_v22, %v226_v25  ;;  %v227_v45 = vmul.f32 %v226_v25, %v225_v29  ;;  %v305_v48 = vadd.f32 %v303_v35, %v300_v34  ;;  %v313_v54 = vadd.f32 %v311_v40, %v308_v39 }
  0xa1   : > { %p1987_p7 = pnand %p2677_p1, %p411_p8  ;;  %s1992_s12 = smin.f32 %s2700_s4, %s470_s0 }
  0xa2   : > { %v218_v24 = vstv %s2726_s9  ;;  %p1448_p10 = scmp.lt.s32.totalorder %s1992_s12, 0  ;;  %s1449_s18 = sceil.f32 %s1992_s12  ;;  %v328_v32 = vld [vmem:[%s2725_s16] sm:$0x3]  ;;  %v1311_v33 = vld [vmem:[%s2725_s16 + $0x10] sm:$0x3] }
  0xa3   : > { %v262_v30 = vmul.f32 %v261_v21, %v218_v24  ;;  %p466_p11 = pneg %p1987_p7  ;;  %s1450_s23 = sfloor.f32 %s1992_s12  ;;  %v333_v41 = vmul.f32 %v328_v32, %v1903_v2  ;;  %v340_v42 = vmul.f32 %v1311_v33, %v1903_v2  ;;  %v219_v44 = vmul.f32 %v218_v24, %v217_v28 }
  0xa4   : > { %s2810_s18 = smov (!%p1448_p10, %s1449_s18), %s1450_s23  ;;  %p2732_p1 = scmp.le.f32.partialorder %s1868_s17, 16.0  ;;  %v332_v51 = vmul.f32 %v328_v32, %v1921_v8  ;;  %v339_v56 = vmul.f32 %v1311_v33, %v1921_v8  ;;  %v314_v62 = vstv %s2734_s22  ;;  %v443_v2 = vrot.slane %v441_v49, 1 }
  0xa5   : > { %s2729_s7 = scalar_select %p1755_p3, 0, 1  ;;  %v270_v46 = vadd.f32 %v269_v31, %v262_v30  ;;  %v335_v55 = vrot.slane %v333_v41, 1  ;;  %v342_v57 = vrot.slane %v340_v42, 1  ;;  %v2055_v60 = vadd.f32 %v227_v45, %v219_v44 }
  0xa6   : > { %p2010_p8 = pnand %p467_p6, %p466_p11  ;;  %p2019_p7 = pnand %p511_p9, %p2732_p1  ;;  %v315_v8 = vmul.f32 %v314_v62, %v313_v54  ;;  %v445_v20 = vadd.f32 %v443_v2, %v439_v1  ;;  %v453_v21 = vadd.f32 %v451_v5, %v448_v4 }
  0xa7   : > { %v272_v36 = vstv %s2729_s7  ;;  %s2026_s3 = scvt.f32.s32 %s2810_s18  ;;  %p1453_p3 = scmp.lt.s32.totalorder %s1970_s25, 0  ;;  %v337_v9 = vadd.f32 %v335_v55, %v332_v51  ;;  %v344_v10 = vadd.f32 %v342_v57, %v339_v56 }
  0xa8   : > { %s2735_s30 = scalar_select %p1686_p2, 0, 1  ;;  %vm273_vm0 = vcmp.eq.s32.totalorder %v272_v36, 1  ;;  %v447_v36 = vmul.f32 %v446_v17, %v445_v20  ;;  %v455_v37 = vmul.f32 %v454_v18, %v453_v21 }
  0xa9   : > { %s473_s15 = scvt.s32.f32 %s2026_s3  ;;  %s476_s18 = sadd.s32 %s2026_s3, %s1909_s1  ;;  %v2058_v61 = vsel %vm273_vm0, %v270_v46, 0.0  ;;  %v345_v27 = vmul.f32 %v344_v10, %v314_v62 }
  0xaa   : > { %v2034_v47 = vstv %s2735_s30  ;;  %s2736_s23 = ssub.f32 1.0, %s2734_s22  ;;  %s477_s2 = scalar_lea.vmem %s2719_s26, %s476_s18  ;;  %v353_v26 = vrot.slane %v2058_v61, 7  ;;  %v456_v56 = vadd.f32 %v455_v37, %v447_v36 }
  0xab   : > { %s1454_s17 = sceil.f32 %s1970_s25  ;;  %s474_s1 = ssub.f32 %s1992_s12, %s473_s15  ;;  %v478_v58 = vld [vmem:[%s477_s2] sm:$0x3]  ;;  %v1327_v59 = vld [vmem:[%s477_s2 + $0x10] sm:$0x3]  ;;  %vm231_vm1 = vcmp.eq.s32.totalorder %v2034_v47, 1 }
  0xac   : > { %v306_v50 = vstv %s2736_s23  ;;  %s1455_s14 = sfloor.f32 %s1970_s25  ;;  %s2738_s20 = sld [smem:[#allocation6_spill]]  ;;  %v232_v4 = vsel %vm231_vm1, %v2055_v60, 0.0 }
  0xad   : > { %s2739_s18 = scalar_select %p1773_p0, 0, 1  ;;  %v307_v0 = vmul.f32 %v306_v50, %v305_v48  ;;  %v2069_v3 = vstv %s474_s1  ;;  %v338_v25 = vmul.f32 %v337_v9, %v306_v50  ;;  %v362_v60 = vsel %vm361_vm5, %v232_v4, %v353_v26 }
  0xae   : > { %s2812_s17 = smov (!%p1453_p3, %s1454_s17), %s1455_s14  ;;  %s475_s2 = ssub.f32 1.0, %s474_s1  ;;  %v485_v6 = vmul.f32 %v2069_v3, %v478_v58  ;;  %v492_v7 = vmul.f32 %v1327_v59, %v2069_v3 }
  0xaf   : > { %v2064_v63 = vstv %s2739_s18  ;;  %p2740_p2 = scmp.ge.f32.partialorder %s1956_s8, -1.0  ;;  %p2741_p10 = pneg %p1939_p12  ;;  %v316_v24 = vadd.f32 %v315_v8, %v307_v0  ;;  %v346_v55 = vadd.f32 %v345_v27, %v338_v25 }
  0xb0   : > { %s1457_s15 = scvt.f32.s32 %s2812_s17  ;;  %v482_v11 = vstv %s475_s2  ;;  %v487_v13 = vrot.slane %v485_v6, 1  ;;  %v494_v15 = vrot.slane %v492_v7, 1  ;;  %s2746_s1 = sshll.u32 %s2804_s19, 8  ;;  %vm319_vm2 = vcmp.eq.s32.totalorder %v2064_v63, 1 }
  0xb1   : > { %p2076_p13 = pnand %p2741_p10, %p2740_p2  ;;  %v483_v12 = vmul.f32 %v482_v11, %v478_v58  ;;  %v491_v14 = vmul.f32 %v1327_v59, %v482_v11  ;;  %s2748_s22 = sadd.s32 3, %s1827_s11  ;;  %v320_v1 = vsel %vm319_vm2, %v316_v24, 0.0 }
  0xb2   : > { %s2084_s23 = sadd.s32 384, %s2738_s20  ;;  %s517_s7 = scvt.s32.f32 %s1457_s15  ;;  %v356_v10 = vrot.slane %v320_v1, 6 }
  0xb3   : > { %s1333_s28 = scalar_select %p2019_p7, 0, 1  ;;  %v489_v22 = vadd.f32 %v487_v13, %v483_v12  ;;  %v496_v23 = vadd.f32 %v494_v15, %v491_v14 }
  0xb4   : > { %s1329_s9 = sshll.u32 %s1457_s15, 4  ;;  %p551_p0 = pneg %p2076_p13  ;;  %v364_v61 = vsel %vm363_vm9, %v362_v60, %v356_v10 }
  0xb5   : > { %s2744_s17 = scalar_select %p1804_p5, 0, 1  ;;  %v490_v28 = vmul.f32 %v489_v22, %v446_v17  ;;  %v497_v29 = vmul.f32 %v496_v23, %v454_v18  ;;  %v546_v53 = vstv %s1333_s28 }
  0xb6   : > { %s2745_s30 = scalar_select %p2010_p8, 0, 1  ;;  %vm547_vm7 = vcmp.eq.s32.totalorder %v546_v53, 1 }
  0xb7   : > { %v2091_v16 = vstv %s2744_s17  ;;  %s2101_s14 = sadd.s32 %s1329_s9, %s2746_s1  ;;  %s2107_s20 = ssub.f32 %s1970_s25, %s517_s7  ;;  %v498_v40 = vadd.f32 %v497_v29, %v490_v28 }
  0xb8   : > { %v500_v19 = vstv %s2745_s30  ;;  %s522_s13 = sadd.s32 %s1905_s10, %s2101_s14  ;;  %p2121_p5 = pnand %p551_p0, %p467_p6  ;;  %vm349_vm3 = vcmp.eq.s32.totalorder %v2091_v16, 1 }
  0xb9   : > { %s523_s0 = scalar_lea.vmem %s2719_s26, %s522_s13  ;;  %vm501_vm4 = vcmp.eq.s32.totalorder %v500_v19, 1  ;;  %s519_s10 = ssub.f32 1.0, %s2107_s20  ;;  %v542_v48 = vstv %s2107_s20  ;;  %v350_v9 = vsel %vm349_vm3, %v346_v55, 0.0 }
  0xba   : > { %v524_v30 = vld [vmem:[%s523_s0] sm:$0x3]  ;;  %v1332_v31 = vld [vmem:[%s523_s0 + $0x10] sm:$0x3]  ;;  %s554_s18 = sadd.s32 %s2026_s3, %s2101_s14  ;;  %s2138_s15 = sld [smem:[#allocation2 + %s2748_s22]]  ;;  %v502_v57 = vsel %vm501_vm4, %v498_v40, 0.0 }
  0xbb   : > { %v528_v32 = vmul.f32 %v524_v30, %v2045_v52  ;;  %v529_v33 = vmul.f32 %v524_v30, %v2006_v38  ;;  %v536_v34 = vmul.f32 %v1332_v31, %v2045_v52  ;;  %v537_v35 = vmul.f32 %v1332_v31, %v2006_v38  ;;  %s555_s12 = scalar_lea.vmem %s2719_s26, %s554_s18  ;;  %s2750_s9 = sfloor.f32 %s1833_s21 }
  0xbc   : > { %s2749_s3 = scalar_select %p1895_p4, 0, 1  ;;  %v556_v41 = vld [vmem:[%s555_s12] sm:$0x3]  ;;  %v1336_v42 = vld [vmem:[%s555_s12 + $0x10] sm:$0x3]  ;;  %v534_v46 = vstv %s519_s10 }
  0xbd   : > { %s1337_s7 = scalar_select %p2121_p5, 0, 1  ;;  %v531_v38 = vrot.slane %v529_v33, 1  ;;  %v539_v43 = vrot.slane %v537_v35, 1  ;;  %v560_v44 = vmul.f32 %v556_v41, %v482_v11  ;;  %v561_v45 = vmul.f32 %v556_v41, %v2069_v3 }
  0xbe   : > { %v458_v39 = vstv %s2749_s3  ;;  %s2751_s17 = sceil.f32 %s1833_s21  ;;  %p2752_p12 = scmp.lt.s32.totalorder %s1833_s21, 0  ;;  %v567_v49 = vmul.f32 %v1336_v42, %v482_v11  ;;  %v568_v50 = vmul.f32 %v1336_v42, %v2069_v3  ;;  %v581_v7 = vrot.slane %v502_v57, 7 }
  0xbf   : > { %s2753_s27 = sld [smem:[#allocation16_spill]]  ;;  %s2754_s30 = sadd.s32 4, %s1827_s11  ;;  %v533_v51 = vadd.f32 %v531_v38, %v528_v32  ;;  %v541_v52 = vadd.f32 %v539_v43, %v536_v34  ;;  %v563_v54 = vrot.slane %v561_v45, 1  ;;  %vm459_vm6 = vcmp.eq.s32.totalorder %v458_v39, 1 }
  0xc0   : > { %s2814_s17 = smov (!%p2752_p12, %s2751_s17), %s2750_s9  ;;  %s2156_s1 = sld [smem:[#allocation2 + %s2754_s30]]  ;;  %v570_v58 = vrot.slane %v568_v50, 1  ;;  %v576_v3 = vstv %s1337_s7  ;;  %v460_v63 = vsel %vm459_vm6, %v456_v56, 0.0  ;;  %v359_v14 = vrot.slane %v350_v9, 5 }
  0xc1   : > { %s825_s14 = sadd.s32 1, %s2084_s23  ;;  %s2162_s13 = scvt.f32.s32 %s2814_s17  ;;  %v535_v59 = vmul.f32 %v534_v46, %v533_v51  ;;  %v543_v62 = vmul.f32 %v542_v48, %v541_v52  ;;  %v565_v0 = vadd.f32 %v563_v54, %v560_v44  ;;  %vm577_vm8 = vcmp.eq.s32.totalorder %v576_v3, 1 }
  0xc2   : > { %s2165_s21 = sld [smem:[#allocation2 + %s2084_s23]]  ;;  %v572_v2 = vadd.f32 %v570_v58, %v567_v49  ;;  %s2181_s28 = smul.f32 -0.57478017, %s1858_s6  ;;  %v589_v13 = vsel %vm361_vm5, %v460_v63, %v581_v7  ;;  %v366_v18 = vsel %vm365_vm10, %v364_v61, %v359_v14 }
  0xc3   : > { %s2171_s16 = sld [smem:[#allocation2 + %s825_s14]]  ;;  %p596_p4 = scmp.gt.s32.totalorder %s2162_s13, 0  ;;  %v544_v5 = vadd.f32 %v543_v62, %v535_v59  ;;  %v566_v6 = vmul.f32 %v565_v0, %v534_v46 }
  0xc4   : > { %p1339_p1 = scmp.lt.s32.totalorder %s2162_s13, 1  ;;  %s608_s20 = sadd.f32 1.0, %s2138_s15  ;;  %v573_v8 = vmul.f32 %v572_v2, %v542_v48 }
  0xc5   : > { %s2169_s11 = smul.f32 -0.57478017, %s2753_s27  ;;  %v548_v47 = vsel %vm547_vm7, %v544_v5, 0.0  ;;  %s828_s10 = sadd.s32 2, %s2084_s23 }
  0xc6   : > { %s597_s19 = scalar_select %p596_p4, %s2162_s13, 0  ;;  %v574_v11 = vadd.f32 %v573_v8, %v566_v6  ;;  %v584_v12 = vrot.slane %v548_v47, 6 }
  0xc7   : > { %s609_s24 = smul.f32 -0.57478017, %s608_s20  ;;  %s612_s0 = sadd.f32 1.0, %s2156_s1 }
  0xc8   : > { %s2816_s19 = smov (!%p1339_p1, %s597_s19), 1  ;;  %v578_v15 = vsel %vm577_vm8, %v574_v11, 0.0  ;;  %v590_v17 = vsel %vm363_vm9, %v589_v13, %v584_v12  ;;  %s2755_s15 = sld [smem:[#allocation7_spill]] }
  0xc9   : > { %s613_s6 = smul.f32 -0.57478017, %s612_s0  ;;  %s614_s25 = ssub.f32 %s609_s24, %s2169_s11  ;;  %v587_v16 = vrot.slane %v578_v15, 5 }
  0xca   : > { %s2680_s22 = sshll.u32 %s2816_s19, 8  ;;  %p1483_p6 = scmp.lt.s32.totalorder %s2165_s21, 0 }
  0xcb   : > { %s615_s8 = ssub.f32 %s613_s6, %s2181_s28  ;;  %s616_s2 = smax.f32 %s2713_s29, %s614_s25  ;;  %v591_v19 = vsel %vm365_vm10, %v590_v17, %v587_v16 }
  0xcc   : > { %s2207_s12 = smul.f32 0.5, %s616_s2  ;;  %s2217_s27 = sld [smem:[#allocation2 + %s828_s10]] }
  0xcd   : > { %s617_s3 = smax.f32 %s2713_s29, %s615_s8 }
  0xce   : > { %s620_s7 = smul.f32 0.5, %s617_s3  ;;  %1043 = vst.msk [vmem:[%s2755_s15] sm:$0xf] %vm1042_vm11, %v366_v18  ;;  %1044 = vst.msk [vmem:[%s2755_s15 + $0x4] sm:$0xf] %vm1042_vm11, %v591_v19 }
  0xcf   : > { %s629_s17 = smul.f32 0.0, %s2207_s12 }
  0xd0   : > { %s625_s30 = smul.f32 0.0, %s620_s7  ;;  %s729_s1 = sadd.f32 %s620_s7, %s2181_s28 }
  0xd1   : > { %s627_s14 = smul.f32 0.5, %s620_s7  ;;  %s630_s13 = sadd.f32 %s629_s17, %s2169_s11 }
  0xd2   : > { %s626_s20 = sadd.f32 %s625_s30, %s2181_s28  ;;  %s2678_s24 = smul.f32 0.5, %s2207_s12 }
  0xd3   : > { %s2226_s0 = sadd.f32 %s729_s1, %s627_s14 }
  0xd4   : > { %s628_s25 = sadd.f32 %s627_s14, %s626_s20  ;;  %s2767_s20 = sshll.u32 %s2816_s19, 8 }
  0xd5   : > { %s2234_s8 = sadd.f32 %s2678_s24, %s630_s13  ;;  %p731_p9 = scmp.ge.f32.partialorder %s2226_s0, -1.0 }
  0xd6   : > { %p633_p11 = scmp.ge.f32.partialorder %s628_s25, -1.0  ;;  %p634_p8 = scmp.le.f32.partialorder %s628_s25, 16.0 }
  0xd7   : > { %p637_p7 = scmp.ge.f32.partialorder %s2234_s8, -1.0  ;;  %p640_p3 = scmp.le.f32.partialorder %s2234_s8, 16.0 }
  0xd8   : > { %p2239_p2 = pnand %p634_p8, %p633_p11  ;;  %s643_s2 = smax.f32 %s2698_s5, %s628_s25 }
  0xd9   : > { %s644_s3 = smin.f32 %s2700_s4, %s643_s2  ;;  %s645_s7 = smax.f32 %s2698_s5, %s2234_s8 }
  0xda   : > { %p636_p10 = pneg %p2239_p2  ;;  %s646_s17 = smin.f32 %s2700_s4, %s645_s7 }
  0xdb   : > { %p1463_p13 = scmp.lt.s32.totalorder %s644_s3, 0  ;;  %s1464_s30 = sceil.f32 %s644_s3 }
  0xdc   : > { %p638_p0 = pnand %p637_p7, %p636_p10  ;;  %s1465_s1 = sfloor.f32 %s644_s3 }
  0xdd   : > { %s2818_s30 = smov (!%p1463_p13, %s1464_s30), %s1465_s1  ;;  %p1468_p12 = scmp.lt.s32.totalorder %s646_s17, 0 }
  0xde   : > { %p639_p5 = pneg %p638_p0  ;;  %s1467_s14 = scvt.f32.s32 %s2818_s30 }
  0xdf   : > { %s1469_s13 = sceil.f32 %s646_s17  ;;  %s1470_s25 = sfloor.f32 %s646_s17 }
  0xe0   : > { %p2257_p4 = pnand %p640_p3, %p639_p5  ;;  %s2820_s13 = smov (!%p1468_p12, %s1469_s13), %s1470_s25 }
  0xe1   : > { %s649_s2 = scvt.s32.f32 %s1467_s14  ;;  %s1345_s7 = sshll.u32 %s1467_s14, 4 }
  0xe2   : > { %s2261_s1 = scvt.f32.s32 %s2820_s13  ;;  %s2265_s30 = sadd.s32 %s1345_s7, %s2680_s22 }
  0xe3   : > { %s2267_s6 = ssub.f32 %s644_s3, %s649_s2  ;;  %p732_p1 = scmp.le.f32.partialorder %s2226_s0, 16.0 }
  0xe4   : > { %s651_s25 = scvt.s32.f32 %s2261_s1  ;;  %s657_s10 = sadd.s32 %s2261_s1, %s2265_s30 }
  0xe5   : > { %s658_s14 = scalar_lea.vmem %s2719_s26, %s657_s10  ;;  %p2279_p11 = pnand %p732_p1, %p731_p9  ;;  %v679_v44 = vstv %s2267_s6 }
  0xe6   : > { %s652_s13 = ssub.f32 %s646_s17, %s651_s25  ;;  %s2759_s7 = smul.f32 0.5, %s2207_s12  ;;  %v659_v20 = vld [vmem:[%s658_s14] sm:$0x3]  ;;  %v1348_v21 = vld [vmem:[%s658_s14 + $0x10] sm:$0x3] }
  0xe7   : > { %s1349_s3 = scalar_select %p2257_p4, 0, 1 }
  0xe8   : > { %s654_s2 = ssub.f32 1.0, %s652_s13  ;;  %p734_p8 = pneg %p2279_p11  ;;  %v2324_v22 = vstv %s652_s13 }
  0xe9   : > { %s2760_s22 = sadd.f32 %s2207_s12, %s2169_s11  ;;  %s739_s9 = smax.f32 %s2698_s5, %s2226_s0  ;;  %v666_v23 = vmul.f32 %v2324_v22, %v659_v20  ;;  %v674_v24 = vmul.f32 %v1348_v21, %v2324_v22  ;;  %v2373_v37 = vstv %s1349_s3 }
  0xea   : > { %p2301_p9 = pnand %p734_p8, %p637_p7  ;;  %s2306_s10 = smin.f32 %s2700_s4, %s739_s9  ;;  %v663_v25 = vstv %s654_s2  ;;  %vm684_vm12 = vcmp.eq.s32.totalorder %v2373_v37, 1 }
  0xeb   : > { %s2292_s18 = sadd.f32 %s2760_s22, %s2759_s7  ;;  %v664_v26 = vmul.f32 %v663_v25, %v659_v20  ;;  %v668_v27 = vrot.slane %v666_v23, 1  ;;  %v673_v28 = vmul.f32 %v1348_v21, %v663_v25  ;;  %v676_v29 = vrot.slane %v674_v24, 1 }
  0xec   : > { %p736_p5 = pneg %p2301_p9  ;;  %s2766_s24 = ssub.f32 1.0, %s2267_s6 }
  0xed   : > { %p689_p13 = scmp.ge.f32.partialorder %s2292_s18, -1.0  ;;  %p692_p0 = scmp.le.f32.partialorder %s2292_s18, 16.0  ;;  %v670_v33 = vadd.f32 %v668_v27, %v664_v26  ;;  %v678_v34 = vadd.f32 %v676_v29, %v673_v28 }
  0xee   : > { %s695_s11 = smax.f32 %s2698_s5, %s2292_s18  ;;  %v671_v43 = vstv %s2766_s24 }
  0xef   : > { %p2319_p7 = pnand %p689_p13, %p636_p10  ;;  %s696_s22 = smin.f32 %s2700_s4, %s695_s11  ;;  %v672_v46 = vmul.f32 %v671_v43, %v670_v33  ;;  %v680_v48 = vmul.f32 %v679_v44, %v678_v34 }
  0xf0   : > { %p1473_p12 = scmp.lt.s32.totalorder %s696_s22, 0  ;;  %s1474_s0 = sceil.f32 %s696_s22 }
  0xf1   : > { %p691_p1 = pneg %p2319_p7  ;;  %s1475_s28 = sfloor.f32 %s696_s22  ;;  %v681_v59 = vadd.f32 %v680_v48, %v672_v46 }
  0xf2   : > { %s2822_s0 = smov (!%p1473_p12, %s1474_s0), %s1475_s28  ;;  %p2341_p10 = pnand %p736_p5, %p640_p3 }
  0xf3   : > { %p2332_p2 = pnand %p692_p0, %p691_p1  ;;  %s2345_s14 = scvt.f32.s32 %s2822_s0  ;;  %v685_v16 = vsel %vm684_vm12, %v681_v59, 0.0 }
  0xf4   : > { %p1478_p7 = scmp.lt.s32.totalorder %s2306_s10, 0  ;;  %s1479_s11 = sceil.f32 %s2306_s10 }
  0xf5   : > { %s1353_s13 = scalar_select %p2332_p2, 0, 1 }
  0xf6   : > { %s698_s8 = scvt.s32.f32 %s2345_s14  ;;  %s701_s7 = sadd.s32 %s2345_s14, %s2265_s30 }
  0xf7   : > { %s702_s2 = scalar_lea.vmem %s2719_s26, %s701_s7  ;;  %s1480_s0 = sfloor.f32 %s2306_s10  ;;  %v725_v45 = vstv %s1353_s13 }
  0xf8   : > { %s699_s12 = ssub.f32 %s696_s22, %s698_s8  ;;  %v703_v30 = vld [vmem:[%s702_s2] sm:$0x3]  ;;  %v1352_v31 = vld [vmem:[%s702_s2 + $0x10] sm:$0x3]  ;;  %s2824_s11 = smov (!%p1478_p7, %s1479_s11), %s1480_s0  ;;  %vm726_vm13 = vcmp.eq.s32.totalorder %v725_v45, 1 }
  0xf9   : > { %p2365_p3 = pnand %p734_p8, %p689_p13  ;;  %s1482_s22 = scvt.f32.s32 %s2824_s11 }
  0xfa   : > { %s700_s28 = ssub.f32 1.0, %s699_s12  ;;  %v709_v32 = vstv %s699_s12  ;;  %s835_s8 = sadd.s32 4, %s2084_s23 }
  0xfb   : > { %v710_v35 = vmul.f32 %v709_v32, %v703_v30  ;;  %v717_v36 = vmul.f32 %v1352_v31, %v709_v32  ;;  %s1358_s29 = scalar_select %p2341_p10, 0, 1 }
  0xfc   : > { %v707_v39 = vstv %s700_s28  ;;  %s742_s7 = scvt.s32.f32 %s1482_s22  ;;  %s1354_s9 = sshll.u32 %s1482_s22, 4 }
  0xfd   : > { %v708_v40 = vmul.f32 %v707_v39, %v703_v30  ;;  %v712_v41 = vrot.slane %v710_v35, 1  ;;  %v716_v42 = vmul.f32 %v1352_v31, %v707_v39  ;;  %v719_v38 = vrot.slane %v717_v36, 1  ;;  %s746_s3 = sadd.s32 %s1354_s9, %s2767_s20  ;;  %p776_p4 = pneg %p2365_p3 }
  0xfe   : > { %s2388_s2 = ssub.f32 %s2306_s10, %s742_s7  ;;  %s747_s11 = sadd.s32 %s2261_s1, %s746_s3  ;;  %v771_v60 = vstv %s1358_s29 }
  0xff   : > { %v714_v49 = vadd.f32 %v712_v41, %v708_v40  ;;  %v721_v50 = vadd.f32 %v719_v38, %v716_v42  ;;  %s748_s13 = scalar_lea.vmem %s2719_s26, %s747_s11  ;;  %p2397_p11 = pnand %p776_p4, %p692_p0  ;;  %vm772_vm14 = vcmp.eq.s32.totalorder %v771_v60, 1 }
 0x100   : > { %s744_s10 = ssub.f32 1.0, %s2388_s2  ;;  %v749_v53 = vld [vmem:[%s748_s13] sm:$0x3]  ;;  %v1357_v54 = vld [vmem:[%s748_s13 + $0x10] sm:$0x3]  ;;  %s779_s1 = sadd.s32 %s2345_s14, %s746_s3  ;;  %v767_v0 = vstv %s2388_s2 }
 0x101   : > { %v715_v51 = vmul.f32 %v714_v49, %v671_v43  ;;  %v722_v52 = vmul.f32 %v721_v50, %v679_v44  ;;  %v753_v55 = vmul.f32 %v749_v53, %v663_v25  ;;  %v754_v56 = vmul.f32 %v749_v53, %v2324_v22  ;;  %s780_s0 = scalar_lea.vmem %s2719_s26, %s779_s1  ;;  %s2769_s28 = sadd.s32 3, %s2084_s23 }
 0x102   : > { %v761_v57 = vmul.f32 %v1357_v54, %v663_v25  ;;  %v762_v58 = vmul.f32 %v1357_v54, %v2324_v22  ;;  %s2410_s30 = sld [smem:[#allocation2 + %s2769_s28]]  ;;  %v781_v1 = vld [vmem:[%s780_s0] sm:$0x3]  ;;  %v1361_v2 = vld [vmem:[%s780_s0 + $0x10] sm:$0x3]  ;;  %s2770_s22 = sfloor.f32 %s2165_s21  ;;  %v759_v63 = vstv %s744_s10 }
 0x103   : > { %v723_v62 = vadd.f32 %v722_v52, %v715_v51  ;;  %s1362_s14 = scalar_select %p2397_p11, 0, 1  ;;  %v756_v3 = vrot.slane %v754_v56, 1  ;;  %v785_v5 = vmul.f32 %v781_v1, %v707_v39  ;;  %v786_v6 = vmul.f32 %v781_v1, %v709_v32 }
 0x104   : > { %v764_v4 = vrot.slane %v762_v58, 1  ;;  %s2771_s7 = sceil.f32 %s2165_s21  ;;  %v792_v8 = vmul.f32 %v1361_v2, %v707_v39  ;;  %v793_v9 = vmul.f32 %v1361_v2, %v709_v32  ;;  %s2424_s9 = sld [smem:[#allocation2 + %s835_s8]] }
 0x105   : > { %s2826_s7 = smov (!%p1483_p6, %s2771_s7), %s2770_s22  ;;  %v727_v7 = vsel %vm726_vm13, %v723_v62, 0.0  ;;  %v758_v10 = vadd.f32 %v756_v3, %v753_v55  ;;  %v788_v11 = vrot.slane %v786_v6, 1  ;;  %s2430_s21 = smul.f32 -0.57478017, %s2171_s16  ;;  %v801_v18 = vstv %s1362_s14 }
 0x106   : > { %v766_v47 = vadd.f32 %v764_v4, %v761_v57  ;;  %s1487_s24 = scvt.f32.s32 %s2826_s7  ;;  %v795_v12 = vrot.slane %v793_v9, 1  ;;  %v806_v61 = vrot.slane %v727_v7, 7  ;;  %s2433_s23 = smul.f32 -0.57478017, %s2217_s27  ;;  %vm802_vm15 = vcmp.eq.s32.totalorder %v801_v18, 1 }
 0x107   : > { %v760_v13 = vmul.f32 %v759_v63, %v758_v10  ;;  %v790_v15 = vadd.f32 %v788_v11, %v785_v5  ;;  %s2772_s2 = smov 1.0  }
 0x108   : > { %v768_v14 = vmul.f32 %v767_v0, %v766_v47  ;;  %p821_p6 = scmp.gt.s32.totalorder %s1487_s24, 0  ;;  %v797_v17 = vadd.f32 %v795_v12, %v792_v8  ;;  %p1364_p8 = scmp.lt.s32.totalorder %s1487_s24, 1  ;;  %v814_v23 = vsel %vm361_vm5, %v685_v16, %v806_v61 }
 0x109   : > { %s833_s25 = sadd.f32 1.0, %s2410_s30  ;;  %v791_v20 = vmul.f32 %v790_v15, %v759_v63 }
 0x10a   : > { %v769_v19 = vadd.f32 %v768_v14, %v760_v13  ;;  %s822_s16 = scalar_select %p821_p6, %s1487_s24, 0  ;;  %v798_v21 = vmul.f32 %v797_v17, %v767_v0 }
 0x10b   : > { %s834_s8 = smul.f32 -0.57478017, %s833_s25  ;;  %s837_s29 = sadd.f32 1.0, %s2424_s9 }
 0x10c   : > { %v773_v22 = vsel %vm772_vm14, %v769_v19, 0.0  ;;  %v799_v24 = vadd.f32 %v798_v21, %v791_v20  ;;  %s2828_s16 = smov (!%p1364_p8, %s822_s16), 1 }
 0x10d   : > { %v809_v25 = vrot.slane %v773_v22, 6  ;;  %s838_s27 = smul.f32 -0.57478017, %s837_s29  ;;  %s839_s20 = ssub.f32 %s834_s8, %s2430_s21 }
 0x10e   : > { %v803_v26 = vsel %vm802_vm15, %v799_v24, 0.0  ;;  %s1369_s22 = sshll.u32 %s2828_s16, 8 }
 0x10f   : > { %v815_v27 = vsel %vm363_vm9, %v814_v23, %v809_v25  ;;  %s840_s3 = ssub.f32 %s838_s27, %s2433_s23  ;;  %s841_s11 = smax.f32 %s2772_s2, %s839_s20  ;;  %v812_v28 = vrot.slane %v803_v26, 5 }
 0x110   : > { %s2447_s6 = smul.f32 0.5, %s841_s11 }
 0x111   : > { %s842_s17 = smax.f32 %s2772_s2, %s840_s3  ;;  %v816_v29 = vsel %vm365_vm10, %v815_v27, %v812_v28 }
 0x112   : > { %s845_s13 = smul.f32 0.5, %s842_s17  ;;  %s912_s10 = sadd.f32 %s2447_s6, %s2430_s21  ;;  %1045 = vst.msk [vmem:[%s2755_s15 + $0x8] sm:$0xf] %vm1042_vm11, %v816_v29 }
 0x113   : > { %s854_s19 = smul.f32 0.0, %s2447_s6 }
 0x114   : > { %s850_s1 = smul.f32 0.0, %s845_s13  ;;  %s954_s18 = sadd.f32 %s845_s13, %s2433_s23 }
 0x115   : > { %s852_s12 = smul.f32 0.5, %s845_s13  ;;  %s855_s0 = sadd.f32 %s854_s19, %s2430_s21 }
 0x116   : > { %s851_s28 = sadd.f32 %s850_s1, %s2433_s23  ;;  %s856_s30 = smul.f32 0.5, %s2447_s6 }
 0x117   : > { %s2460_s14 = sadd.f32 %s954_s18, %s852_s12 }
 0x118   : > { %s853_s7 = sadd.f32 %s852_s12, %s851_s28 }
 0x119   : > { %s2465_s9 = sadd.f32 %s856_s30, %s855_s0  ;;  %p956_p9 = scmp.ge.f32.partialorder %s2460_s14, -1.0 }
 0x11a   : > { %p858_p13 = scmp.ge.f32.partialorder %s853_s7, -1.0  ;;  %p859_p0 = scmp.le.f32.partialorder %s853_s7, 16.0 }
 0x11b   : > { %p862_p5 = scmp.ge.f32.partialorder %s2465_s9, -1.0  ;;  %p865_p12 = scmp.le.f32.partialorder %s2465_s9, 16.0 }
 0x11c   : > { %p2470_p1 = pnand %p859_p0, %p858_p13  ;;  %s868_s23 = smax.f32 %s2698_s5, %s853_s7 }
 0x11d   : > { %s869_s25 = smin.f32 %s2700_s4, %s868_s23  ;;  %s870_s8 = smax.f32 %s2698_s5, %s2465_s9 }
 0x11e   : > { %p861_p2 = pneg %p2470_p1  ;;  %s871_s29 = smin.f32 %s2700_s4, %s870_s8 }
 0x11f   : > { %p1488_p10 = scmp.lt.s32.totalorder %s869_s25, 0  ;;  %s1489_s27 = sceil.f32 %s869_s25 }
 0x120   : > { %p863_p7 = pnand %p862_p5, %p861_p2  ;;  %s1490_s20 = sfloor.f32 %s869_s25 }
 0x121   : > { %s2830_s27 = smov (!%p1488_p10, %s1489_s27), %s1490_s20  ;;  %p1493_p4 = scmp.lt.s32.totalorder %s871_s29, 0 }
 0x122   : > { %p864_p3 = pneg %p863_p7  ;;  %s1492_s3 = scvt.f32.s32 %s2830_s27 }
 0x123   : > { %s1494_s2 = sceil.f32 %s871_s29  ;;  %s1495_s17 = sfloor.f32 %s871_s29 }
 0x124   : > { %p2488_p11 = pnand %p865_p12, %p864_p3  ;;  %s2832_s2 = smov (!%p1493_p4, %s1494_s2), %s1495_s17 }
 0x125   : > { %s874_s13 = scvt.s32.f32 %s1492_s3  ;;  %s1370_s19 = sshll.u32 %s1492_s3, 4 }
 0x126   : > { %s2492_s1 = scvt.f32.s32 %s2832_s2  ;;  %s2496_s18 = sadd.s32 %s1370_s19, %s1369_s22 }
 0x127   : > { %s2498_s12 = ssub.f32 %s869_s25, %s874_s13  ;;  %p957_p6 = scmp.le.f32.partialorder %s2460_s14, 16.0 }
 0x128   : > { %s876_s0 = scvt.s32.f32 %s2492_s1  ;;  %s882_s28 = sadd.s32 %s2492_s1, %s2496_s18 }
 0x129   : > { %s878_s7 = ssub.f32 1.0, %s2498_s12  ;;  %s883_s27 = scalar_lea.vmem %s2719_s26, %s882_s28  ;;  %v904_v54 = vstv %s2498_s12 }
 0x12a   : > { %s877_s20 = ssub.f32 %s871_s29, %s876_s0  ;;  %p2510_p8 = pnand %p957_p6, %p956_p9  ;;  %v884_v30 = vld [vmem:[%s883_s27] sm:$0x3]  ;;  %v1373_v31 = vld [vmem:[%s883_s27 + $0x10] sm:$0x3] }
 0x12b   : > { %s1374_s25 = scalar_select %p2488_p11, 0, 1  ;;  %v896_v53 = vstv %s878_s7 }
 0x12c   : > { %s879_s2 = ssub.f32 1.0, %s877_s20  ;;  %p959_p13 = pneg %p2510_p8  ;;  %v2555_v32 = vstv %s877_s20 }
 0x12d   : > { %s2523_s17 = sadd.f32 %s912_s10, %s856_s30  ;;  %s964_s29 = smax.f32 %s2698_s5, %s2460_s14  ;;  %v891_v33 = vmul.f32 %v2555_v32, %v884_v30  ;;  %v899_v34 = vmul.f32 %v1373_v31, %v2555_v32  ;;  %v908_v62 = vstv %s1374_s25 }
 0x12e   : > { %p2532_p9 = pnand %p959_p13, %p862_p5  ;;  %s2537_s19 = smin.f32 %s2700_s4, %s964_s29  ;;  %v888_v35 = vstv %s879_s2  ;;  %vm909_vm1 = vcmp.eq.s32.totalorder %v908_v62, 1 }
 0x12f   : > { %p914_p0 = scmp.ge.f32.partialorder %s2523_s17, -1.0  ;;  %p917_p10 = scmp.le.f32.partialorder %s2523_s17, 16.0  ;;  %v889_v36 = vmul.f32 %v888_v35, %v884_v30  ;;  %v893_v37 = vrot.slane %v891_v33, 1  ;;  %v898_v39 = vmul.f32 %v1373_v31, %v888_v35  ;;  %v901_v40 = vrot.slane %v899_v34, 1 }
 0x130   : > { %s920_s21 = smax.f32 %s2698_s5, %s2523_s17  ;;  %p961_p7 = pneg %p2532_p9 }
 0x131   : > { %p2550_p5 = pnand %p914_p0, %p861_p2  ;;  %s921_s10 = smin.f32 %s2700_s4, %s920_s21  ;;  %v895_v43 = vadd.f32 %v893_v37, %v889_v36  ;;  %v903_v44 = vadd.f32 %v901_v40, %v898_v39 }
 0x132   : > { %p1498_p3 = scmp.lt.s32.totalorder %s921_s10, 0  ;;  %s1499_s5 = sceil.f32 %s921_s10 }
 0x133   : > { %p916_p4 = pneg %p2550_p5  ;;  %s1500_s30 = sfloor.f32 %s921_s10  ;;  %v897_v56 = vmul.f32 %v896_v53, %v895_v43  ;;  %v905_v57 = vmul.f32 %v904_v54, %v903_v44 }
 0x134   : > { %s2834_s5 = smov (!%p1498_p3, %s1499_s5), %s1500_s30  ;;  %p2572_p2 = pnand %p961_p7, %p865_p12 }
 0x135   : > { %p2563_p1 = pnand %p917_p10, %p916_p4  ;;  %s2576_s24 = scvt.f32.s32 %s2834_s5  ;;  %v906_v63 = vadd.f32 %v905_v57, %v897_v56 }
 0x136   : > { %p1503_p6 = scmp.lt.s32.totalorder %s2537_s19, 0  ;;  %s1504_s20 = sceil.f32 %s2537_s19 }
 0x137   : > { %s1378_s0 = scalar_select %p2563_p1, 0, 1  ;;  %v910_v26 = vsel %vm909_vm1, %v906_v63, 0.0 }
 0x138   : > { %s923_s9 = scvt.s32.f32 %s2576_s24  ;;  %s926_s28 = sadd.s32 %s2576_s24, %s2496_s18 }
 0x139   : > { %s927_s27 = scalar_lea.vmem %s2719_s26, %s926_s28  ;;  %s1505_s29 = sfloor.f32 %s2537_s19  ;;  %v950_v55 = vstv %s1378_s0 }
 0x13a   : > { %s924_s2 = ssub.f32 %s921_s10, %s923_s9  ;;  %v928_v41 = vld [vmem:[%s927_s27] sm:$0x3]  ;;  %v1377_v42 = vld [vmem:[%s927_s27 + $0x10] sm:$0x3]  ;;  %s2836_s20 = smov (!%p1503_p6, %s1504_s20), %s1505_s29  ;;  %vm951_vm0 = vcmp.eq.s32.totalorder %v950_v55, 1 }
 0x13b   : > { %p2596_p12 = pnand %p959_p13, %p914_p0  ;;  %s1507_s21 = scvt.f32.s32 %s2836_s20 }
 0x13c   : > { %s925_s13 = ssub.f32 1.0, %s924_s2  ;;  %v934_v38 = vstv %s924_s2 }
 0x13d   : > { %v935_v45 = vmul.f32 %v934_v38, %v928_v41  ;;  %v942_v46 = vmul.f32 %v1377_v42, %v934_v38  ;;  %s1383_s6 = scalar_select %p2572_p2, 0, 1 }
 0x13e   : > { %v932_v48 = vstv %s925_s13  ;;  %s967_s3 = scvt.s32.f32 %s1507_s21  ;;  %s1379_s10 = sshll.u32 %s1507_s21, 4 }
 0x13f   : > { %v933_v49 = vmul.f32 %v932_v48, %v928_v41  ;;  %v937_v50 = vrot.slane %v935_v45, 1  ;;  %v941_v51 = vmul.f32 %v1377_v42, %v932_v48  ;;  %v944_v52 = vrot.slane %v942_v46, 1  ;;  %s971_s5 = sadd.s32 %s1379_s10, %s1369_s22  ;;  %p1001_p8 = pneg %p2596_p12 }
 0x140   : > { %s2613_s30 = ssub.f32 %s2537_s19, %s967_s3  ;;  %s972_s9 = sadd.s32 %s2492_s1, %s971_s5  ;;  %v996_v19 = vstv %s1383_s6 }
 0x141   : > { %v939_v58 = vadd.f32 %v937_v50, %v933_v49  ;;  %v946_v59 = vadd.f32 %v944_v52, %v941_v51  ;;  %s973_s14 = scalar_lea.vmem %s2719_s26, %s972_s9  ;;  %p2624_p13 = pnand %p1001_p8, %p917_p10  ;;  %vm997_vm2 = vcmp.eq.s32.totalorder %v996_v19, 1 }
 0x142   : > { %s969_s22 = ssub.f32 1.0, %s2613_s30  ;;  %v974_v2 = vld [vmem:[%s973_s14] sm:$0x3]  ;;  %v1382_v3 = vld [vmem:[%s973_s14 + $0x10] sm:$0x3]  ;;  %s1004_s1 = sadd.s32 %s2576_s24, %s971_s5  ;;  %v992_v9 = vstv %s2613_s30 }
 0x143   : > { %v940_v0 = vmul.f32 %v939_v58, %v896_v53  ;;  %v947_v1 = vmul.f32 %v946_v59, %v904_v54  ;;  %v978_v4 = vmul.f32 %v974_v2, %v888_v35  ;;  %v979_v5 = vmul.f32 %v974_v2, %v2555_v32  ;;  %s1005_s17 = scalar_lea.vmem %s2719_s26, %s1004_s1 }
 0x144   : > { %v986_v6 = vmul.f32 %v1382_v3, %v888_v35  ;;  %v987_v7 = vmul.f32 %v1382_v3, %v2555_v32  ;;  %v1006_v10 = vld [vmem:[%s1005_s17] sm:$0x3]  ;;  %v1386_v47 = vld [vmem:[%s1005_s17 + $0x10] sm:$0x3]  ;;  %v984_v15 = vstv %s969_s22  ;;  %s1387_s19 = scalar_select %p2624_p13, 0, 1 }
 0x145   : > { %v948_v8 = vadd.f32 %v947_v1, %v940_v0  ;;  %v981_v60 = vrot.slane %v979_v5, 1  ;;  %v1010_v12 = vmul.f32 %v1006_v10, %v932_v48  ;;  %v1011_v13 = vmul.f32 %v1006_v10, %v934_v38 }
 0x146   : > { %v989_v11 = vrot.slane %v987_v7, 1  ;;  %v1017_v61 = vmul.f32 %v1386_v47, %v932_v48  ;;  %v1018_v16 = vmul.f32 %v1386_v47, %v934_v38  ;;  %v1026_v28 = vstv %s1387_s19 }
 0x147   : > { %v952_v14 = vsel %vm951_vm0, %v948_v8, 0.0  ;;  %v983_v17 = vadd.f32 %v981_v60, %v978_v4  ;;  %v1013_v20 = vrot.slane %v1011_v13, 1  ;;  %vm1027_vm3 = vcmp.eq.s32.totalorder %v1026_v28, 1 }
 0x148   : > { %v991_v18 = vadd.f32 %v989_v11, %v986_v6  ;;  %v1020_v21 = vrot.slane %v1018_v16, 1  ;;  %v1031_v25 = vrot.slane %v952_v14, 7 }
 0x149   : > { %v985_v22 = vmul.f32 %v984_v15, %v983_v17  ;;  %v1015_v24 = vadd.f32 %v1013_v20, %v1010_v12 }
 0x14a   : > { %v993_v23 = vmul.f32 %v992_v9, %v991_v18  ;;  %v1022_v27 = vadd.f32 %v1020_v21, %v1017_v61  ;;  %v1039_v33 = vsel %vm361_vm5, %v910_v26, %v1031_v25 }
 0x14b   : > { %v1016_v30 = vmul.f32 %v1015_v24, %v984_v15 }
 0x14c   : > { %v994_v29 = vadd.f32 %v993_v23, %v985_v22  ;;  %v1023_v31 = vmul.f32 %v1022_v27, %v992_v9 }
 0x14e   : > { %v998_v32 = vsel %vm997_vm2, %v994_v29, 0.0  ;;  %v1024_v34 = vadd.f32 %v1023_v31, %v1016_v30 }
 0x14f   : > { %v1034_v35 = vrot.slane %v998_v32, 6 }
 0x150   : > { %v1028_v36 = vsel %vm1027_vm3, %v1024_v34, 0.0 }
 0x151   : > { %v1040_v37 = vsel %vm363_vm9, %v1039_v33, %v1034_v35  ;;  %v1037_v39 = vrot.slane %v1028_v36, 5 }
 0x153   : > { %v1041_v40 = vsel %vm365_vm10, %v1040_v37, %v1037_v39 }
 0x154   : > { %1046 = vst.msk [vmem:[%s2755_s15 + $0xc] sm:$0xf] %vm1042_vm11, %v1041_v40 }
 0x155 PF: > { %s2782_s26 = sld [smem:[#allocation5_spill]] }
 0x15b   : > { %s13_s9 = sadd.s32 1, %s2782_s26  }
 0x15c   : > { %p10_p11 = scmp.ge.s32.totalorder %s13_s9, 4  }
 0x15e   :  { %12 = sbr.rel (!%p10_p11) target bundleno = 5 (0x5), region = 92 }
 0x163   :  { %1069 = vsyncpa [#allocation3], 1 }
 0x164   :  { %1071 = vsyncpa [#allocation3 + $0x1], 1 }

// kernel: tpu_custom_call.1
= control target key start
LH: loop header
LB: loop body
LE: loop exit
PB: predicated region body
PF: predicated region fallthrough
CT: control target
= control target key end

     0   :  { %s2651_s0 = inlined_call_operand.vmem [shape: f32[8,5], index: 0, kind: input, shape index: {}]   ;;  %s2652_s1 = inlined_call_operand.vmem [shape: f32[536,4], index: 1, kind: input, shape index: {}]   ;;  %s2653_s2 = inlined_call_operand.vmem [shape: f32[8,4,4], index: 2, kind: output, shape index: {}]  }
   0x1   :  { %2681 = sst [smem:[#allocation17_spill]] %s2651_s0 }
   0x2   :  { %2682 = sst [smem:[#allocation18_spill]] %s2652_s1 }
   0x3   :  { %2683 = sst [smem:[#allocation19_spill]] %s2653_s2 }
   0x4   :  { %7 = vsyncpa [#allocation3], 0  ;;  %s1576_s9 = smov 0  }
   0x5 LB: > { %2684 = sst [smem:[#allocation5_spill]] %s1555_s9  ;;  %s1582_s10 = sadd.s32 4294967295, %s1555_s9   ;;  %s1555_s9 = sphi %s1576_s9, %s13_s9  }
   0x6   : > { %p1281_p0 = scmp.ge.s32.totalorder %s1555_s9, 1  ;;  %p86_p1 = scmp.lt.s32.totalorder %s1555_s9, 3 }
   0x7   : > { %s2685_s0 = sld [smem:[#allocation17_spill]]  ;;  %p1516_p3 = scmp.eq.s32.totalorder %s1582_s10, 0 }
   0x8   : > { %p1589_p2 = pnand %p1281_p0, %p86_p1 }
   0xa   : > { %p1512_p4 = pneg %p1589_p2 }
   0xc   : > { %p1513_p5 = pnand %p1516_p3, %p1512_p4 }
   0xd   : > { %s99_s13 = sshll.u32 %s2685_s0, 4  ;;  %s100_s13 = int_to_ptr.vmem [resolvable:$true] %s99_s13 }
   0xe   : > { %s1530_s15 = scalar_lea.vmem %s100_s13, 128  ;;  %p1532_p7 = pneg %p1513_p5 }
   0xf   : > { %p1531_p6 = scmp.ne.s32.totalorder %s100_s13, %s1530_s15  ;;  %p1538_p10 = scmp.lt.s32.totalorder %s100_s13, %s100_s13 }
  0x10   : > { %p1539_p11 = scmp.lt.s32.totalorder %s1530_s15, %s1530_s15 }
  0x11   : > { %p1533_p8 = pnand %p1532_p7, %p1531_p6 }
  0x12   : > { %p1540_p12 = por %p1539_p11, %p1538_p10 }
  0x13   : > { %p1534_p9 = pneg %p1533_p8 }
  0x15   : > { %p1541_p13 = pnand %p1540_p12, %p1534_p9 }
  0x17   : > { %1544 = shalt.err (!%p1541_p13)
}
  0x18   : > { %s1557_s16 = smov [#allocation2]   ;;  %115 = sbr.rel (%p1589_p2) target bundleno = 341 (0x155), region = 28 }
  0x19   : > { %1515 = dma.vmem_to_smem (!%p1513_p5), %s100_s13, 128, %s1557_s16, [#allocation3]  }
  0x1d   : > { %1550 = dma.done.wait (%p1516_p3), [#allocation3], 128  }
  0x1e   : > { %1552 = vsyncadd (%p1516_p3), [#allocation3], 4294967168 }
  0x1f   : > { %121 = sfence }
  0x20   : > { %s1285_s17 = sshll.u32 %s1582_s10, 2  ;;  %s1606_s18 = sshll.u32 %s1582_s10, 9  ;;  %vm361_vm5 = vcmask 1040384   ;;  %vm363_vm9 = vcmask 1041408   ;;  %vm365_vm10 = vcmask 1042432   ;;  %vm1042_vm11 = vcmask 27648  }
  0x21   : > { %2687 = sst [smem:[#allocation6_spill]] %s1606_s18  ;;  %p134_p0 = scmp.lt.s32.totalorder %s1285_s17, 7 }
  0x22   : > { %s141_s19 = sld [smem:[#allocation2 + %s1606_s18]]  ;;  %s147_s20 = sadd.s32 1, %s1606_s18 }
  0x23   : > { %s150_s21 = sadd.s32 2, %s1606_s18  ;;  %s2784_s17 = smov (!%p134_p0, %s1285_s17), 7 }
  0x24   : > { %s148_s22 = sld [smem:[#allocation2 + %s147_s20]]  ;;  %s153_s23 = sadd.s32 3, %s1606_s18 }
  0x25   : > { %s151_s24 = sld [smem:[#allocation2 + %s150_s21]]  ;;  %s157_s28 = sadd.s32 4, %s1606_s18 }
  0x26   : > { %s154_s25 = sld [smem:[#allocation2 + %s153_s23]]  ;;  %s1286_s29 = sshll.u32 %s2784_s17, 2 }
  0x27   : > { %s158_s30 = sld [smem:[#allocation2 + %s157_s28]]  ;;  %s1626_s15 = sadd.s32 128, %s1606_s18 }
  0x28   : > { %p1408_p1 = scmp.lt.s32.totalorder %s141_s19, 0  ;;  %s1409_s26 = sceil.f32 %s141_s19 }
  0x29   : > { %s1410_s27 = sfloor.f32 %s141_s19  ;;  %s2688_s2 = sld [smem:[#allocation19_spill]] }
  0x2a   : > { %s2786_s26 = smov (!%p1408_p1, %s1409_s26), %s1410_s27  ;;  %s1613_s4 = smul.f32 -0.57478017, %s148_s22 }
  0x2b   : > { %s1412_s3 = scvt.f32.s32 %s2786_s26  ;;  %s1615_s5 = smul.f32 -0.57478017, %s151_s24 }
  0x2c   : > { %s155_s6 = sadd.f32 1.0, %s154_s25  ;;  %s2654_s17 = smov 1.0  }
  0x2d   : > { %p143_p2 = scmp.gt.s32.totalorder %s1412_s3, 0  ;;  %p1289_p3 = scmp.lt.s32.totalorder %s1412_s3, 1 }
  0x2e   : > { %s156_s11 = smul.f32 -0.57478017, %s155_s6  ;;  %s159_s12 = sadd.f32 1.0, %s158_s30 }
  0x2f   : > { %s1620_s10 = scalar_lea.vmem %s2688_s2, %s1286_s29  ;;  %s2788_s3 = smov (!%p143_p2, %s1412_s3), 0 }
  0x30   : > { %2689 = sst [smem:[#allocation7_spill]] %s1620_s10  ;;  %s2790_s3 = smov (!%p1289_p3, %s2788_s3), 1 }
  0x31   : > { %s160_s13 = smul.f32 -0.57478017, %s159_s12  ;;  %s161_s14 = ssub.f32 %s156_s11, %s1613_s4 }
  0x32   : > { %s1633_s21 = sld [smem:[#allocation2 + %s1626_s15]]  ;;  %s375_s23 = sadd.s32 1, %s1626_s15 }
  0x33   : > { %s162_s16 = ssub.f32 %s160_s13, %s1615_s5  ;;  %s163_s19 = smax.f32 %s2654_s17, %s161_s14 }
  0x34   : > { %s1630_s20 = smul.f32 0.5, %s163_s19  ;;  %s1640_s27 = sld [smem:[#allocation2 + %s375_s23]] }
  0x35   : > { %s164_s22 = smax.f32 %s2654_s17, %s162_s16  ;;  %s2660_s12 = sshll.u32 %s2790_s3, 8 }
  0x36   : > { %s167_s24 = smul.f32 0.5, %s164_s22  ;;  %s2656_s22 = smov 15.0  }
  0x37   : > { %s176_s26 = smul.f32 0.0, %s1630_s20  ;;  %s2696_s1 = sld [smem:[#allocation18_spill]] }
  0x38   : > { %s172_s28 = smul.f32 0.0, %s167_s24  ;;  %s276_s29 = sadd.f32 %s167_s24, %s1615_s5 }
  0x39   : > { %s174_s30 = smul.f32 0.5, %s167_s24  ;;  %s177_s6 = sadd.f32 %s176_s26, %s1613_s4 }
  0x3a   : > { %s173_s7 = sadd.f32 %s172_s28, %s1615_s5  ;;  %s178_s8 = smul.f32 0.5, %s1630_s20 }
  0x3b   : > { %s1646_s11 = sadd.f32 %s276_s29, %s174_s30  ;;  %p1433_p4 = scmp.lt.s32.totalorder %s1633_s21, 0 }
  0x3c   : > { %s175_s13 = sadd.f32 %s174_s30, %s173_s7  ;;  %s2658_s5 = smov 0.0  }
  0x3d   : > { %s1651_s14 = sadd.f32 %s178_s8, %s177_s6  ;;  %p278_p1 = scmp.ge.f32.partialorder %s1646_s11, -1.0 }
  0x3e   : > { %p180_p5 = scmp.ge.f32.partialorder %s175_s13, -1.0  ;;  %p181_p6 = scmp.le.f32.partialorder %s175_s13, 16.0 }
  0x3f   : > { %p184_p7 = scmp.ge.f32.partialorder %s1651_s14, -1.0  ;;  %p187_p8 = scmp.le.f32.partialorder %s1651_s14, 16.0 }
  0x40   : > { %p1656_p9 = pnand %p181_p6, %p180_p5  ;;  %s190_s19 = smax.f32 %s2658_s5, %s175_s13 }
  0x41   : > { %s191_s23 = smin.f32 %s2656_s22, %s190_s19  ;;  %s192_s24 = smax.f32 %s2658_s5, %s1651_s14 }
  0x42   : > { %p183_p10 = pneg %p1656_p9  ;;  %s1667_s26 = smin.f32 %s2656_s22, %s192_s24 }
  0x43   : > { %p1413_p11 = scmp.lt.s32.totalorder %s191_s23, 0  ;;  %s1414_s28 = sceil.f32 %s191_s23 }
  0x44   : > { %p1674_p12 = pnand %p184_p7, %p183_p10  ;;  %s1415_s30 = sfloor.f32 %s191_s23 }
  0x45   : > { %s2792_s28 = smov (!%p1413_p11, %s1414_s28), %s1415_s30  ;;  %p1418_p0 = scmp.lt.s32.totalorder %s1667_s26, 0 }
  0x46   : > { %p186_p13 = pneg %p1674_p12  ;;  %s1417_s6 = scvt.f32.s32 %s2792_s28 }
  0x47   : > { %s1419_s7 = sceil.f32 %s1667_s26  ;;  %s1420_s13 = sfloor.f32 %s1667_s26 }
  0x48   : > { %s2794_s7 = smov (!%p1418_p0, %s1419_s7), %s1420_s13  ;;  %s196_s19 = scvt.s32.f32 %s1417_s6 }
  0x49   : > { %s1295_s24 = sshll.u32 %s1417_s6, 4  ;;  %p1686_p2 = pnand %p187_p8, %p186_p13 }
  0x4a   : > { %s1690_s28 = scvt.f32.s32 %s2794_s7  ;;  %s1692_s29 = ssub.f32 %s191_s23, %s196_s19 }
  0x4b   : > { %s2692_s17 = scalar_select %p1686_p2, 1, 0 }
  0x4c   : > { %2694 = sst [smem:[#allocation9_spill]] %s1692_s29  ;;  %p279_p3 = scmp.le.f32.partialorder %s1646_s11, 16.0 }
  0x4d   : > { %2693 = sst [smem:[#allocation8_spill]] %s2692_s17  ;;  %s1697_s30 = sadd.s32 %s1295_s24, %s2660_s12 }
  0x4e   : > { %s198_s13 = scvt.s32.f32 %s1690_s28  ;;  %s204_s22 = sadd.s32 %s1690_s28, %s1697_s30 }
  0x4f   : > { %p1706_p5 = pnand %p279_p3, %p278_p1  ;;  %s1715_s24 = scalar_lea.vmem %s2696_s1, %s204_s22 }
  0x50   : > { %s2697_s6 = sadd.f32 %s1630_s20, %s1613_s4  ;;  %s2698_s5 = smov 0.0   ;;  %v206_v3 = vld [vmem:[%s1715_s24] sm:$0x3]  ;;  %v1298_v4 = vld [vmem:[%s1715_s24 + $0x10] sm:$0x3] }
  0x51   : > { %p281_p6 = pneg %p1706_p5  ;;  %s286_s0 = smax.f32 %s2698_s5, %s1646_s11 }
  0x52   : > { %s1724_s12 = sadd.f32 %s2697_s6, %s178_s8  ;;  %s2700_s4 = smov 15.0  }
  0x53   : > { %s1729_s2 = ssub.f32 %s1667_s26, %s198_s13  ;;  %p1736_p11 = pnand %p281_p6, %p184_p7 }
  0x54   : > { %p236_p12 = scmp.ge.f32.partialorder %s1724_s12, -1.0  ;;  %s1742_s20 = smin.f32 %s2700_s4, %s286_s0 }
  0x55   : > { %p239_p13 = scmp.le.f32.partialorder %s1724_s12, 16.0  ;;  %s242_s8 = smax.f32 %s2698_s5, %s1724_s12  ;;  %v212_v5 = vstv %s1729_s2 }
  0x56   : > { %p237_p0 = pnand %p236_p12, %p183_p10  ;;  %s243_s11 = smin.f32 %s2700_s4, %s242_s8  ;;  %v213_v10 = vmul.f32 %v212_v5, %v206_v3  ;;  %v221_v11 = vmul.f32 %v1298_v4, %v212_v5 }
  0x57   : > { %p1423_p7 = scmp.lt.s32.totalorder %s243_s11, 0  ;;  %s1424_s26 = sceil.f32 %s243_s11 }
  0x58   : > { %p238_p1 = pneg %p237_p0  ;;  %s1425_s0 = sfloor.f32 %s243_s11  ;;  %v215_v18 = vrot.slane %v213_v10, 1  ;;  %v223_v20 = vrot.slane %v221_v11, 1 }
  0x59   : > { %s2796_s26 = smov (!%p1423_p7, %s1424_s26), %s1425_s0  ;;  %p283_p9 = pneg %p1736_p11 }
  0x5a   : > { %p1755_p3 = pnand %p239_p13, %p238_p1  ;;  %s1761_s16 = scvt.f32.s32 %s2796_s26 }
  0x5b   : > { %p1428_p10 = scmp.lt.s32.totalorder %s1742_s20, 0  ;;  %s1429_s0 = sceil.f32 %s1742_s20 }
  0x5c   : > { %s2701_s6 = scalar_select %p1755_p3, 1, 0 }
  0x5d   : > { %s245_s19 = scvt.s32.f32 %s1761_s16  ;;  %s248_s8 = sadd.s32 %s1761_s16, %s1697_s30 }
  0x5e   : > { %2702 = sst [smem:[#allocation10_spill]] %s2701_s6  ;;  %p1773_p0 = pnand %p283_p9, %p187_p8 }
  0x5f   : > { %s1430_s26 = sfloor.f32 %s1742_s20  ;;  %s1781_s13 = scalar_lea.vmem %s2696_s1, %s248_s8 }
  0x60   : > { %s2703_s22 = scalar_select %p1773_p0, 1, 0  ;;  %v250_v0 = vld [vmem:[%s1781_s13] sm:$0x3]  ;;  %v1302_v1 = vld [vmem:[%s1781_s13 + $0x10] sm:$0x3] }
  0x61   : > { %s2798_s0 = smov (!%p1428_p10, %s1429_s0), %s1430_s26  ;;  %p322_p11 = pnand %p281_p6, %p236_p12 }
  0x62   : > { %2704 = sst [smem:[#allocation11_spill]] %s2703_s22  ;;  %s1432_s30 = scvt.f32.s32 %s2798_s0 }
  0x63   : > { %s1788_s14 = ssub.f32 %s243_s11, %s245_s19  ;;  %s2705_s9 = sshll.u32 %s2790_s3, 8 }
  0x64   : > { %s289_s26 = scvt.s32.f32 %s1432_s30  ;;  %s1304_s10 = sshll.u32 %s1432_s30, 4 }
  0x65   : > { %s1794_s23 = sadd.s32 %s1304_s10, %s2705_s9  ;;  %p323_p8 = pneg %p322_p11  ;;  %v1903_v2 = vstv %s1788_s14 }
  0x66   : > { %s1797_s25 = ssub.f32 %s1742_s20, %s289_s26  ;;  %s294_s11 = sadd.s32 %s1690_s28, %s1794_s23  ;;  %v257_v6 = vmul.f32 %v1903_v2, %v250_v0  ;;  %v264_v7 = vmul.f32 %v1302_v1, %v1903_v2 }
  0x67   : > { %p1804_p5 = pnand %p323_p8, %p239_p13  ;;  %s1811_s3 = scalar_lea.vmem %s2696_s1, %s294_s11 }
  0x68   : > { %2706 = sst [smem:[#allocation12_spill]] %s1797_s25  ;;  %s1435_s10 = sfloor.f32 %s1633_s21  ;;  %v259_v13 = vrot.slane %v257_v6, 1  ;;  %v266_v15 = vrot.slane %v264_v7, 1 }
  0x69   : > { %s2707_s8 = scalar_select %p1804_p5, 1, 0 }
  0x6a   : > { %2709 = sst [smem:[#allocation14_spill]] %s1811_s3  ;;  %s326_s20 = sadd.s32 %s1761_s16, %s1794_s23 }
  0x6b   : > { %2708 = sst [smem:[#allocation13_spill]] %s2707_s8  ;;  %s2710_s28 = sceil.f32 %s1633_s21 }
  0x6c   : > { %s2800_s28 = smov (!%p1433_p4, %s2710_s28), %s1435_s10  ;;  %s378_s12 = sadd.s32 2, %s1626_s15 }
  0x6d   : > { %s381_s9 = sadd.s32 3, %s1626_s15  ;;  %s1437_s19 = scvt.f32.s32 %s2800_s28 }
  0x6e   : > { %s379_s22 = sld [smem:[#allocation2 + %s378_s12]]  ;;  %s385_s6 = sadd.s32 4, %s1626_s15 }
  0x6f   : > { %s382_s17 = sld [smem:[#allocation2 + %s381_s9]]  ;;  %p371_p6 = scmp.gt.s32.totalorder %s1437_s19, 0 }
  0x70   : > { %p1314_p12 = scmp.lt.s32.totalorder %s1437_s19, 1  ;;  %s386_s7 = sld [smem:[#allocation2 + %s385_s6]] }
  0x71   : > { %s1827_s11 = sadd.s32 256, %s1606_s18  ;;  %s2802_s19 = smov (!%p371_p6, %s1437_s19), 0 }
  0x72   : > { %s1830_s16 = smul.f32 -0.57478017, %s1640_s27  ;;  %s1833_s21 = sld [smem:[#allocation2 + %s1827_s11]] }
  0x73   : > { %s2804_s19 = smov (!%p1314_p12, %s2802_s19), 1  ;;  %s600_s23 = sadd.s32 1, %s1827_s11 }
  0x74   : > { %s1841_s10 = scalar_lea.vmem %s2696_s1, %s326_s20  ;;  %s380_s28 = smul.f32 -0.57478017, %s379_s22 }
  0x75   : > { %s383_s15 = sadd.f32 1.0, %s382_s17  ;;  %s603_s18 = sadd.s32 2, %s1827_s11 }
  0x76   : > { %2711 = sst [smem:[#allocation15_spill]] %s1841_s10  ;;  %s2713_s29 = smov 1.0  }
  0x77   : > { %s384_s12 = smul.f32 -0.57478017, %s383_s15  ;;  %s387_s27 = sadd.f32 1.0, %s386_s7 }
  0x78   : > { %s1844_s26 = sld [smem:[#allocation2 + %s600_s23]] }
  0x79   : > { %s388_s30 = smul.f32 -0.57478017, %s387_s27  ;;  %s389_s8 = ssub.f32 %s384_s12, %s1830_s16 }
  0x7a   : > { %s1858_s6 = sld [smem:[#allocation2 + %s603_s18]] }
  0x7b   : > { %s390_s17 = ssub.f32 %s388_s30, %s380_s28  ;;  %s391_s3 = smax.f32 %s2713_s29, %s389_s8 }
  0x7c   : > { %s1850_s0 = smul.f32 0.5, %s391_s3 }
  0x7d   : > { %s392_s22 = smax.f32 %s2713_s29, %s390_s17 }
  0x7e   : > { %2712 = sst [smem:[#allocation16_spill]] %s1844_s26  ;;  %s395_s7 = smul.f32 0.5, %s392_s22 }
  0x7f   : > { %s404_s23 = smul.f32 0.0, %s1850_s0  ;;  %s2719_s26 = sld [smem:[#allocation18_spill]] }
  0x80   : > { %s400_s30 = smul.f32 0.0, %s395_s7  ;;  %s504_s12 = sadd.f32 %s395_s7, %s380_s28 }
  0x81   : > { %s402_s8 = smul.f32 0.5, %s395_s7  ;;  %s405_s27 = sadd.f32 %s404_s23, %s1830_s16 }
  0x82   : > { %s401_s3 = sadd.f32 %s400_s30, %s380_s28  ;;  %s406_s25 = smul.f32 0.5, %s1850_s0 }
  0x83   : > { %s1862_s9 = sadd.f32 %s504_s12, %s402_s8 }
  0x84   : > { %s403_s10 = sadd.f32 %s402_s8, %s401_s3 }
  0x85   : > { %s1868_s17 = sadd.f32 %s406_s25, %s405_s27  ;;  %p506_p13 = scmp.ge.f32.partialorder %s1862_s9, -1.0 }
  0x86   : > { %p408_p7 = scmp.ge.f32.partialorder %s403_s10, -1.0  ;;  %p409_p1 = scmp.le.f32.partialorder %s403_s10, 16.0 }
  0x87   : > { %p412_p9 = scmp.ge.f32.partialorder %s1868_s17, -1.0  ;;  %p2676_p10 = scmp.le.f32.partialorder %s1868_s17, 16.0 }
  0x88   : > { %p1873_p11 = pnand %p409_p1, %p408_p7  ;;  %s418_s28 = smax.f32 %s2698_s5, %s403_s10 }
  0x89   : > { %s419_s22 = smin.f32 %s2700_s4, %s418_s28  ;;  %s420_s7 = smax.f32 %s2698_s5, %s1868_s17 }
  0x8a   : > { %p411_p8 = pneg %p1873_p11  ;;  %s1884_s23 = smin.f32 %s2700_s4, %s420_s7 }
  0x8b   : > { %p1438_p6 = scmp.lt.s32.totalorder %s419_s22, 0  ;;  %s1439_s30 = sceil.f32 %s419_s22 }
  0x8c   : > { %p413_p12 = pnand %p412_p9, %p411_p8  ;;  %s1440_s10 = sfloor.f32 %s419_s22 }
  0x8d   : > { %s2806_s30 = smov (!%p1438_p6, %s1439_s30), %s1440_s10  ;;  %p1443_p1 = scmp.lt.s32.totalorder %s1884_s23, 0 }
  0x8e   : > { %p414_p7 = pneg %p413_p12  ;;  %s1442_s12 = scvt.f32.s32 %s2806_s30 }
  0x8f   : > { %s1444_s8 = sceil.f32 %s1884_s23  ;;  %s1445_s3 = sfloor.f32 %s1884_s23 }
  0x90   : > { %p1895_p4 = pnand %p2676_p10, %p414_p7  ;;  %s2808_s8 = smov (!%p1443_p1, %s1444_s8), %s1445_s3 }
  0x91   : > { %s424_s28 = scvt.s32.f32 %s1442_s12  ;;  %s1320_s7 = sshll.u32 %s1442_s12, 4 }
  0x92   : > { %s1905_s10 = scvt.f32.s32 %s2808_s8  ;;  %s2716_s30 = sshll.u32 %s2804_s19, 8 }
  0x93   : > { %s1909_s1 = sadd.s32 %s1320_s7, %s2716_s30  ;;  %s1916_s13 = ssub.f32 %s419_s22, %s424_s28 }
  0x94   : > { %p507_p6 = scmp.le.f32.partialorder %s1862_s9, 16.0  ;;  %s2717_s12 = ssub.f32 1.0, %s1788_s14 }
  0x95   : > { %s426_s8 = scvt.s32.f32 %s1905_s10  ;;  %s2718_s3 = sld [smem:[#allocation14_spill]] }
  0x96   : > { %v1921_v8 = vstv %s2717_s12  ;;  %s432_s7 = sadd.s32 %s1905_s10, %s1909_s1  ;;  %s428_s24 = ssub.f32 1.0, %s1916_s13 }
  0x97   : > { %s1930_s15 = scalar_lea.vmem %s2719_s26, %s432_s7  ;;  %s2720_s22 = ssub.f32 1.0, %s1729_s2  ;;  %v255_v12 = vmul.f32 %v1921_v8, %v250_v0  ;;  %v263_v14 = vmul.f32 %v1302_v1, %v1921_v8 }
  0x98   : > { %s1935_s14 = ssub.f32 %s1884_s23, %s426_s8  ;;  %p1939_p12 = pnand %p507_p6, %p506_p13  ;;  %v434_v37 = vld [vmem:[%s1930_s15] sm:$0x3]  ;;  %v1323_v43 = vld [vmem:[%s1930_s15 + $0x10] sm:$0x3] }
  0x99   : > { %v210_v9 = vstv %s2720_s22  ;;  %s2722_s23 = sld [smem:[#allocation9_spill]]  ;;  %s514_s7 = smax.f32 %s2698_s5, %s1862_s9  ;;  %v261_v21 = vadd.f32 %v259_v13, %v255_v12  ;;  %v268_v22 = vadd.f32 %v266_v15, %v263_v14 }
  0x9a   : > { %s429_s20 = ssub.f32 1.0, %s1935_s14  ;;  %p2675_p7 = pneg %p1939_p12  ;;  %v211_v17 = vmul.f32 %v210_v9, %v206_v3  ;;  %v220_v19 = vmul.f32 %v1298_v4, %v210_v9  ;;  %v2006_v38 = vstv %s1935_s14 }
  0x9b   : > { %v296_v16 = vld [vmem:[%s2718_s3] sm:$0x3]  ;;  %s2723_s12 = sadd.f32 %s1850_s0, %s1830_s16  ;;  %v1307_v23 = vld [vmem:[%s2718_s3 + $0x10] sm:$0x3]  ;;  %v441_v49 = vmul.f32 %v2006_v38, %v434_v37  ;;  %v449_v53 = vmul.f32 %v1323_v43, %v2006_v38 }
  0x9c   : > { %p1965_p13 = pnand %p2675_p7, %p412_p9  ;;  %s2725_s16 = sld [smem:[#allocation15_spill]]  ;;  %v301_v26 = vmul.f32 %v296_v16, %v212_v5  ;;  %v309_v27 = vmul.f32 %v1307_v23, %v212_v5  ;;  %v217_v28 = vadd.f32 %v215_v18, %v211_v17  ;;  %v225_v29 = vadd.f32 %v223_v20, %v220_v19 }
  0x9d   : > { %s1956_s8 = sadd.f32 %s2723_s12, %s406_s25  ;;  %s1970_s25 = smin.f32 %s2700_s4, %s514_s7  ;;  %v300_v34 = vmul.f32 %v296_v16, %v210_v9  ;;  %v308_v39 = vmul.f32 %v1307_v23, %v210_v9  ;;  %v2045_v52 = vstv %s429_s20  ;;  %v451_v5 = vrot.slane %v449_v53, 1 }
  0x9e   : > { %p511_p9 = pneg %p1965_p13  ;;  %v303_v35 = vrot.slane %v301_v26, 1  ;;  %v311_v40 = vrot.slane %v309_v27, 1  ;;  %s2734_s22 = sld [smem:[#allocation12_spill]]  ;;  %v439_v1 = vmul.f32 %v2045_v52, %v434_v37  ;;  %v448_v4 = vmul.f32 %v1323_v43, %v2045_v52 }
  0x9f   : > { %p2677_p1 = scmp.ge.f32.partialorder %s1956_s8, -1.0  ;;  %p467_p6 = scmp.le.f32.partialorder %s1956_s8, 16.0  ;;  %v226_v25 = vstv %s2722_s23  ;;  %v446_v17 = vstv %s428_s24  ;;  %v454_v18 = vstv %s1916_s13 }
  0xa0   : > { %s2726_s9 = ssub.f32 1.0, %s2722_s23  ;;  %s470_s0 = smax.f32 %s2698_s5, %s1956_s8  ;;  %v269_v31 = vmul.f32 %v268_v22, %v226_v25  ;;  %v227_v45 = vmul.f32 %v226_v25, %v225_v29  ;;  %v305_v48 = vadd.f32 %v303_v35, %v300_v34  ;;  %v313_v54 = vadd.f32 %v311_v40, %v308_v39 }
  0xa1   : > { %p1987_p7 = pnand %p2677_p1, %p411_p8  ;;  %s1992_s12 = smin.f32 %s2700_s4, %s470_s0 }
  0xa2   : > { %v218_v24 = vstv %s2726_s9  ;;  %p1448_p10 = scmp.lt.s32.totalorder %s1992_s12, 0  ;;  %s1449_s18 = sceil.f32 %s1992_s12  ;;  %v328_v32 = vld [vmem:[%s2725_s16] sm:$0x3]  ;;  %v1311_v33 = vld [vmem:[%s2725_s16 + $0x10] sm:$0x3] }
  0xa3   : > { %v262_v30 = vmul.f32 %v261_v21, %v218_v24  ;;  %p466_p11 = pneg %p1987_p7  ;;  %s1450_s23 = sfloor.f32 %s1992_s12  ;;  %v333_v41 = vmul.f32 %v328_v32, %v1903_v2  ;;  %v340_v42 = vmul.f32 %v1311_v33, %v1903_v2  ;;  %v219_v44 = vmul.f32 %v218_v24, %v217_v28 }
  0xa4   : > { %s2810_s18 = smov (!%p1448_p10, %s1449_s18), %s1450_s23  ;;  %p2732_p1 = scmp.le.f32.partialorder %s1868_s17, 16.0  ;;  %v332_v51 = vmul.f32 %v328_v32, %v1921_v8  ;;  %v339_v56 = vmul.f32 %v1311_v33, %v1921_v8  ;;  %v314_v62 = vstv %s2734_s22  ;;  %v443_v2 = vrot.slane %v441_v49, 1 }
  0xa5   : > { %s2729_s7 = scalar_select %p1755_p3, 0, 1  ;;  %v270_v46 = vadd.f32 %v269_v31, %v262_v30  ;;  %v335_v55 = vrot.slane %v333_v41, 1  ;;  %v342_v57 = vrot.slane %v340_v42, 1  ;;  %v2055_v60 = vadd.f32 %v227_v45, %v219_v44 }
  0xa6   : > { %p2010_p8 = pnand %p467_p6, %p466_p11  ;;  %p2019_p7 = pnand %p511_p9, %p2732_p1  ;;  %v315_v8 = vmul.f32 %v314_v62, %v313_v54  ;;  %v445_v20 = vadd.f32 %v443_v2, %v439_v1  ;;  %v453_v21 = vadd.f32 %v451_v5, %v448_v4 }
  0xa7   : > { %v272_v36 = vstv %s2729_s7  ;;  %s2026_s3 = scvt.f32.s32 %s2810_s18  ;;  %p1453_p3 = scmp.lt.s32.totalorder %s1970_s25, 0  ;;  %v337_v9 = vadd.f32 %v335_v55, %v332_v51  ;;  %v344_v10 = vadd.f32 %v342_v57, %v339_v56 }
  0xa8   : > { %s2735_s30 = scalar_select %p1686_p2, 0, 1  ;;  %vm273_vm0 = vcmp.eq.s32.totalorder %v272_v36, 1  ;;  %v447_v36 = vmul.f32 %v446_v17, %v445_v20  ;;  %v455_v37 = vmul.f32 %v454_v18, %v453_v21 }
  0xa9   : > { %s473_s15 = scvt.s32.f32 %s2026_s3  ;;  %s476_s18 = sadd.s32 %s2026_s3, %s1909_s1  ;;  %v2058_v61 = vsel %vm273_vm0, %v270_v46, 0.0  ;;  %v345_v27 = vmul.f32 %v344_v10, %v314_v62 }
  0xaa   : > { %v2034_v47 = vstv %s2735_s30  ;;  %s2736_s23 = ssub.f32 1.0, %s2734_s22  ;;  %s477_s2 = scalar_lea.vmem %s2719_s26, %s476_s18  ;;  %v353_v26 = vrot.slane %v2058_v61, 7  ;;  %v456_v56 = vadd.f32 %v455_v37, %v447_v36 }
  0xab   : > { %s1454_s17 = sceil.f32 %s1970_s25  ;;  %s474_s1 = ssub.f32 %s1992_s12, %s473_s15  ;;  %v478_v58 = vld [vmem:[%s477_s2] sm:$0x3]  ;;  %v1327_v59 = vld [vmem:[%s477_s2 + $0x10] sm:$0x3]  ;;  %vm231_vm1 = vcmp.eq.s32.totalorder %v2034_v47, 1 }
  0xac   : > { %v306_v50 = vstv %s2736_s23  ;;  %s1455_s14 = sfloor.f32 %s1970_s25  ;;  %s2738_s20 = sld [smem:[#allocation6_spill]]  ;;  %v232_v4 = vsel %vm231_vm1, %v2055_v60, 0.0 }
  0xad   : > { %s2739_s18 = scalar_select %p1773_p0, 0, 1  ;;  %v307_v0 = vmul.f32 %v306_v50, %v305_v48  ;;  %v2069_v3 = vstv %s474_s1  ;;  %v338_v25 = vmul.f32 %v337_v9, %v306_v50  ;;  %v362_v60 = vsel %vm361_vm5, %v232_v4, %v353_v26 }
  0xae   : > { %s2812_s17 = smov (!%p1453_p3, %s1454_s17), %s1455_s14  ;;  %s475_s2 = ssub.f32 1.0, %s474_s1  ;;  %v485_v6 = vmul.f32 %v2069_v3, %v478_v58  ;;  %v492_v7 = vmul.f32 %v1327_v59, %v2069_v3 }
  0xaf   : > { %v2064_v63 = vstv %s2739_s18  ;;  %p2740_p2 = scmp.ge.f32.partialorder %s1956_s8, -1.0  ;;  %p2741_p10 = pneg %p1939_p12  ;;  %v316_v24 = vadd.f32 %v315_v8, %v307_v0  ;;  %v346_v55 = vadd.f32 %v345_v27, %v338_v25 }
  0xb0   : > { %s1457_s15 = scvt.f32.s32 %s2812_s17  ;;  %v482_v11 = vstv %s475_s2  ;;  %v487_v13 = vrot.slane %v485_v6, 1  ;;  %v494_v15 = vrot.slane %v492_v7, 1  ;;  %s2746_s1 = sshll.u32 %s2804_s19, 8  ;;  %vm319_vm2 = vcmp.eq.s32.totalorder %v2064_v63, 1 }
  0xb1   : > { %p2076_p13 = pnand %p2741_p10, %p2740_p2  ;;  %v483_v12 = vmul.f32 %v482_v11, %v478_v58  ;;  %v491_v14 = vmul.f32 %v1327_v59, %v482_v11  ;;  %s2748_s22 = sadd.s32 3, %s1827_s11  ;;  %v320_v1 = vsel %vm319_vm2, %v316_v24, 0.0 }
  0xb2   : > { %s2084_s23 = sadd.s32 384, %s2738_s20  ;;  %s517_s7 = scvt.s32.f32 %s1457_s15  ;;  %v356_v10 = vrot.slane %v320_v1, 6 }
  0xb3   : > { %s1333_s28 = scalar_select %p2019_p7, 0, 1  ;;  %v489_v22 = vadd.f32 %v487_v13, %v483_v12  ;;  %v496_v23 = vadd.f32 %v494_v15, %v491_v14 }
  0xb4   : > { %s1329_s9 = sshll.u32 %s1457_s15, 4  ;;  %p551_p0 = pneg %p2076_p13  ;;  %v364_v61 = vsel %vm363_vm9, %v362_v60, %v356_v10 }
  0xb5   : > { %s2744_s17 = scalar_select %p1804_p5, 0, 1  ;;  %v490_v28 = vmul.f32 %v489_v22, %v446_v17  ;;  %v497_v29 = vmul.f32 %v496_v23, %v454_v18  ;;  %v546_v53 = vstv %s1333_s28 }
  0xb6   : > { %s2745_s30 = scalar_select %p2010_p8, 0, 1  ;;  %vm547_vm7 = vcmp.eq.s32.totalorder %v546_v53, 1 }
  0xb7   : > { %v2091_v16 = vstv %s2744_s17  ;;  %s2101_s14 = sadd.s32 %s1329_s9, %s2746_s1  ;;  %s2107_s20 = ssub.f32 %s1970_s25, %s517_s7  ;;  %v498_v40 = vadd.f32 %v497_v29, %v490_v28 }
  0xb8   : > { %v500_v19 = vstv %s2745_s30  ;;  %s522_s13 = sadd.s32 %s1905_s10, %s2101_s14  ;;  %p2121_p5 = pnand %p551_p0, %p467_p6  ;;  %vm349_vm3 = vcmp.eq.s32.totalorder %v2091_v16, 1 }
  0xb9   : > { %s523_s0 = scalar_lea.vmem %s2719_s26, %s522_s13  ;;  %vm501_vm4 = vcmp.eq.s32.totalorder %v500_v19, 1  ;;  %s519_s10 = ssub.f32 1.0, %s2107_s20  ;;  %v542_v48 = vstv %s2107_s20  ;;  %v350_v9 = vsel %vm349_vm3, %v346_v55, 0.0 }
  0xba   : > { %v524_v30 = vld [vmem:[%s523_s0] sm:$0x3]  ;;  %v1332_v31 = vld [vmem:[%s523_s0 + $0x10] sm:$0x3]  ;;  %s554_s18 = sadd.s32 %s2026_s3, %s2101_s14  ;;  %s2138_s15 = sld [smem:[#allocation2 + %s2748_s22]]  ;;  %v502_v57 = vsel %vm501_vm4, %v498_v40, 0.0 }
  0xbb   : > { %v528_v32 = vmul.f32 %v524_v30, %v2045_v52  ;;  %v529_v33 = vmul.f32 %v524_v30, %v2006_v38  ;;  %v536_v34 = vmul.f32 %v1332_v31, %v2045_v52  ;;  %v537_v35 = vmul.f32 %v1332_v31, %v2006_v38  ;;  %s555_s12 = scalar_lea.vmem %s2719_s26, %s554_s18  ;;  %s2750_s9 = sfloor.f32 %s1833_s21 }
  0xbc   : > { %s2749_s3 = scalar_select %p1895_p4, 0, 1  ;;  %v556_v41 = vld [vmem:[%s555_s12] sm:$0x3]  ;;  %v1336_v42 = vld [vmem:[%s555_s12 + $0x10] sm:$0x3]  ;;  %v534_v46 = vstv %s519_s10 }
  0xbd   : > { %s1337_s7 = scalar_select %p2121_p5, 0, 1  ;;  %v531_v38 = vrot.slane %v529_v33, 1  ;;  %v539_v43 = vrot.slane %v537_v35, 1  ;;  %v560_v44 = vmul.f32 %v556_v41, %v482_v11  ;;  %v561_v45 = vmul.f32 %v556_v41, %v2069_v3 }
  0xbe   : > { %v458_v39 = vstv %s2749_s3  ;;  %s2751_s17 = sceil.f32 %s1833_s21  ;;  %p2752_p12 = scmp.lt.s32.totalorder %s1833_s21, 0  ;;  %v567_v49 = vmul.f32 %v1336_v42, %v482_v11  ;;  %v568_v50 = vmul.f32 %v1336_v42, %v2069_v3  ;;  %v581_v7 = vrot.slane %v502_v57, 7 }
  0xbf   : > { %s2753_s27 = sld [smem:[#allocation16_spill]]  ;;  %s2754_s30 = sadd.s32 4, %s1827_s11  ;;  %v533_v51 = vadd.f32 %v531_v38, %v528_v32  ;;  %v541_v52 = vadd.f32 %v539_v43, %v536_v34  ;;  %v563_v54 = vrot.slane %v561_v45, 1  ;;  %vm459_vm6 = vcmp.eq.s32.totalorder %v458_v39, 1 }
  0xc0   : > { %s2814_s17 = smov (!%p2752_p12, %s2751_s17), %s2750_s9  ;;  %s2156_s1 = sld [smem:[#allocation2 + %s2754_s30]]  ;;  %v570_v58 = vrot.slane %v568_v50, 1  ;;  %v576_v3 = vstv %s1337_s7  ;;  %v460_v63 = vsel %vm459_vm6, %v456_v56, 0.0  ;;  %v359_v14 = vrot.slane %v350_v9, 5 }
  0xc1   : > { %s825_s14 = sadd.s32 1, %s2084_s23  ;;  %s2162_s13 = scvt.f32.s32 %s2814_s17  ;;  %v535_v59 = vmul.f32 %v534_v46, %v533_v51  ;;  %v543_v62 = vmul.f32 %v542_v48, %v541_v52  ;;  %v565_v0 = vadd.f32 %v563_v54, %v560_v44  ;;  %vm577_vm8 = vcmp.eq.s32.totalorder %v576_v3, 1 }
  0xc2   : > { %s2165_s21 = sld [smem:[#allocation2 + %s2084_s23]]  ;;  %v572_v2 = vadd.f32 %v570_v58, %v567_v49  ;;  %s2181_s28 = smul.f32 -0.57478017, %s1858_s6  ;;  %v589_v13 = vsel %vm361_vm5, %v460_v63, %v581_v7  ;;  %v366_v18 = vsel %vm365_vm10, %v364_v61, %v359_v14 }
  0xc3   : > { %s2171_s16 = sld [smem:[#allocation2 + %s825_s14]]  ;;  %p596_p4 = scmp.gt.s32.totalorder %s2162_s13, 0  ;;  %v544_v5 = vadd.f32 %v543_v62, %v535_v59  ;;  %v566_v6 = vmul.f32 %v565_v0, %v534_v46 }
  0xc4   : > { %p1339_p1 = scmp.lt.s32.totalorder %s2162_s13, 1  ;;  %s608_s20 = sadd.f32 1.0, %s2138_s15  ;;  %v573_v8 = vmul.f32 %v572_v2, %v542_v48 }
  0xc5   : > { %s2169_s11 = smul.f32 -0.57478017, %s2753_s27  ;;  %v548_v47 = vsel %vm547_vm7, %v544_v5, 0.0  ;;  %s828_s10 = sadd.s32 2, %s2084_s23 }
  0xc6   : > { %s597_s19 = scalar_select %p596_p4, %s2162_s13, 0  ;;  %v574_v11 = vadd.f32 %v573_v8, %v566_v6  ;;  %v584_v12 = vrot.slane %v548_v47, 6 }
  0xc7   : > { %s609_s24 = smul.f32 -0.57478017, %s608_s20  ;;  %s612_s0 = sadd.f32 1.0, %s2156_s1 }
  0xc8   : > { %s2816_s19 = smov (!%p1339_p1, %s597_s19), 1  ;;  %v578_v15 = vsel %vm577_vm8, %v574_v11, 0.0  ;;  %v590_v17 = vsel %vm363_vm9, %v589_v13, %v584_v12  ;;  %s2755_s15 = sld [smem:[#allocation7_spill]] }
  0xc9   : > { %s613_s6 = smul.f32 -0.57478017, %s612_s0  ;;  %s614_s25 = ssub.f32 %s609_s24, %s2169_s11  ;;  %v587_v16 = vrot.slane %v578_v15, 5 }
  0xca   : > { %s2680_s22 = sshll.u32 %s2816_s19, 8  ;;  %p1483_p6 = scmp.lt.s32.totalorder %s2165_s21, 0 }
  0xcb   : > { %s615_s8 = ssub.f32 %s613_s6, %s2181_s28  ;;  %s616_s2 = smax.f32 %s2713_s29, %s614_s25  ;;  %v591_v19 = vsel %vm365_vm10, %v590_v17, %v587_v16 }
  0xcc   : > { %s2207_s12 = smul.f32 0.5, %s616_s2  ;;  %s2217_s27 = sld [smem:[#allocation2 + %s828_s10]] }
  0xcd   : > { %s617_s3 = smax.f32 %s2713_s29, %s615_s8 }
  0xce   : > { %s620_s7 = smul.f32 0.5, %s617_s3  ;;  %1043 = vst.msk [vmem:[%s2755_s15] sm:$0xf] %vm1042_vm11, %v366_v18  ;;  %1044 = vst.msk [vmem:[%s2755_s15 + $0x4] sm:$0xf] %vm1042_vm11, %v591_v19 }
  0xcf   : > { %s629_s17 = smul.f32 0.0, %s2207_s12 }
  0xd0   : > { %s625_s30 = smul.f32 0.0, %s620_s7  ;;  %s729_s1 = sadd.f32 %s620_s7, %s2181_s28 }
  0xd1   : > { %s627_s14 = smul.f32 0.5, %s620_s7  ;;  %s630_s13 = sadd.f32 %s629_s17, %s2169_s11 }
  0xd2   : > { %s626_s20 = sadd.f32 %s625_s30, %s2181_s28  ;;  %s2678_s24 = smul.f32 0.5, %s2207_s12 }
  0xd3   : > { %s2226_s0 = sadd.f32 %s729_s1, %s627_s14 }
  0xd4   : > { %s628_s25 = sadd.f32 %s627_s14, %s626_s20  ;;  %s2767_s20 = sshll.u32 %s2816_s19, 8 }
  0xd5   : > { %s2234_s8 = sadd.f32 %s2678_s24, %s630_s13  ;;  %p731_p9 = scmp.ge.f32.partialorder %s2226_s0, -1.0 }
  0xd6   : > { %p633_p11 = scmp.ge.f32.partialorder %s628_s25, -1.0  ;;  %p634_p8 = scmp.le.f32.partialorder %s628_s25, 16.0 }
  0xd7   : > { %p637_p7 = scmp.ge.f32.partialorder %s2234_s8, -1.0  ;;  %p640_p3 = scmp.le.f32.partialorder %s2234_s8, 16.0 }
  0xd8   : > { %p2239_p2 = pnand %p634_p8, %p633_p11  ;;  %s643_s2 = smax.f32 %s2698_s5, %s628_s25 }
  0xd9   : > { %s644_s3 = smin.f32 %s2700_s4, %s643_s2  ;;  %s645_s7 = smax.f32 %s2698_s5, %s2234_s8 }
  0xda   : > { %p636_p10 = pneg %p2239_p2  ;;  %s646_s17 = smin.f32 %s2700_s4, %s645_s7 }
  0xdb   : > { %p1463_p13 = scmp.lt.s32.totalorder %s644_s3, 0  ;;  %s1464_s30 = sceil.f32 %s644_s3 }
  0xdc   : > { %p638_p0 = pnand %p637_p7, %p636_p10  ;;  %s1465_s1 = sfloor.f32 %s644_s3 }
  0xdd   : > { %s2818_s30 = smov (!%p1463_p13, %s1464_s30), %s1465_s1  ;;  %p1468_p12 = scmp.lt.s32.totalorder %s646_s17, 0 }
  0xde   : > { %p639_p5 = pneg %p638_p0  ;;  %s1467_s14 = scvt.f32.s32 %s2818_s30 }
  0xdf   : > { %s1469_s13 = sceil.f32 %s646_s17  ;;  %s1470_s25 = sfloor.f32 %s646_s17 }
  0xe0   : > { %p2257_p4 = pnand %p640_p3, %p639_p5  ;;  %s2820_s13 = smov (!%p1468_p12, %s1469_s13), %s1470_s25 }
  0xe1   : > { %s649_s2 = scvt.s32.f32 %s1467_s14  ;;  %s1345_s7 = sshll.u32 %s1467_s14, 4 }
  0xe2   : > { %s2261_s1 = scvt.f32.s32 %s2820_s13  ;;  %s2265_s30 = sadd.s32 %s1345_s7, %s2680_s22 }
  0xe3   : > { %s2267_s6 = ssub.f32 %s644_s3, %s649_s2  ;;  %p732_p1 = scmp.le.f32.partialorder %s2226_s0, 16.0 }
  0xe4   : > { %s651_s25 = scvt.s32.f32 %s2261_s1  ;;  %s657_s10 = sadd.s32 %s2261_s1, %s2265_s30 }
  0xe5   : > { %s658_s14 = scalar_lea.vmem %s2719_s26, %s657_s10  ;;  %p2279_p11 = pnand %p732_p1, %p731_p9  ;;  %v679_v44 = vstv %s2267_s6 }
  0xe6   : > { %s652_s13 = ssub.f32 %s646_s17, %s651_s25  ;;  %s2759_s7 = smul.f32 0.5, %s2207_s12  ;;  %v659_v20 = vld [vmem:[%s658_s14] sm:$0x3]  ;;  %v1348_v21 = vld [vmem:[%s658_s14 + $0x10] sm:$0x3] }
  0xe7   : > { %s1349_s3 = scalar_select %p2257_p4, 0, 1 }
  0xe8   : > { %s654_s2 = ssub.f32 1.0, %s652_s13  ;;  %p734_p8 = pneg %p2279_p11  ;;  %v2324_v22 = vstv %s652_s13 }
  0xe9   : > { %s2760_s22 = sadd.f32 %s2207_s12, %s2169_s11  ;;  %s739_s9 = smax.f32 %s2698_s5, %s2226_s0  ;;  %v666_v23 = vmul.f32 %v2324_v22, %v659_v20  ;;  %v674_v24 = vmul.f32 %v1348_v21, %v2324_v22  ;;  %v2373_v37 = vstv %s1349_s3 }
  0xea   : > { %p2301_p9 = pnand %p734_p8, %p637_p7  ;;  %s2306_s10 = smin.f32 %s2700_s4, %s739_s9  ;;  %v663_v25 = vstv %s654_s2  ;;  %vm684_vm12 = vcmp.eq.s32.totalorder %v2373_v37, 1 }
  0xeb   : > { %s2292_s18 = sadd.f32 %s2760_s22, %s2759_s7  ;;  %v664_v26 = vmul.f32 %v663_v25, %v659_v20  ;;  %v668_v27 = vrot.slane %v666_v23, 1  ;;  %v673_v28 = vmul.f32 %v1348_v21, %v663_v25  ;;  %v676_v29 = vrot.slane %v674_v24, 1 }
  0xec   : > { %p736_p5 = pneg %p2301_p9  ;;  %s2766_s24 = ssub.f32 1.0, %s2267_s6 }
  0xed   : > { %p689_p13 = scmp.ge.f32.partialorder %s2292_s18, -1.0  ;;  %p692_p0 = scmp.le.f32.partialorder %s2292_s18, 16.0  ;;  %v670_v33 = vadd.f32 %v668_v27, %v664_v26  ;;  %v678_v34 = vadd.f32 %v676_v29, %v673_v28 }
  0xee   : > { %s695_s11 = smax.f32 %s2698_s5, %s2292_s18  ;;  %v671_v43 = vstv %s2766_s24 }
  0xef   : > { %p2319_p7 = pnand %p689_p13, %p636_p10  ;;  %s696_s22 = smin.f32 %s2700_s4, %s695_s11  ;;  %v672_v46 = vmul.f32 %v671_v43, %v670_v33  ;;  %v680_v48 = vmul.f32 %v679_v44, %v678_v34 }
  0xf0   : > { %p1473_p12 = scmp.lt.s32.totalorder %s696_s22, 0  ;;  %s1474_s0 = sceil.f32 %s696_s22 }
  0xf1   : > { %p691_p1 = pneg %p2319_p7  ;;  %s1475_s28 = sfloor.f32 %s696_s22  ;;  %v681_v59 = vadd.f32 %v680_v48, %v672_v46 }
  0xf2   : > { %s2822_s0 = smov (!%p1473_p12, %s1474_s0), %s1475_s28  ;;  %p2341_p10 = pnand %p736_p5, %p640_p3 }
  0xf3   : > { %p2332_p2 = pnand %p692_p0, %p691_p1  ;;  %s2345_s14 = scvt.f32.s32 %s2822_s0  ;;  %v685_v16 = vsel %vm684_vm12, %v681_v59, 0.0 }
  0xf4   : > { %p1478_p7 = scmp.lt.s32.totalorder %s2306_s10, 0  ;;  %s1479_s11 = sceil.f32 %s2306_s10 }
  0xf5   : > { %s1353_s13 = scalar_select %p2332_p2, 0, 1 }
  0xf6   : > { %s698_s8 = scvt.s32.f32 %s2345_s14  ;;  %s701_s7 = sadd.s32 %s2345_s14, %s2265_s30 }
  0xf7   : > { %s702_s2 = scalar_lea.vmem %s2719_s26, %s701_s7  ;;  %s1480_s0 = sfloor.f32 %s2306_s10  ;;  %v725_v45 = vstv %s1353_s13 }
  0xf8   : > { %s699_s12 = ssub.f32 %s696_s22, %s698_s8  ;;  %v703_v30 = vld [vmem:[%s702_s2] sm:$0x3]  ;;  %v1352_v31 = vld [vmem:[%s702_s2 + $0x10] sm:$0x3]  ;;  %s2824_s11 = smov (!%p1478_p7, %s1479_s11), %s1480_s0  ;;  %vm726_vm13 = vcmp.eq.s32.totalorder %v725_v45, 1 }
  0xf9   : > { %p2365_p3 = pnand %p734_p8, %p689_p13  ;;  %s1482_s22 = scvt.f32.s32 %s2824_s11 }
  0xfa   : > { %s700_s28 = ssub.f32 1.0, %s699_s12  ;;  %v709_v32 = vstv %s699_s12  ;;  %s835_s8 = sadd.s32 4, %s2084_s23 }
  0xfb   : > { %v710_v35 = vmul.f32 %v709_v32, %v703_v30  ;;  %v717_v36 = vmul.f32 %v1352_v31, %v709_v32  ;;  %s1358_s29 = scalar_select %p2341_p10, 0, 1 }
  0xfc   : > { %v707_v39 = vstv %s700_s28  ;;  %s742_s7 = scvt.s32.f32 %s1482_s22  ;;  %s1354_s9 = sshll.u32 %s1482_s22, 4 }
  0xfd   : > { %v708_v40 = vmul.f32 %v707_v39, %v703_v30  ;;  %v712_v41 = vrot.slane %v710_v35, 1  ;;  %v716_v42 = vmul.f32 %v1352_v31, %v707_v39  ;;  %v719_v38 = vrot.slane %v717_v36, 1  ;;  %s746_s3 = sadd.s32 %s1354_s9, %s2767_s20  ;;  %p776_p4 = pneg %p2365_p3 }
  0xfe   : > { %s2388_s2 = ssub.f32 %s2306_s10, %s742_s7  ;;  %s747_s11 = sadd.s32 %s2261_s1, %s746_s3  ;;  %v771_v60 = vstv %s1358_s29 }
  0xff   : > { %v714_v49 = vadd.f32 %v712_v41, %v708_v40  ;;  %v721_v50 = vadd.f32 %v719_v38, %v716_v42  ;;  %s748_s13 = scalar_lea.vmem %s2719_s26, %s747_s11  ;;  %p2397_p11 = pnand %p776_p4, %p692_p0  ;;  %vm772_vm14 = vcmp.eq.s32.totalorder %v771_v60, 1 }
 0x100   : > { %s744_s10 = ssub.f32 1.0, %s2388_s2  ;;  %v749_v53 = vld [vmem:[%s748_s13] sm:$0x3]  ;;  %v1357_v54 = vld [vmem:[%s748_s13 + $0x10] sm:$0x3]  ;;  %s779_s1 = sadd.s32 %s2345_s14, %s746_s3  ;;  %v767_v0 = vstv %s2388_s2 }
 0x101   : > { %v715_v51 = vmul.f32 %v714_v49, %v671_v43  ;;  %v722_v52 = vmul.f32 %v721_v50, %v679_v44  ;;  %v753_v55 = vmul.f32 %v749_v53, %v663_v25  ;;  %v754_v56 = vmul.f32 %v749_v53, %v2324_v22  ;;  %s780_s0 = scalar_lea.vmem %s2719_s26, %s779_s1  ;;  %s2769_s28 = sadd.s32 3, %s2084_s23 }
 0x102   : > { %v761_v57 = vmul.f32 %v1357_v54, %v663_v25  ;;  %v762_v58 = vmul.f32 %v1357_v54, %v2324_v22  ;;  %s2410_s30 = sld [smem:[#allocation2 + %s2769_s28]]  ;;  %v781_v1 = vld [vmem:[%s780_s0] sm:$0x3]  ;;  %v1361_v2 = vld [vmem:[%s780_s0 + $0x10] sm:$0x3]  ;;  %s2770_s22 = sfloor.f32 %s2165_s21  ;;  %v759_v63 = vstv %s744_s10 }
 0x103   : > { %v723_v62 = vadd.f32 %v722_v52, %v715_v51  ;;  %s1362_s14 = scalar_select %p2397_p11, 0, 1  ;;  %v756_v3 = vrot.slane %v754_v56, 1  ;;  %v785_v5 = vmul.f32 %v781_v1, %v707_v39  ;;  %v786_v6 = vmul.f32 %v781_v1, %v709_v32 }
 0x104   : > { %v764_v4 = vrot.slane %v762_v58, 1  ;;  %s2771_s7 = sceil.f32 %s2165_s21  ;;  %v792_v8 = vmul.f32 %v1361_v2, %v707_v39  ;;  %v793_v9 = vmul.f32 %v1361_v2, %v709_v32  ;;  %s2424_s9 = sld [smem:[#allocation2 + %s835_s8]] }
 0x105   : > { %s2826_s7 = smov (!%p1483_p6, %s2771_s7), %s2770_s22  ;;  %v727_v7 = vsel %vm726_vm13, %v723_v62, 0.0  ;;  %v758_v10 = vadd.f32 %v756_v3, %v753_v55  ;;  %v788_v11 = vrot.slane %v786_v6, 1  ;;  %s2430_s21 = smul.f32 -0.57478017, %s2171_s16  ;;  %v801_v18 = vstv %s1362_s14 }
 0x106   : > { %v766_v47 = vadd.f32 %v764_v4, %v761_v57  ;;  %s1487_s24 = scvt.f32.s32 %s2826_s7  ;;  %v795_v12 = vrot.slane %v793_v9, 1  ;;  %v806_v61 = vrot.slane %v727_v7, 7  ;;  %s2433_s23 = smul.f32 -0.57478017, %s2217_s27  ;;  %vm802_vm15 = vcmp.eq.s32.totalorder %v801_v18, 1 }
 0x107   : > { %v760_v13 = vmul.f32 %v759_v63, %v758_v10  ;;  %v790_v15 = vadd.f32 %v788_v11, %v785_v5  ;;  %s2772_s2 = smov 1.0  }
 0x108   : > { %v768_v14 = vmul.f32 %v767_v0, %v766_v47  ;;  %p821_p6 = scmp.gt.s32.totalorder %s1487_s24, 0  ;;  %v797_v17 = vadd.f32 %v795_v12, %v792_v8  ;;  %p1364_p8 = scmp.lt.s32.totalorder %s1487_s24, 1  ;;  %v814_v23 = vsel %vm361_vm5, %v685_v16, %v806_v61 }
 0x109   : > { %s833_s25 = sadd.f32 1.0, %s2410_s30  ;;  %v791_v20 = vmul.f32 %v790_v15, %v759_v63 }
 0x10a   : > { %v769_v19 = vadd.f32 %v768_v14, %v760_v13  ;;  %s822_s16 = scalar_select %p821_p6, %s1487_s24, 0  ;;  %v798_v21 = vmul.f32 %v797_v17, %v767_v0 }
 0x10b   : > { %s834_s8 = smul.f32 -0.57478017, %s833_s25  ;;  %s837_s29 = sadd.f32 1.0, %s2424_s9 }
 0x10c   : > { %v773_v22 = vsel %vm772_vm14, %v769_v19, 0.0  ;;  %v799_v24 = vadd.f32 %v798_v21, %v791_v20  ;;  %s2828_s16 = smov (!%p1364_p8, %s822_s16), 1 }
 0x10d   : > { %v809_v25 = vrot.slane %v773_v22, 6  ;;  %s838_s27 = smul.f32 -0.57478017, %s837_s29  ;;  %s839_s20 = ssub.f32 %s834_s8, %s2430_s21 }
 0x10e   : > { %v803_v26 = vsel %vm802_vm15, %v799_v24, 0.0  ;;  %s1369_s22 = sshll.u32 %s2828_s16, 8 }
 0x10f   : > { %v815_v27 = vsel %vm363_vm9, %v814_v23, %v809_v25  ;;  %s840_s3 = ssub.f32 %s838_s27, %s2433_s23  ;;  %s841_s11 = smax.f32 %s2772_s2, %s839_s20  ;;  %v812_v28 = vrot.slane %v803_v26, 5 }
 0x110   : > { %s2447_s6 = smul.f32 0.5, %s841_s11 }
 0x111   : > { %s842_s17 = smax.f32 %s2772_s2, %s840_s3  ;;  %v816_v29 = vsel %vm365_vm10, %v815_v27, %v812_v28 }
 0x112   : > { %s845_s13 = smul.f32 0.5, %s842_s17  ;;  %s912_s10 = sadd.f32 %s2447_s6, %s2430_s21  ;;  %1045 = vst.msk [vmem:[%s2755_s15 + $0x8] sm:$0xf] %vm1042_vm11, %v816_v29 }
 0x113   : > { %s854_s19 = smul.f32 0.0, %s2447_s6 }
 0x114   : > { %s850_s1 = smul.f32 0.0, %s845_s13  ;;  %s954_s18 = sadd.f32 %s845_s13, %s2433_s23 }
 0x115   : > { %s852_s12 = smul.f32 0.5, %s845_s13  ;;  %s855_s0 = sadd.f32 %s854_s19, %s2430_s21 }
 0x116   : > { %s851_s28 = sadd.f32 %s850_s1, %s2433_s23  ;;  %s856_s30 = smul.f32 0.5, %s2447_s6 }
 0x117   : > { %s2460_s14 = sadd.f32 %s954_s18, %s852_s12 }
 0x118   : > { %s853_s7 = sadd.f32 %s852_s12, %s851_s28 }
 0x119   : > { %s2465_s9 = sadd.f32 %s856_s30, %s855_s0  ;;  %p956_p9 = scmp.ge.f32.partialorder %s2460_s14, -1.0 }
 0x11a   : > { %p858_p13 = scmp.ge.f32.partialorder %s853_s7, -1.0  ;;  %p859_p0 = scmp.le.f32.partialorder %s853_s7, 16.0 }
 0x11b   : > { %p862_p5 = scmp.ge.f32.partialorder %s2465_s9, -1.0  ;;  %p865_p12 = scmp.le.f32.partialorder %s2465_s9, 16.0 }
 0x11c   : > { %p2470_p1 = pnand %p859_p0, %p858_p13  ;;  %s868_s23 = smax.f32 %s2698_s5, %s853_s7 }
 0x11d   : > { %s869_s25 = smin.f32 %s2700_s4, %s868_s23  ;;  %s870_s8 = smax.f32 %s2698_s5, %s2465_s9 }
 0x11e   : > { %p861_p2 = pneg %p2470_p1  ;;  %s871_s29 = smin.f32 %s2700_s4, %s870_s8 }
 0x11f   : > { %p1488_p10 = scmp.lt.s32.totalorder %s869_s25, 0  ;;  %s1489_s27 = sceil.f32 %s869_s25 }
 0x120   : > { %p863_p7 = pnand %p862_p5, %p861_p2  ;;  %s1490_s20 = sfloor.f32 %s869_s25 }
 0x121   : > { %s2830_s27 = smov (!%p1488_p10, %s1489_s27), %s1490_s20  ;;  %p1493_p4 = scmp.lt.s32.totalorder %s871_s29, 0 }
 0x122   : > { %p864_p3 = pneg %p863_p7  ;;  %s1492_s3 = scvt.f32.s32 %s2830_s27 }
 0x123   : > { %s1494_s2 = sceil.f32 %s871_s29  ;;  %s1495_s17 = sfloor.f32 %s871_s29 }
 0x124   : > { %p2488_p11 = pnand %p865_p12, %p864_p3  ;;  %s2832_s2 = smov (!%p1493_p4, %s1494_s2), %s1495_s17 }
 0x125   : > { %s874_s13 = scvt.s32.f32 %s1492_s3  ;;  %s1370_s19 = sshll.u32 %s1492_s3, 4 }
 0x126   : > { %s2492_s1 = scvt.f32.s32 %s2832_s2  ;;  %s2496_s18 = sadd.s32 %s1370_s19, %s1369_s22 }
 0x127   : > { %s2498_s12 = ssub.f32 %s869_s25, %s874_s13  ;;  %p957_p6 = scmp.le.f32.partialorder %s2460_s14, 16.0 }
 0x128   : > { %s876_s0 = scvt.s32.f32 %s2492_s1  ;;  %s882_s28 = sadd.s32 %s2492_s1, %s2496_s18 }
 0x129   : > { %s878_s7 = ssub.f32 1.0, %s2498_s12  ;;  %s883_s27 = scalar_lea.vmem %s2719_s26, %s882_s28  ;;  %v904_v54 = vstv %s2498_s12 }
 0x12a   : > { %s877_s20 = ssub.f32 %s871_s29, %s876_s0  ;;  %p2510_p8 = pnand %p957_p6, %p956_p9  ;;  %v884_v30 = vld [vmem:[%s883_s27] sm:$0x3]  ;;  %v1373_v31 = vld [vmem:[%s883_s27 + $0x10] sm:$0x3] }
 0x12b   : > { %s1374_s25 = scalar_select %p2488_p11, 0, 1  ;;  %v896_v53 = vstv %s878_s7 }
 0x12c   : > { %s879_s2 = ssub.f32 1.0, %s877_s20  ;;  %p959_p13 = pneg %p2510_p8  ;;  %v2555_v32 = vstv %s877_s20 }
 0x12d   : > { %s2523_s17 = sadd.f32 %s912_s10, %s856_s30  ;;  %s964_s29 = smax.f32 %s2698_s5, %s2460_s14  ;;  %v891_v33 = vmul.f32 %v2555_v32, %v884_v30  ;;  %v899_v34 = vmul.f32 %v1373_v31, %v2555_v32  ;;  %v908_v62 = vstv %s1374_s25 }
 0x12e   : > { %p2532_p9 = pnand %p959_p13, %p862_p5  ;;  %s2537_s19 = smin.f32 %s2700_s4, %s964_s29  ;;  %v888_v35 = vstv %s879_s2  ;;  %vm909_vm1 = vcmp.eq.s32.totalorder %v908_v62, 1 }
 0x12f   : > { %p914_p0 = scmp.ge.f32.partialorder %s2523_s17, -1.0  ;;  %p917_p10 = scmp.le.f32.partialorder %s2523_s17, 16.0  ;;  %v889_v36 = vmul.f32 %v888_v35, %v884_v30  ;;  %v893_v37 = vrot.slane %v891_v33, 1  ;;  %v898_v39 = vmul.f32 %v1373_v31, %v888_v35  ;;  %v901_v40 = vrot.slane %v899_v34, 1 }
 0x130   : > { %s920_s21 = smax.f32 %s2698_s5, %s2523_s17  ;;  %p961_p7 = pneg %p2532_p9 }
 0x131   : > { %p2550_p5 = pnand %p914_p0, %p861_p2  ;;  %s921_s10 = smin.f32 %s2700_s4, %s920_s21  ;;  %v895_v43 = vadd.f32 %v893_v37, %v889_v36  ;;  %v903_v44 = vadd.f32 %v901_v40, %v898_v39 }
 0x132   : > { %p1498_p3 = scmp.lt.s32.totalorder %s921_s10, 0  ;;  %s1499_s5 = sceil.f32 %s921_s10 }
 0x133   : > { %p916_p4 = pneg %p2550_p5  ;;  %s1500_s30 = sfloor.f32 %s921_s10  ;;  %v897_v56 = vmul.f32 %v896_v53, %v895_v43  ;;  %v905_v57 = vmul.f32 %v904_v54, %v903_v44 }
 0x134   : > { %s2834_s5 = smov (!%p1498_p3, %s1499_s5), %s1500_s30  ;;  %p2572_p2 = pnand %p961_p7, %p865_p12 }
 0x135   : > { %p2563_p1 = pnand %p917_p10, %p916_p4  ;;  %s2576_s24 = scvt.f32.s32 %s2834_s5  ;;  %v906_v63 = vadd.f32 %v905_v57, %v897_v56 }
 0x136   : > { %p1503_p6 = scmp.lt.s32.totalorder %s2537_s19, 0  ;;  %s1504_s20 = sceil.f32 %s2537_s19 }
 0x137   : > { %s1378_s0 = scalar_select %p2563_p1, 0, 1  ;;  %v910_v26 = vsel %vm909_vm1, %v906_v63, 0.0 }
 0x138   : > { %s923_s9 = scvt.s32.f32 %s2576_s24  ;;  %s926_s28 = sadd.s32 %s2576_s24, %s2496_s18 }
 0x139   : > { %s927_s27 = scalar_lea.vmem %s2719_s26, %s926_s28  ;;  %s1505_s29 = sfloor.f32 %s2537_s19  ;;  %v950_v55 = vstv %s1378_s0 }
 0x13a   : > { %s924_s2 = ssub.f32 %s921_s10, %s923_s9  ;;  %v928_v41 = vld [vmem:[%s927_s27] sm:$0x3]  ;;  %v1377_v42 = vld [vmem:[%s927_s27 + $0x10] sm:$0x3]  ;;  %s2836_s20 = smov (!%p1503_p6, %s1504_s20), %s1505_s29  ;;  %vm951_vm0 = vcmp.eq.s32.totalorder %v950_v55, 1 }
 0x13b   : > { %p2596_p12 = pnand %p959_p13, %p914_p0  ;;  %s1507_s21 = scvt.f32.s32 %s2836_s20 }
 0x13c   : > { %s925_s13 = ssub.f32 1.0, %s924_s2  ;;  %v934_v38 = vstv %s924_s2 }
 0x13d   : > { %v935_v45 = vmul.f32 %v934_v38, %v928_v41  ;;  %v942_v46 = vmul.f32 %v1377_v42, %v934_v38  ;;  %s1383_s6 = scalar_select %p2572_p2, 0, 1 }
 0x13e   : > { %v932_v48 = vstv %s925_s13  ;;  %s967_s3 = scvt.s32.f32 %s1507_s21  ;;  %s1379_s10 = sshll.u32 %s1507_s21, 4 }
 0x13f   : > { %v933_v49 = vmul.f32 %v932_v48, %v928_v41  ;;  %v937_v50 = vrot.slane %v935_v45, 1  ;;  %v941_v51 = vmul.f32 %v1377_v42, %v932_v48  ;;  %v944_v52 = vrot.slane %v942_v46, 1  ;;  %s971_s5 = sadd.s32 %s1379_s10, %s1369_s22  ;;  %p1001_p8 = pneg %p2596_p12 }
 0x140   : > { %s2613_s30 = ssub.f32 %s2537_s19, %s967_s3  ;;  %s972_s9 = sadd.s32 %s2492_s1, %s971_s5  ;;  %v996_v19 = vstv %s1383_s6 }
 0x141   : > { %v939_v58 = vadd.f32 %v937_v50, %v933_v49  ;;  %v946_v59 = vadd.f32 %v944_v52, %v941_v51  ;;  %s973_s14 = scalar_lea.vmem %s2719_s26, %s972_s9  ;;  %p2624_p13 = pnand %p1001_p8, %p917_p10  ;;  %vm997_vm2 = vcmp.eq.s32.totalorder %v996_v19, 1 }
 0x142   : > { %s969_s22 = ssub.f32 1.0, %s2613_s30  ;;  %v974_v2 = vld [vmem:[%s973_s14] sm:$0x3]  ;;  %v1382_v3 = vld [vmem:[%s973_s14 + $0x10] sm:$0x3]  ;;  %s1004_s1 = sadd.s32 %s2576_s24, %s971_s5  ;;  %v992_v9 = vstv %s2613_s30 }
 0x143   : > { %v940_v0 = vmul.f32 %v939_v58, %v896_v53  ;;  %v947_v1 = vmul.f32 %v946_v59, %v904_v54  ;;  %v978_v4 = vmul.f32 %v974_v2, %v888_v35  ;;  %v979_v5 = vmul.f32 %v974_v2, %v2555_v32  ;;  %s1005_s17 = scalar_lea.vmem %s2719_s26, %s1004_s1 }
 0x144   : > { %v986_v6 = vmul.f32 %v1382_v3, %v888_v35  ;;  %v987_v7 = vmul.f32 %v1382_v3, %v2555_v32  ;;  %v1006_v10 = vld [vmem:[%s1005_s17] sm:$0x3]  ;;  %v1386_v47 = vld [vmem:[%s1005_s17 + $0x10] sm:$0x3]  ;;  %v984_v15 = vstv %s969_s22  ;;  %s1387_s19 = scalar_select %p2624_p13, 0, 1 }
 0x145   : > { %v948_v8 = vadd.f32 %v947_v1, %v940_v0  ;;  %v981_v60 = vrot.slane %v979_v5, 1  ;;  %v1010_v12 = vmul.f32 %v1006_v10, %v932_v48  ;;  %v1011_v13 = vmul.f32 %v1006_v10, %v934_v38 }
 0x146   : > { %v989_v11 = vrot.slane %v987_v7, 1  ;;  %v1017_v61 = vmul.f32 %v1386_v47, %v932_v48  ;;  %v1018_v16 = vmul.f32 %v1386_v47, %v934_v38  ;;  %v1026_v28 = vstv %s1387_s19 }
 0x147   : > { %v952_v14 = vsel %vm951_vm0, %v948_v8, 0.0  ;;  %v983_v17 = vadd.f32 %v981_v60, %v978_v4  ;;  %v1013_v20 = vrot.slane %v1011_v13, 1  ;;  %vm1027_vm3 = vcmp.eq.s32.totalorder %v1026_v28, 1 }
 0x148   : > { %v991_v18 = vadd.f32 %v989_v11, %v986_v6  ;;  %v1020_v21 = vrot.slane %v1018_v16, 1  ;;  %v1031_v25 = vrot.slane %v952_v14, 7 }
 0x149   : > { %v985_v22 = vmul.f32 %v984_v15, %v983_v17  ;;  %v1015_v24 = vadd.f32 %v1013_v20, %v1010_v12 }
 0x14a   : > { %v993_v23 = vmul.f32 %v992_v9, %v991_v18  ;;  %v1022_v27 = vadd.f32 %v1020_v21, %v1017_v61  ;;  %v1039_v33 = vsel %vm361_vm5, %v910_v26, %v1031_v25 }
 0x14b   : > { %v1016_v30 = vmul.f32 %v1015_v24, %v984_v15 }
 0x14c   : > { %v994_v29 = vadd.f32 %v993_v23, %v985_v22  ;;  %v1023_v31 = vmul.f32 %v1022_v27, %v992_v9 }
 0x14e   : > { %v998_v32 = vsel %vm997_vm2, %v994_v29, 0.0  ;;  %v1024_v34 = vadd.f32 %v1023_v31, %v1016_v30 }
 0x14f   : > { %v1034_v35 = vrot.slane %v998_v32, 6 }
 0x150   : > { %v1028_v36 = vsel %vm1027_vm3, %v1024_v34, 0.0 }
 0x151   : > { %v1040_v37 = vsel %vm363_vm9, %v1039_v33, %v1034_v35  ;;  %v1037_v39 = vrot.slane %v1028_v36, 5 }
 0x153   : > { %v1041_v40 = vsel %vm365_vm10, %v1040_v37, %v1037_v39 }
 0x154   : > { %1046 = vst.msk [vmem:[%s2755_s15 + $0xc] sm:$0xf] %vm1042_vm11, %v1041_v40 }
 0x155 PF: > { %s2782_s26 = sld [smem:[#allocation5_spill]] }
 0x15b   : > { %s13_s9 = sadd.s32 1, %s2782_s26  }
 0x15c   : > { %p10_p11 = scmp.ge.s32.totalorder %s13_s9, 4  }
 0x15e   :  { %12 = sbr.rel (!%p10_p11) target bundleno = 5 (0x5), region = 92 }
 0x163   :  { %1069 = vsyncpa [#allocation3], 1 }
 0x164   :  { %1071 = vsyncpa [#allocation3 + $0x1], 1 }

</bundles_post_ra>
